<compile_context>
chip_gen: v7x
topology: tpu7x:2x2x1
jax: 0.10.0
libtpu: 0.0.40
codegen_flags: <defaults>
</compile_context>

<pallas_src>
import functools

import jax
import jax.numpy as jnp
from jax.experimental import pallas as pl
from jax.experimental.pallas import tpu as pltpu


def _round_up(a, m):
    return ((a + m - 1) // m) * m


def _vmem_capacity_bytes():
    """Physical VMEM per core; conservative 64 MiB (v7x) if undeterminable."""
    try:
        info = pltpu.get_tpu_info()
        cap = getattr(info, "vmem_capacity_bytes", None)
        if cap:
            return int(cap)
    except Exception:
        pass
    return 64 * 2**20


def _compute_dtype(out_dtype):
    # bf16 gate multiply halves VALU/vreg cost of the apply on v6e/v7x; the
    # numerically sensitive conv/sigmoid stays f32.  (On v5e, which has no bf16
    # VALU, the compiler falls back to f32 math - neutral rather than faster.)
    if jnp.dtype(out_dtype) == jnp.dtype(jnp.bfloat16):
        return jnp.bfloat16
    return jnp.float32


def _zero_pad_border(pad_ref, *, H, W, P):
    """Zero only the P-wide border of the (2, H+2P, W+2P) padded scratch.

    Done per grid step (tiny) rather than gated on program_id == 0, because with
    megacore the first step executed on core 1 has program_id != 0 and would
    otherwise run with an uninitialised border in its per-core scratch.
    """
    Hp, Wp = H + 2 * P, W + 2 * P
    zrow = jnp.zeros((2, P, Wp), jnp.float32)
    zcol = jnp.zeros((2, Hp, P), jnp.float32)
    pad_ref[:, :P, :] = zrow
    pad_ref[:, P + H:, :] = zrow
    pad_ref[:, :, :P] = zcol
    pad_ref[:, :, P + W:] = zcol


def _stencil_gate(avg_view, max_view, gate_view, w_ref, b_ref, pad_ref,
                  shift_ref, *, H, W, K, n_acc):
    """gate = sigmoid(conv2d([avg, max], w) + b) for one image.

    avg_view / max_view / gate_view : (H*W,) lane-dense 1-D ref views.
    pad_ref  : (2, H+2P, W+2P) f32 scratch whose P-wide border is already zero.
    shift_ref: (2, K, H+2P, W) f32 scratch for the lane-shifted copies.
    """
    P = K // 2

    # 1) Scatter the lane-dense pooled rows into the zero-padded 2-D scratch
    #    (ref-mediated row copies; the heavy C*H*W traffic never comes here).
    for h in range(H):
        pad_ref[0, P + h, P:P + W] = avg_view[pl.ds(h * W, W)]
        pad_ref[1, P + h, P:P + W] = max_view[pl.ds(h * W, W)]

    # 2) Hoist the lane (dx) shifts out of the stencil: 2*K lane-shifted copies
    #    instead of 98 lane-unaligned reads (cuts XLU lane-crossing work ~7x).
    for c in range(2):
        for dx in range(K):
            shift_ref[c, dx] = pad_ref[c, :, dx:dx + W]

    # 3) 7x7 x 2-channel stencil: only cheap sublane (dy) offsets remain.
    #    n_acc independent accumulation chains instead of one serial vadd chain.
    accs = [jnp.zeros((H, W), jnp.float32) + b_ref[0]]
    accs += [jnp.zeros((H, W), jnp.float32) for _ in range(n_acc - 1)]
    tap = 0
    for c in range(2):
        for dy in range(K):
            for dx in range(K):
                wgt = w_ref[c * K * K + dy * K + dx]          # SMEM scalar path
                accs[tap % n_acc] = accs[tap % n_acc] + wgt * shift_ref[c, dx, dy:dy + H, :]
                tap += 1
    acc = accs[0]
    for a in accs[1:]:
        acc = acc + a
    att2d = jax.nn.sigmoid(acc)                               # (H, W) f32

    # 4) Flatten the gate back to the lane-dense layout, row by row, via the
    #    pad scratch (its centre is dead now; the zero border is untouched).
    pad_ref[0, P:P + H, P:P + W] = att2d
    for h in range(H):
        gate_view[pl.ds(h * W, W)] = pad_ref[0, P + h, P:P + W]


# ----------------- path 1: single-pass kernel (block fits VMEM) ----------------

def _spatial_attention_kernel(x_ref, w_ref, b_ref, o_ref,
                              pad_ref, shift_ref, flat_ref,
                              *, C, H, W, K, bt, n_acc):
    # x_ref / o_ref : (bt, C, H*W) lane-dense VMEM blocks
    # w_ref / b_ref : (2*K*K,) / (1,) f32 in SMEM
    # pad_ref       : (2, H+2P, W+2P) f32 scratch
    # shift_ref     : (2, K, H+2P, W) f32 scratch (lane-shifted copies)
    # flat_ref      : (3, H*W) f32 scratch -- avg / max / gate, lane-dense
    P = K // 2
    cdtype = _compute_dtype(o_ref.dtype)

    _zero_pad_border(pad_ref, H=H, W=W, P=P)

    @pl.loop(0, bt)                       # bounded live ranges / code size
    def _(bb):
        # Channel pooling: fused streaming f32 reductions over the lane-dense
        # (C, H*W) sub-block; nothing large stays live afterwards.
        flat_ref[0] = jnp.sum(x_ref[bb].astype(jnp.float32), axis=0) * (1.0 / C)
        flat_ref[1] = jnp.max(x_ref[bb].astype(jnp.float32), axis=0)

        _stencil_gate(flat_ref.at[0], flat_ref.at[1], flat_ref.at[2],
                      w_ref, b_ref, pad_ref, shift_ref,
                      H=H, W=W, K=K, n_acc=n_acc)

        # Apply the gate with one fused, lane-dense elementwise pass that
        # re-reads x from the VMEM-resident block (no long-lived f32 copy).
        gate = flat_ref[2].astype(cdtype)
        o_ref[bb] = (x_ref[bb].astype(cdtype) * gate[None, :]).astype(o_ref.dtype)


# -------------- path 2: two-pass, channel-tiled (large feature maps) -----------

def _pool_conv_kernel(x_ref, w_ref, b_ref, att_ref,
                      acc_ref, pad_ref, shift_ref,
                      *, C, H, W, K, n_acc):
    # grid = (B, C // ct); channel axis is the (trailing) reduction axis.
    ci = pl.program_id(1)
    HW = H * W
    P = K // 2

    @pl.when(ci == 0)
    def _():
        acc_ref[0] = jnp.zeros((HW,), jnp.float32)
        acc_ref[1] = jnp.full((HW,), -jnp.inf, jnp.float32)

    acc_ref[0] = acc_ref[0] + jnp.sum(x_ref[0].astype(jnp.float32), axis=0)
    acc_ref[1] = jnp.maximum(acc_ref[1], jnp.max(x_ref[0].astype(jnp.float32), axis=0))

    @pl.when(ci == pl.num_programs(1) - 1)
    def _():
        _zero_pad_border(pad_ref, H=H, W=W, P=P)
        acc_ref[0] = acc_ref[0] * (1.0 / C)          # finalise the mean
        _stencil_gate(acc_ref.at[0], acc_ref.at[1], att_ref.at[0, 0],
                      w_ref, b_ref, pad_ref, shift_ref,
                      H=H, W=W, K=K, n_acc=n_acc)


def _apply_gate_kernel(x_ref, att_ref, o_ref):
    # x_ref / o_ref: (1, ct, H*W); att_ref: (1, 1, H*W) f32.
    cdtype = _compute_dtype(o_ref.dtype)
    gate = att_ref[0, 0].astype(cdtype)
    o_ref[0] = (x_ref[0].astype(cdtype) * gate[None, :]).astype(o_ref.dtype)


# ----------------------------------- wrapper -----------------------------------

def spatial_attention(x, w, b, *, vmem_budget_bytes=None):
    """SpatialAttention forward: x * sigmoid(conv2d([mean_c(x), max_c(x)], w, b)).

    x: (B, C, H, W); w: (1, 2, K, K) conv weight (OIHW); b: (1,) conv bias.
    """
    B, C, H, W = x.shape
    K = w.shape[-1]
    P = K // 2
    assert w.shape == (1, 2, K, K) and b.shape == (1,)
    HW = H * W
    itemsize = jnp.dtype(x.dtype).itemsize

    # Conv parameters live in SMEM as flat 32-bit scalars (scalar path, resident
    # across the whole grid).
    w_flat = w.reshape(-1).astype(jnp.float32)                # (2*K*K,)
    b_flat = b.reshape(1).astype(jnp.float32)                 # (1,)

    # Lane-dense layout: flattening H*W onto the lane axis (free plumbing) turns
    # every big load/store into full 128-lane vectors instead of W(<128)-wide
    # masked partial stores -- the biggest single lever for this mem-bound op.
    x3 = x.reshape(B, C, HW)

    # ---- VMEM limit / tiling budget (generation aware; v7x only has 64 MiB) ----
    cap = _vmem_capacity_bytes()
    vmem_limit = int(max(32 * 2**20, min(cap - 16 * 2**20, 100 * 2**20)))
    Hp, Wp = H + 2 * P, W + 2 * P
    scratch_bytes = 4 * (2 * _round_up(Hp, 8) * _round_up(Wp, 128)
                         + 2 * K * _round_up(Hp, 8) * _round_up(W, 128)
                         + 3 * _round_up(HW, 128))
    if vmem_budget_bytes is None:
        budget = max(2 * 2**20, int(0.7 * (vmem_limit - scratch_bytes)))
    else:
        budget = int(vmem_budget_bytes)

    per_elem = _round_up(C, 8) * _round_up(HW, 128) * itemsize   # one batch element
    n_acc = 4 if HW <= 8192 else 2        # accumulation chains that still fit vregs

    def compiler(dims):
        return pltpu.CompilerParams(dimension_semantics=dims,
                                    vmem_limit_bytes=vmem_limit)

    # ---------------- path 1: single pass over x (2x HBM traffic) ----------------
    if 4 * per_elem <= budget:            # in + out blocks, double-buffered
        bt = min(B, max(1, budget // (4 * per_elem)))
        # Keep >= 2 grid steps (v7x megacore / DMA-compute overlap) only if the
        # halved block stays large; v5e/v6e prefer the biggest possible tiles.
        if B >= 2 and bt >= B and (B // 2) * per_elem >= 4 * 2**20:
            bt = max(1, B // 2)
        nb = pl.cdiv(B, bt)
        B_pad = nb * bt                   # non-divisor bt: pad the batch (cheap)
        xin = x3 if B_pad == B else jnp.pad(x3, ((0, B_pad - B), (0, 0), (0, 0)))

        kernel = functools.partial(_spatial_attention_kernel,
                                   C=C, H=H, W=W, K=K, bt=bt, n_acc=n_acc)
        out3 = pl.pallas_call(
            kernel,
            out_shape=jax.ShapeDtypeStruct((B_pad, C, HW), x.dtype),
            grid_spec=pltpu.PrefetchScalarGridSpec(
                num_scalar_prefetch=0,
                grid=(nb,),
                in_specs=[
                    pl.BlockSpec((bt, C, HW), lambda i: (i, 0, 0)),
                    pl.BlockSpec(memory_space=pltpu.MemorySpace.SMEM),   # conv weight
                    pl.BlockSpec(memory_space=pltpu.MemorySpace.SMEM),   # conv bias
                ],
                out_specs=pl.BlockSpec((bt, C, HW), lambda i: (i, 0, 0)),
                scratch_shapes=[
                    pltpu.VMEM((2, Hp, Wp), jnp.float32),      # padded pooled maps
                    pltpu.VMEM((2, K, Hp, W), jnp.float32),    # lane-shifted copies
                    pltpu.VMEM((3, HW), jnp.float32),          # avg / max / gate (flat)
                ]),
            compiler_params=compiler(("parallel",)),
        )(xin, w_flat, b_flat)
        return out3[:B].reshape(B, C, H, W)

    # ------------- path 2: two-pass, channel-tiled (block > VMEM budget) ---------
    # Pool + conv over channel tiles, then a lane-dense gate-apply pass.  Trades
    # one extra HBM read of x for never holding the whole (C, H*W) block in VMEM
    # and gives >= 2 grid steps even when B == 1.
    row_bytes = _round_up(HW, 128) * itemsize

    def pick_ct(frac):
        limit = max(1, int(budget * frac) // (2 * row_bytes))   # double-buffered
        cands = [d for d in range(8, C + 1, 8) if C % d == 0]   # 8-aligned sublane tiles
        if not cands:
            cands = [C]
        best = None
        for d in cands:
            if d <= limit:
                best = d
        return best if best is not None else min(cands)

    ct_a = pick_ct(0.6)
    ct_b = pick_ct(0.6)

    pool_conv = functools.partial(_pool_conv_kernel, C=C, H=H, W=W, K=K, n_acc=n_acc)
    att = pl.pallas_call(
        pool_conv,
        out_shape=jax.ShapeDtypeStruct((B, 1, HW), jnp.float32),
        grid_spec=pltpu.PrefetchScalarGridSpec(
            num_scalar_prefetch=0,
            grid=(B, C // ct_a),
            in_specs=[
                pl.BlockSpec((1, ct_a, HW), lambda bi, ci: (bi, ci, 0)),
                pl.BlockSpec(memory_space=pltpu.MemorySpace.SMEM),
                pl.BlockSpec(memory_space=pltpu.MemorySpace.SMEM),
            ],
            out_specs=pl.BlockSpec((1, 1, HW), lambda bi, ci: (bi, 0, 0)),
            scratch_shapes=[
                pltpu.VMEM((2, HW), jnp.float32),              # running sum / max
                pltpu.VMEM((2, Hp, Wp), jnp.float32),
                pltpu.VMEM((2, K, Hp, W), jnp.float32),
            ]),
        compiler_params=compiler(("parallel", "arbitrary")),
    )(x3, w_flat, b_flat)

    out3 = pl.pallas_call(
        _apply_gate_kernel,
        out_shape=jax.ShapeDtypeStruct((B, C, HW), x.dtype),
        grid_spec=pltpu.PrefetchScalarGridSpec(
            num_scalar_prefetch=0,
            grid=(B, C // ct_b),
            in_specs=[
                pl.BlockSpec((1, ct_b, HW), lambda bi, ci: (bi, ci, 0)),
                pl.BlockSpec((1, 1, HW), lambda bi, ci: (bi, 0, 0)),
            ],
            out_specs=pl.BlockSpec((1, ct_b, HW), lambda bi, ci: (bi, ci, 0))),
        compiler_params=compiler(("parallel", "parallel")),
    )(x3, att)
    return out3.reshape(B, C, H, W)


def spatial_attention_ref(x, w, b):
    """Pure-JAX reference matching the PyTorch module."""
    xf = x.astype(jnp.float32)
    avg = jnp.mean(xf, axis=1, keepdims=True)
    mx = jnp.max(xf, axis=1, keepdims=True)
    pooled = jnp.concatenate([avg, mx], axis=1)                 # (B, 2, H, W)
    att = jax.lax.conv_general_dilated(
        pooled, w.astype(jnp.float32),
        window_strides=(1, 1), padding="SAME",
        dimension_numbers=("NCHW", "OIHW", "NCHW"))
    att = jax.nn.sigmoid(att + b.reshape(1, -1, 1, 1))          # (B, 1, H, W)
    return (xf * att).astype(x.dtype)


if __name__ == "__main__":
    key = jax.random.PRNGKey(0)
    kx, kw, kb, kx2 = jax.random.split(key, 4)
    K = 7
    # nn.Conv2d(2, 1, 7, padding=3): weight (1, 2, 7, 7), bias (1,)
    w = jax.random.normal(kw, (1, 2, K, K), dtype=jnp.float32) * 0.1
    b = jax.random.normal(kb, (1,), dtype=jnp.float32) * 0.1

    # Path 1: single-pass kernel (whole block fits VMEM).
    B, C, H, W = 2, 4, 16, 16
    x = jax.random.normal(kx, (B, C, H, W), dtype=jnp.float32)
    out = jax.block_until_ready(spatial_attention(x, w, b))
    ref = spatial_attention_ref(x, w, b)
    assert out.shape == (B, C, H, W)
    assert jnp.allclose(out, ref, atol=2e-5, rtol=2e-5), float(jnp.max(jnp.abs(out - ref)))

    # Path 2: channel-tiled two-pass kernels (the path large SAM2 maps take),
    # exercised here by forcing a tiny VMEM budget.
    x2 = jax.random.normal(kx2, (2, 16, 16, 16), dtype=jnp.float32)
    out2 = jax.block_until_ready(
        spatial_attention(x2, w, b, vmem_budget_bytes=32 * 1024))
    ref2 = spatial_attention_ref(x2, w, b)
    assert jnp.allclose(out2, ref2, atol=2e-5, rtol=2e-5), float(jnp.max(jnp.abs(out2 - ref2)))

    print("KERNEL_OK")
</pallas_src>

<mosaic_0001>
module attributes {stable_mosaic.version = 11 : i64} {
  func.func @_spatial_attention_kernel(%arg0: i32, %arg1: memref<2x4x256xf32, #tpu.memory_space<vmem>>, %arg2: memref<98xf32, #tpu.memory_space<smem>>, %arg3: memref<1xf32, #tpu.memory_space<smem>>, %arg4: memref<2x4x256xf32, #tpu.memory_space<vmem>>, %arg5: memref<2x22x22xf32, #tpu.memory_space<vmem>>, %arg6: memref<2x7x22x16xf32, #tpu.memory_space<vmem>>, %arg7: memref<3x256xf32, #tpu.memory_space<vmem>>) attributes {dimension_semantics = [#tpu.dimension_semantics<parallel>], iteration_bounds = array<i64: 1>, scalar_prefetch = 0 : i64, scratch_operands = 3 : i64, tpu.core_type = #tpu.core_type<tc>, window_params = [{transform_indices = @transform_0, window_bounds = array<i64: 2, 4, 256>}, {transform_indices = @transform_1, window_bounds = array<i64: 98>}, {transform_indices = @transform_2, window_bounds = array<i64: 1>}, {transform_indices = @transform_3, window_bounds = array<i64: 2, 4, 256>}]} {
    %cst = arith.constant 0.000000e+00 : f32
    %0 = vector.broadcast %cst : f32 to vector<2x3x22xf32>
    %cst_0 = arith.constant 0.000000e+00 : f32
    %1 = vector.broadcast %cst_0 : f32 to vector<2x22x3xf32>
    %c0 = arith.constant 0 : index
    %c0_1 = arith.constant 0 : index
    %c0_2 = arith.constant 0 : index
    %2 = vector.load %arg5[%c0, %c0_1, %c0_2] : memref<2x22x22xf32, #tpu.memory_space<vmem>>, vector<2x3x22xf32>
    tpu.vector_store %arg5[%c0, %c0_1, %c0_2], %0 {strides = array<i32>} : memref<2x22x22xf32, #tpu.memory_space<vmem>>, vector<2x3x22xf32>,
    %c0_3 = arith.constant 0 : index
    %c19 = arith.constant 19 : index
    %c0_4 = arith.constant 0 : index
    %3 = vector.load %arg5[%c0_3, %c19, %c0_4] : memref<2x22x22xf32, #tpu.memory_space<vmem>>, vector<2x3x22xf32>
    tpu.vector_store %arg5[%c0_3, %c19, %c0_4], %0 {strides = array<i32>} : memref<2x22x22xf32, #tpu.memory_space<vmem>>, vector<2x3x22xf32>,
    %c0_5 = arith.constant 0 : index
    %c0_6 = arith.constant 0 : index
    %c0_7 = arith.constant 0 : index
    %4 = vector.load %arg5[%c0_5, %c0_6, %c0_7] : memref<2x22x22xf32, #tpu.memory_space<vmem>>, vector<2x22x3xf32>
    tpu.vector_store %arg5[%c0_5, %c0_6, %c0_7], %1 {strides = array<i32>} : memref<2x22x22xf32, #tpu.memory_space<vmem>>, vector<2x22x3xf32>,
    %c0_8 = arith.constant 0 : index
    %c0_9 = arith.constant 0 : index
    %c19_10 = arith.constant 19 : index
    %5 = vector.load %arg5[%c0_8, %c0_9, %c19_10] : memref<2x22x22xf32, #tpu.memory_space<vmem>>, vector<2x22x3xf32>
    tpu.vector_store %arg5[%c0_8, %c0_9, %c19_10], %1 {strides = array<i32>} : memref<2x22x22xf32, #tpu.memory_space<vmem>>, vector<2x22x3xf32>,
    %c0_i32 = arith.constant 0 : i32
    %c2_i32 = arith.constant 2 : i32
    %6 = arith.addi %c0_i32, %c2_i32 : i32
    %c1_i32 = arith.constant 1 : i32
    scf.for %arg8 = %c0_i32 to %6 step %c1_i32  : i32 {
      %c1_i32_12 = arith.constant 1 : i32
      %7 = arith.muli %arg8, %c1_i32_12 : i32
      %c0_i32_13 = arith.constant 0 : i32
      %8 = arith.addi %c0_i32_13, %7 : i32
      %9 = arith.index_cast %8 : i32 to index
      %c0_14 = arith.constant 0 : index
      %c0_15 = arith.constant 0 : index
      %10 = vector.load %arg1[%9, %c0_14, %c0_15] : memref<2x4x256xf32, #tpu.memory_space<vmem>>, vector<1x4x256xf32>
      %11 = vector.shape_cast %10 : vector<1x4x256xf32> to vector<4x256xf32>
      %cst_16 = arith.constant dense<0.000000e+00> : vector<256xf32>
      %12 = vector.multi_reduction <add>, %11, %cst_16 [0] : vector<4x256xf32> to vector<256xf32>
      %cst_17 = arith.constant 2.500000e-01 : f32
      %13 = vector.broadcast %cst_17 : f32 to vector<256xf32>
      %14 = arith.mulf %12, %13 : vector<256xf32>
      %c0_18 = arith.constant 0 : index
      %c0_19 = arith.constant 0 : index
      %15 = vector.load %arg7[%c0_18, %c0_19] : memref<3x256xf32, #tpu.memory_space<vmem>>, vector<1x256xf32>
      %16 = vector.shape_cast %15 : vector<1x256xf32> to vector<256xf32>
      %17 = vector.shape_cast %14 : vector<256xf32> to vector<1x256xf32>
      tpu.vector_store %arg7[%c0_18, %c0_19], %17 {strides = array<i32>} : memref<3x256xf32, #tpu.memory_space<vmem>>, vector<1x256xf32>,
      %18 = arith.index_cast %8 : i32 to index
      %c0_20 = arith.constant 0 : index
      %c0_21 = arith.constant 0 : index
      %19 = vector.load %arg1[%18, %c0_20, %c0_21] : memref<2x4x256xf32, #tpu.memory_space<vmem>>, vector<1x4x256xf32>
      %20 = vector.shape_cast %19 : vector<1x4x256xf32> to vector<4x256xf32>
      %cst_22 = arith.constant dense<0xFF800000> : vector<256xf32>
      %21 = vector.multi_reduction <maximumf>, %20, %cst_22 [0] : vector<4x256xf32> to vector<256xf32>
      %c1 = arith.constant 1 : index
      %c0_23 = arith.constant 0 : index
      %22 = vector.load %arg7[%c1, %c0_23] : memref<3x256xf32, #tpu.memory_space<vmem>>, vector<1x256xf32>
      %23 = vector.shape_cast %22 : vector<1x256xf32> to vector<256xf32>
      %24 = vector.shape_cast %21 : vector<256xf32> to vector<1x256xf32>
      tpu.vector_store %arg7[%c1, %c0_23], %24 {strides = array<i32>} : memref<3x256xf32, #tpu.memory_space<vmem>>, vector<1x256xf32>,
      %c0_i32_24 = arith.constant 0 : i32
      %c0_i32_25 = arith.constant 0 : i32
      %25 = tpu.memref_slice %arg7[%c0_i32_24, %c0_i32_25] : memref<3x256xf32, #tpu.memory_space<vmem>> -> memref<1x256xf32, #tpu.memory_space<vmem>>
      %26 = tpu.memref_squeeze %25 : memref<1x256xf32, #tpu.memory_space<vmem>> -> memref<256xf32, #tpu.memory_space<vmem>>
      %c0_26 = arith.constant 0 : index
      %27 = vector.load %26[%c0_26] : memref<256xf32, #tpu.memory_space<vmem>>, vector<16xf32>
      %c0_27 = arith.constant 0 : index
      %c3 = arith.constant 3 : index
      %c3_28 = arith.constant 3 : index
      %28 = vector.load %arg5[%c0_27, %c3, %c3_28] : memref<2x22x22xf32, #tpu.memory_space<vmem>>, vector<1x1x16xf32>
      %29 = vector.shape_cast %28 : vector<1x1x16xf32> to vector<16xf32>
      %30 = vector.shape_cast %27 : vector<16xf32> to vector<1x1x16xf32>
      tpu.vector_store %arg5[%c0_27, %c3, %c3_28], %30 {strides = array<i32>} : memref<2x22x22xf32, #tpu.memory_space<vmem>>, vector<1x1x16xf32>,
      %c1_i32_29 = arith.constant 1 : i32
      %c0_i32_30 = arith.constant 0 : i32
      %31 = tpu.memref_slice %arg7[%c1_i32_29, %c0_i32_30] : memref<3x256xf32, #tpu.memory_space<vmem>> -> memref<1x256xf32, #tpu.memory_space<vmem>>
      %32 = tpu.memref_squeeze %31 : memref<1x256xf32, #tpu.memory_space<vmem>> -> memref<256xf32, #tpu.memory_space<vmem>>
      %c0_31 = arith.constant 0 : index
      %33 = vector.load %32[%c0_31] : memref<256xf32, #tpu.memory_space<vmem>>, vector<16xf32>
      %c1_32 = arith.constant 1 : index
      %c3_33 = arith.constant 3 : index
      %c3_34 = arith.constant 3 : index
      %34 = vector.load %arg5[%c1_32, %c3_33, %c3_34] : memref<2x22x22xf32, #tpu.memory_space<vmem>>, vector<1x1x16xf32>
      %35 = vector.shape_cast %34 : vector<1x1x16xf32> to vector<16xf32>
      %36 = vector.shape_cast %33 : vector<16xf32> to vector<1x1x16xf32>
      tpu.vector_store %arg5[%c1_32, %c3_33, %c3_34], %36 {strides = array<i32>} : memref<2x22x22xf32, #tpu.memory_space<vmem>>, vector<1x1x16xf32>,
      %c0_i32_35 = arith.constant 0 : i32
      %c0_i32_36 = arith.constant 0 : i32
      %37 = tpu.memref_slice %arg7[%c0_i32_35, %c0_i32_36] : memref<3x256xf32, #tpu.memory_space<vmem>> -> memref<1x256xf32, #tpu.memory_space<vmem>>
      %38 = tpu.memref_squeeze %37 : memref<1x256xf32, #tpu.memory_space<vmem>> -> memref<256xf32, #tpu.memory_space<vmem>>
      %c16 = arith.constant 16 : index
      %39 = vector.load %38[%c16] : memref<256xf32, #tpu.memory_space<vmem>>, vector<16xf32>
      %c0_37 = arith.constant 0 : index
      %c4 = arith.constant 4 : index
      %c3_38 = arith.constant 3 : index
      %40 = vector.load %arg5[%c0_37, %c4, %c3_38] : memref<2x22x22xf32, #tpu.memory_space<vmem>>, vector<1x1x16xf32>
      %41 = vector.shape_cast %40 : vector<1x1x16xf32> to vector<16xf32>
      %42 = vector.shape_cast %39 : vector<16xf32> to vector<1x1x16xf32>
      tpu.vector_store %arg5[%c0_37, %c4, %c3_38], %42 {strides = array<i32>} : memref<2x22x22xf32, #tpu.memory_space<vmem>>, vector<1x1x16xf32>,
      %c1_i32_39 = arith.constant 1 : i32
      %c0_i32_40 = arith.constant 0 : i32
      %43 = tpu.memref_slice %arg7[%c1_i32_39, %c0_i32_40] : memref<3x256xf32, #tpu.memory_space<vmem>> -> memref<1x256xf32, #tpu.memory_space<vmem>>
      %44 = tpu.memref_squeeze %43 : memref<1x256xf32, #tpu.memory_space<vmem>> -> memref<256xf32, #tpu.memory_space<vmem>>
      %c16_41 = arith.constant 16 : index
      %45 = vector.load %44[%c16_41] : memref<256xf32, #tpu.memory_space<vmem>>, vector<16xf32>
      %c1_42 = arith.constant 1 : index
      %c4_43 = arith.constant 4 : index
      %c3_44 = arith.constant 3 : index
      %46 = vector.load %arg5[%c1_42, %c4_43, %c3_44] : memref<2x22x22xf32, #tpu.memory_space<vmem>>, vector<1x1x16xf32>
      %47 = vector.shape_cast %46 : vector<1x1x16xf32> to vector<16xf32>
      %48 = vector.shape_cast %45 : vector<16xf32> to vector<1x1x16xf32>
      tpu.vector_store %arg5[%c1_42, %c4_43, %c3_44], %48 {strides = array<i32>} : memref<2x22x22xf32, #tpu.memory_space<vmem>>, vector<1x1x16xf32>,
      %c0_i32_45 = arith.constant 0 : i32
      %c0_i32_46 = arith.constant 0 : i32
      %49 = tpu.memref_slice %arg7[%c0_i32_45, %c0_i32_46] : memref<3x256xf32, #tpu.memory_space<vmem>> -> memref<1x256xf32, #tpu.memory_space<vmem>>
      %50 = tpu.memref_squeeze %49 : memref<1x256xf32, #tpu.memory_space<vmem>> -> memref<256xf32, #tpu.memory_space<vmem>>
      %c32 = arith.constant 32 : index
      %51 = vector.load %50[%c32] : memref<256xf32, #tpu.memory_space<vmem>>, vector<16xf32>
      %c0_47 = arith.constant 0 : index
      %c5 = arith.constant 5 : index
      %c3_48 = arith.constant 3 : index
      %52 = vector.load %arg5[%c0_47, %c5, %c3_48] : memref<2x22x22xf32, #tpu.memory_space<vmem>>, vector<1x1x16xf32>
      %53 = vector.shape_cast %52 : vector<1x1x16xf32> to vector<16xf32>
      %54 = vector.shape_cast %51 : vector<16xf32> to vector<1x1x16xf32>
      tpu.vector_store %arg5[%c0_47, %c5, %c3_48], %54 {strides = array<i32>} : memref<2x22x22xf32, #tpu.memory_space<vmem>>, vector<1x1x16xf32>,
      %c1_i32_49 = arith.constant 1 : i32
      %c0_i32_50 = arith.constant 0 : i32
      %55 = tpu.memref_slice %arg7[%c1_i32_49, %c0_i32_50] : memref<3x256xf32, #tpu.memory_space<vmem>> -> memref<1x256xf32, #tpu.memory_space<vmem>>
      %56 = tpu.memref_squeeze %55 : memref<1x256xf32, #tpu.memory_space<vmem>> -> memref<256xf32, #tpu.memory_space<vmem>>
      %c32_51 = arith.constant 32 : index
      %57 = vector.load %56[%c32_51] : memref<256xf32, #tpu.memory_space<vmem>>, vector<16xf32>
      %c1_52 = arith.constant 1 : index
      %c5_53 = arith.constant 5 : index
      %c3_54 = arith.constant 3 : index
      %58 = vector.load %arg5[%c1_52, %c5_53, %c3_54] : memref<2x22x22xf32, #tpu.memory_space<vmem>>, vector<1x1x16xf32>
      %59 = vector.shape_cast %58 : vector<1x1x16xf32> to vector<16xf32>
      %60 = vector.shape_cast %57 : vector<16xf32> to vector<1x1x16xf32>
      tpu.vector_store %arg5[%c1_52, %c5_53, %c3_54], %60 {strides = array<i32>} : memref<2x22x22xf32, #tpu.memory_space<vmem>>, vector<1x1x16xf32>,
      %c0_i32_55 = arith.constant 0 : i32
      %c0_i32_56 = arith.constant 0 : i32
      %61 = tpu.memref_slice %arg7[%c0_i32_55, %c0_i32_56] : memref<3x256xf32, #tpu.memory_space<vmem>> -> memref<1x256xf32, #tpu.memory_space<vmem>>
      %62 = tpu.memref_squeeze %61 : memref<1x256xf32, #tpu.memory_space<vmem>> -> memref<256xf32, #tpu.memory_space<vmem>>
      %c48 = arith.constant 48 : index
      %63 = vector.load %62[%c48] : memref<256xf32, #tpu.memory_space<vmem>>, vector<16xf32>
      %c0_57 = arith.constant 0 : index
      %c6 = arith.constant 6 : index
      %c3_58 = arith.constant 3 : index
      %64 = vector.load %arg5[%c0_57, %c6, %c3_58] : memref<2x22x22xf32, #tpu.memory_space<vmem>>, vector<1x1x16xf32>
      %65 = vector.shape_cast %64 : vector<1x1x16xf32> to vector<16xf32>
      %66 = vector.shape_cast %63 : vector<16xf32> to vector<1x1x16xf32>
      tpu.vector_store %arg5[%c0_57, %c6, %c3_58], %66 {strides = array<i32>} : memref<2x22x22xf32, #tpu.memory_space<vmem>>, vector<1x1x16xf32>,
      %c1_i32_59 = arith.constant 1 : i32
      %c0_i32_60 = arith.constant 0 : i32
      %67 = tpu.memref_slice %arg7[%c1_i32_59, %c0_i32_60] : memref<3x256xf32, #tpu.memory_space<vmem>> -> memref<1x256xf32, #tpu.memory_space<vmem>>
      %68 = tpu.memref_squeeze %67 : memref<1x256xf32, #tpu.memory_space<vmem>> -> memref<256xf32, #tpu.memory_space<vmem>>
      %c48_61 = arith.constant 48 : index
      %69 = vector.load %68[%c48_61] : memref<256xf32, #tpu.memory_space<vmem>>, vector<16xf32>
      %c1_62 = arith.constant 1 : index
      %c6_63 = arith.constant 6 : index
      %c3_64 = arith.constant 3 : index
      %70 = vector.load %arg5[%c1_62, %c6_63, %c3_64] : memref<2x22x22xf32, #tpu.memory_space<vmem>>, vector<1x1x16xf32>
      %71 = vector.shape_cast %70 : vector<1x1x16xf32> to vector<16xf32>
      %72 = vector.shape_cast %69 : vector<16xf32> to vector<1x1x16xf32>
      tpu.vector_store %arg5[%c1_62, %c6_63, %c3_64], %72 {strides = array<i32>} : memref<2x22x22xf32, #tpu.memory_space<vmem>>, vector<1x1x16xf32>,
      %c0_i32_65 = arith.constant 0 : i32
      %c0_i32_66 = arith.constant 0 : i32
      %73 = tpu.memref_slice %arg7[%c0_i32_65, %c0_i32_66] : memref<3x256xf32, #tpu.memory_space<vmem>> -> memref<1x256xf32, #tpu.memory_space<vmem>>
      %74 = tpu.memref_squeeze %73 : memref<1x256xf32, #tpu.memory_space<vmem>> -> memref<256xf32, #tpu.memory_space<vmem>>
      %c64 = arith.constant 64 : index
      %75 = vector.load %74[%c64] : memref<256xf32, #tpu.memory_space<vmem>>, vector<16xf32>
      %c0_67 = arith.constant 0 : index
      %c7 = arith.constant 7 : index
      %c3_68 = arith.constant 3 : index
      %76 = vector.load %arg5[%c0_67, %c7, %c3_68] : memref<2x22x22xf32, #tpu.memory_space<vmem>>, vector<1x1x16xf32>
      %77 = vector.shape_cast %76 : vector<1x1x16xf32> to vector<16xf32>
      %78 = vector.shape_cast %75 : vector<16xf32> to vector<1x1x16xf32>
      tpu.vector_store %arg5[%c0_67, %c7, %c3_68], %78 {strides = array<i32>} : memref<2x22x22xf32, #tpu.memory_space<vmem>>, vector<1x1x16xf32>,
      %c1_i32_69 = arith.constant 1 : i32
      %c0_i32_70 = arith.constant 0 : i32
      %79 = tpu.memref_slice %arg7[%c1_i32_69, %c0_i32_70] : memref<3x256xf32, #tpu.memory_space<vmem>> -> memref<1x256xf32, #tpu.memory_space<vmem>>
      %80 = tpu.memref_squeeze %79 : memref<1x256xf32, #tpu.memory_space<vmem>> -> memref<256xf32, #tpu.memory_space<vmem>>
      %c64_71 = arith.constant 64 : index
      %81 = vector.load %80[%c64_71] : memref<256xf32, #tpu.memory_space<vmem>>, vector<16xf32>
      %c1_72 = arith.constant 1 : index
      %c7_73 = arith.constant 7 : index
      %c3_74 = arith.constant 3 : index
      %82 = vector.load %arg5[%c1_72, %c7_73, %c3_74] : memref<2x22x22xf32, #tpu.memory_space<vmem>>, vector<1x1x16xf32>
      %83 = vector.shape_cast %82 : vector<1x1x16xf32> to vector<16xf32>
      %84 = vector.shape_cast %81 : vector<16xf32> to vector<1x1x16xf32>
      tpu.vector_store %arg5[%c1_72, %c7_73, %c3_74], %84 {strides = array<i32>} : memref<2x22x22xf32, #tpu.memory_space<vmem>>, vector<1x1x16xf32>,
      %c0_i32_75 = arith.constant 0 : i32
      %c0_i32_76 = arith.constant 0 : i32
      %85 = tpu.memref_slice %arg7[%c0_i32_75, %c0_i32_76] : memref<3x256xf32, #tpu.memory_space<vmem>> -> memref<1x256xf32, #tpu.memory_space<vmem>>
      %86 = tpu.memref_squeeze %85 : memref<1x256xf32, #tpu.memory_space<vmem>> -> memref<256xf32, #tpu.memory_space<vmem>>
      %c80 = arith.constant 80 : index
      %87 = vector.load %86[%c80] : memref<256xf32, #tpu.memory_space<vmem>>, vector<16xf32>
      %c0_77 = arith.constant 0 : index
      %c8 = arith.constant 8 : index
      %c3_78 = arith.constant 3 : index
      %88 = vector.load %arg5[%c0_77, %c8, %c3_78] : memref<2x22x22xf32, #tpu.memory_space<vmem>>, vector<1x1x16xf32>
      %89 = vector.shape_cast %88 : vector<1x1x16xf32> to vector<16xf32>
      %90 = vector.shape_cast %87 : vector<16xf32> to vector<1x1x16xf32>
      tpu.vector_store %arg5[%c0_77, %c8, %c3_78], %90 {strides = array<i32>} : memref<2x22x22xf32, #tpu.memory_space<vmem>>, vector<1x1x16xf32>,
      %c1_i32_79 = arith.constant 1 : i32
      %c0_i32_80 = arith.constant 0 : i32
      %91 = tpu.memref_slice %arg7[%c1_i32_79, %c0_i32_80] : memref<3x256xf32, #tpu.memory_space<vmem>> -> memref<1x256xf32, #tpu.memory_space<vmem>>
      %92 = tpu.memref_squeeze %91 : memref<1x256xf32, #tpu.memory_space<vmem>> -> memref<256xf32, #tpu.memory_space<vmem>>
      %c80_81 = arith.constant 80 : index
      %93 = vector.load %92[%c80_81] : memref<256xf32, #tpu.memory_space<vmem>>, vector<16xf32>
      %c1_82 = arith.constant 1 : index
      %c8_83 = arith.constant 8 : index
      %c3_84 = arith.constant 3 : index
      %94 = vector.load %arg5[%c1_82, %c8_83, %c3_84] : memref<2x22x22xf32, #tpu.memory_space<vmem>>, vector<1x1x16xf32>
      %95 = vector.shape_cast %94 : vector<1x1x16xf32> to vector<16xf32>
      %96 = vector.shape_cast %93 : vector<16xf32> to vector<1x1x16xf32>
      tpu.vector_store %arg5[%c1_82, %c8_83, %c3_84], %96 {strides = array<i32>} : memref<2x22x22xf32, #tpu.memory_space<vmem>>, vector<1x1x16xf32>,
      %c0_i32_85 = arith.constant 0 : i32
      %c0_i32_86 = arith.constant 0 : i32
      %97 = tpu.memref_slice %arg7[%c0_i32_85, %c0_i32_86] : memref<3x256xf32, #tpu.memory_space<vmem>> -> memref<1x256xf32, #tpu.memory_space<vmem>>
      %98 = tpu.memref_squeeze %97 : memref<1x256xf32, #tpu.memory_space<vmem>> -> memref<256xf32, #tpu.memory_space<vmem>>
      %c96 = arith.constant 96 : index
      %99 = vector.load %98[%c96] : memref<256xf32, #tpu.memory_space<vmem>>, vector<16xf32>
      %c0_87 = arith.constant 0 : index
      %c9 = arith.constant 9 : index
      %c3_88 = arith.constant 3 : index
      %100 = vector.load %arg5[%c0_87, %c9, %c3_88] : memref<2x22x22xf32, #tpu.memory_space<vmem>>, vector<1x1x16xf32>
      %101 = vector.shape_cast %100 : vector<1x1x16xf32> to vector<16xf32>
      %102 = vector.shape_cast %99 : vector<16xf32> to vector<1x1x16xf32>
      tpu.vector_store %arg5[%c0_87, %c9, %c3_88], %102 {strides = array<i32>} : memref<2x22x22xf32, #tpu.memory_space<vmem>>, vector<1x1x16xf32>,
      %c1_i32_89 = arith.constant 1 : i32
      %c0_i32_90 = arith.constant 0 : i32
      %103 = tpu.memref_slice %arg7[%c1_i32_89, %c0_i32_90] : memref<3x256xf32, #tpu.memory_space<vmem>> -> memref<1x256xf32, #tpu.memory_space<vmem>>
      %104 = tpu.memref_squeeze %103 : memref<1x256xf32, #tpu.memory_space<vmem>> -> memref<256xf32, #tpu.memory_space<vmem>>
      %c96_91 = arith.constant 96 : index
      %105 = vector.load %104[%c96_91] : memref<256xf32, #tpu.memory_space<vmem>>, vector<16xf32>
      %c1_92 = arith.constant 1 : index
      %c9_93 = arith.constant 9 : index
      %c3_94 = arith.constant 3 : index
      %106 = vector.load %arg5[%c1_92, %c9_93, %c3_94] : memref<2x22x22xf32, #tpu.memory_space<vmem>>, vector<1x1x16xf32>
      %107 = vector.shape_cast %106 : vector<1x1x16xf32> to vector<16xf32>
      %108 = vector.shape_cast %105 : vector<16xf32> to vector<1x1x16xf32>
      tpu.vector_store %arg5[%c1_92, %c9_93, %c3_94], %108 {strides = array<i32>} : memref<2x22x22xf32, #tpu.memory_space<vmem>>, vector<1x1x16xf32>,
      %c0_i32_95 = arith.constant 0 : i32
      %c0_i32_96 = arith.constant 0 : i32
      %109 = tpu.memref_slice %arg7[%c0_i32_95, %c0_i32_96] : memref<3x256xf32, #tpu.memory_space<vmem>> -> memref<1x256xf32, #tpu.memory_space<vmem>>
      %110 = tpu.memref_squeeze %109 : memref<1x256xf32, #tpu.memory_space<vmem>> -> memref<256xf32, #tpu.memory_space<vmem>>
      %c112 = arith.constant 112 : index
      %111 = vector.load %110[%c112] : memref<256xf32, #tpu.memory_space<vmem>>, vector<16xf32>
      %c0_97 = arith.constant 0 : index
      %c10 = arith.constant 10 : index
      %c3_98 = arith.constant 3 : index
      %112 = vector.load %arg5[%c0_97, %c10, %c3_98] : memref<2x22x22xf32, #tpu.memory_space<vmem>>, vector<1x1x16xf32>
      %113 = vector.shape_cast %112 : vector<1x1x16xf32> to vector<16xf32>
      %114 = vector.shape_cast %111 : vector<16xf32> to vector<1x1x16xf32>
      tpu.vector_store %arg5[%c0_97, %c10, %c3_98], %114 {strides = array<i32>} : memref<2x22x22xf32, #tpu.memory_space<vmem>>, vector<1x1x16xf32>,
      %c1_i32_99 = arith.constant 1 : i32
      %c0_i32_100 = arith.constant 0 : i32
      %115 = tpu.memref_slice %arg7[%c1_i32_99, %c0_i32_100] : memref<3x256xf32, #tpu.memory_space<vmem>> -> memref<1x256xf32, #tpu.memory_space<vmem>>
      %116 = tpu.memref_squeeze %115 : memref<1x256xf32, #tpu.memory_space<vmem>> -> memref<256xf32, #tpu.memory_space<vmem>>
      %c112_101 = arith.constant 112 : index
      %117 = vector.load %116[%c112_101] : memref<256xf32, #tpu.memory_space<vmem>>, vector<16xf32>
      %c1_102 = arith.constant 1 : index
      %c10_103 = arith.constant 10 : index
      %c3_104 = arith.constant 3 : index
      %118 = vector.load %arg5[%c1_102, %c10_103, %c3_104] : memref<2x22x22xf32, #tpu.memory_space<vmem>>, vector<1x1x16xf32>
      %119 = vector.shape_cast %118 : vector<1x1x16xf32> to vector<16xf32>
      %120 = vector.shape_cast %117 : vector<16xf32> to vector<1x1x16xf32>
      tpu.vector_store %arg5[%c1_102, %c10_103, %c3_104], %120 {strides = array<i32>} : memref<2x22x22xf32, #tpu.memory_space<vmem>>, vector<1x1x16xf32>,
      %c0_i32_105 = arith.constant 0 : i32
      %c0_i32_106 = arith.constant 0 : i32
      %121 = tpu.memref_slice %arg7[%c0_i32_105, %c0_i32_106] : memref<3x256xf32, #tpu.memory_space<vmem>> -> memref<1x256xf32, #tpu.memory_space<vmem>>
      %122 = tpu.memref_squeeze %121 : memref<1x256xf32, #tpu.memory_space<vmem>> -> memref<256xf32, #tpu.memory_space<vmem>>
      %c128 = arith.constant 128 : index
      %123 = vector.load %122[%c128] : memref<256xf32, #tpu.memory_space<vmem>>, vector<16xf32>
      %c0_107 = arith.constant 0 : index
      %c11 = arith.constant 11 : index
      %c3_108 = arith.constant 3 : index
      %124 = vector.load %arg5[%c0_107, %c11, %c3_108] : memref<2x22x22xf32, #tpu.memory_space<vmem>>, vector<1x1x16xf32>
      %125 = vector.shape_cast %124 : vector<1x1x16xf32> to vector<16xf32>
      %126 = vector.shape_cast %123 : vector<16xf32> to vector<1x1x16xf32>
      tpu.vector_store %arg5[%c0_107, %c11, %c3_108], %126 {strides = array<i32>} : memref<2x22x22xf32, #tpu.memory_space<vmem>>, vector<1x1x16xf32>,
      %c1_i32_109 = arith.constant 1 : i32
      %c0_i32_110 = arith.constant 0 : i32
      %127 = tpu.memref_slice %arg7[%c1_i32_109, %c0_i32_110] : memref<3x256xf32, #tpu.memory_space<vmem>> -> memref<1x256xf32, #tpu.memory_space<vmem>>
      %128 = tpu.memref_squeeze %127 : memref<1x256xf32, #tpu.memory_space<vmem>> -> memref<256xf32, #tpu.memory_space<vmem>>
      %c128_111 = arith.constant 128 : index
      %129 = vector.load %128[%c128_111] : memref<256xf32, #tpu.memory_space<vmem>>, vector<16xf32>
      %c1_112 = arith.constant 1 : index
      %c11_113 = arith.constant 11 : index
      %c3_114 = arith.constant 3 : index
      %130 = vector.load %arg5[%c1_112, %c11_113, %c3_114] : memref<2x22x22xf32, #tpu.memory_space<vmem>>, vector<1x1x16xf32>
      %131 = vector.shape_cast %130 : vector<1x1x16xf32> to vector<16xf32>
      %132 = vector.shape_cast %129 : vector<16xf32> to vector<1x1x16xf32>
      tpu.vector_store %arg5[%c1_112, %c11_113, %c3_114], %132 {strides = array<i32>} : memref<2x22x22xf32, #tpu.memory_space<vmem>>, vector<1x1x16xf32>,
      %c0_i32_115 = arith.constant 0 : i32
      %c0_i32_116 = arith.constant 0 : i32
      %133 = tpu.memref_slice %arg7[%c0_i32_115, %c0_i32_116] : memref<3x256xf32, #tpu.memory_space<vmem>> -> memref<1x256xf32, #tpu.memory_space<vmem>>
      %134 = tpu.memref_squeeze %133 : memref<1x256xf32, #tpu.memory_space<vmem>> -> memref<256xf32, #tpu.memory_space<vmem>>
      %c144 = arith.constant 144 : index
      %135 = vector.load %134[%c144] : memref<256xf32, #tpu.memory_space<vmem>>, vector<16xf32>
      %c0_117 = arith.constant 0 : index
      %c12 = arith.constant 12 : index
      %c3_118 = arith.constant 3 : index
      %136 = vector.load %arg5[%c0_117, %c12, %c3_118] : memref<2x22x22xf32, #tpu.memory_space<vmem>>, vector<1x1x16xf32>
      %137 = vector.shape_cast %136 : vector<1x1x16xf32> to vector<16xf32>
      %138 = vector.shape_cast %135 : vector<16xf32> to vector<1x1x16xf32>
      tpu.vector_store %arg5[%c0_117, %c12, %c3_118], %138 {strides = array<i32>} : memref<2x22x22xf32, #tpu.memory_space<vmem>>, vector<1x1x16xf32>,
      %c1_i32_119 = arith.constant 1 : i32
      %c0_i32_120 = arith.constant 0 : i32
      %139 = tpu.memref_slice %arg7[%c1_i32_119, %c0_i32_120] : memref<3x256xf32, #tpu.memory_space<vmem>> -> memref<1x256xf32, #tpu.memory_space<vmem>>
      %140 = tpu.memref_squeeze %139 : memref<1x256xf32, #tpu.memory_space<vmem>> -> memref<256xf32, #tpu.memory_space<vmem>>
      %c144_121 = arith.constant 144 : index
      %141 = vector.load %140[%c144_121] : memref<256xf32, #tpu.memory_space<vmem>>, vector<16xf32>
      %c1_122 = arith.constant 1 : index
      %c12_123 = arith.constant 12 : index
      %c3_124 = arith.constant 3 : index
      %142 = vector.load %arg5[%c1_122, %c12_123, %c3_124] : memref<2x22x22xf32, #tpu.memory_space<vmem>>, vector<1x1x16xf32>
      %143 = vector.shape_cast %142 : vector<1x1x16xf32> to vector<16xf32>
      %144 = vector.shape_cast %141 : vector<16xf32> to vector<1x1x16xf32>
      tpu.vector_store %arg5[%c1_122, %c12_123, %c3_124], %144 {strides = array<i32>} : memref<2x22x22xf32, #tpu.memory_space<vmem>>, vector<1x1x16xf32>,
      %c0_i32_125 = arith.constant 0 : i32
      %c0_i32_126 = arith.constant 0 : i32
      %145 = tpu.memref_slice %arg7[%c0_i32_125, %c0_i32_126] : memref<3x256xf32, #tpu.memory_space<vmem>> -> memref<1x256xf32, #tpu.memory_space<vmem>>
      %146 = tpu.memref_squeeze %145 : memref<1x256xf32, #tpu.memory_space<vmem>> -> memref<256xf32, #tpu.memory_space<vmem>>
      %c160 = arith.constant 160 : index
      %147 = vector.load %146[%c160] : memref<256xf32, #tpu.memory_space<vmem>>, vector<16xf32>
      %c0_127 = arith.constant 0 : index
      %c13 = arith.constant 13 : index
      %c3_128 = arith.constant 3 : index
      %148 = vector.load %arg5[%c0_127, %c13, %c3_128] : memref<2x22x22xf32, #tpu.memory_space<vmem>>, vector<1x1x16xf32>
      %149 = vector.shape_cast %148 : vector<1x1x16xf32> to vector<16xf32>
      %150 = vector.shape_cast %147 : vector<16xf32> to vector<1x1x16xf32>
      tpu.vector_store %arg5[%c0_127, %c13, %c3_128], %150 {strides = array<i32>} : memref<2x22x22xf32, #tpu.memory_space<vmem>>, vector<1x1x16xf32>,
      %c1_i32_129 = arith.constant 1 : i32
      %c0_i32_130 = arith.constant 0 : i32
      %151 = tpu.memref_slice %arg7[%c1_i32_129, %c0_i32_130] : memref<3x256xf32, #tpu.memory_space<vmem>> -> memref<1x256xf32, #tpu.memory_space<vmem>>
      %152 = tpu.memref_squeeze %151 : memref<1x256xf32, #tpu.memory_space<vmem>> -> memref<256xf32, #tpu.memory_space<vmem>>
      %c160_131 = arith.constant 160 : index
      %153 = vector.load %152[%c160_131] : memref<256xf32, #tpu.memory_space<vmem>>, vector<16xf32>
      %c1_132 = arith.constant 1 : index
      %c13_133 = arith.constant 13 : index
      %c3_134 = arith.constant 3 : index
      %154 = vector.load %arg5[%c1_132, %c13_133, %c3_134] : memref<2x22x22xf32, #tpu.memory_space<vmem>>, vector<1x1x16xf32>
      %155 = vector.shape_cast %154 : vector<1x1x16xf32> to vector<16xf32>
      %156 = vector.shape_cast %153 : vector<16xf32> to vector<1x1x16xf32>
      tpu.vector_store %arg5[%c1_132, %c13_133, %c3_134], %156 {strides = array<i32>} : memref<2x22x22xf32, #tpu.memory_space<vmem>>, vector<1x1x16xf32>,
      %c0_i32_135 = arith.constant 0 : i32
      %c0_i32_136 = arith.constant 0 : i32
      %157 = tpu.memref_slice %arg7[%c0_i32_135, %c0_i32_136] : memref<3x256xf32, #tpu.memory_space<vmem>> -> memref<1x256xf32, #tpu.memory_space<vmem>>
      %158 = tpu.memref_squeeze %157 : memref<1x256xf32, #tpu.memory_space<vmem>> -> memref<256xf32, #tpu.memory_space<vmem>>
      %c176 = arith.constant 176 : index
      %159 = vector.load %158[%c176] : memref<256xf32, #tpu.memory_space<vmem>>, vector<16xf32>
      %c0_137 = arith.constant 0 : index
      %c14 = arith.constant 14 : index
      %c3_138 = arith.constant 3 : index
      %160 = vector.load %arg5[%c0_137, %c14, %c3_138] : memref<2x22x22xf32, #tpu.memory_space<vmem>>, vector<1x1x16xf32>
      %161 = vector.shape_cast %160 : vector<1x1x16xf32> to vector<16xf32>
      %162 = vector.shape_cast %159 : vector<16xf32> to vector<1x1x16xf32>
      tpu.vector_store %arg5[%c0_137, %c14, %c3_138], %162 {strides = array<i32>} : memref<2x22x22xf32, #tpu.memory_space<vmem>>, vector<1x1x16xf32>,
      %c1_i32_139 = arith.constant 1 : i32
      %c0_i32_140 = arith.constant 0 : i32
      %163 = tpu.memref_slice %arg7[%c1_i32_139, %c0_i32_140] : memref<3x256xf32, #tpu.memory_space<vmem>> -> memref<1x256xf32, #tpu.memory_space<vmem>>
      %164 = tpu.memref_squeeze %163 : memref<1x256xf32, #tpu.memory_space<vmem>> -> memref<256xf32, #tpu.memory_space<vmem>>
      %c176_141 = arith.constant 176 : index
      %165 = vector.load %164[%c176_141] : memref<256xf32, #tpu.memory_space<vmem>>, vector<16xf32>
      %c1_142 = arith.constant 1 : index
      %c14_143 = arith.constant 14 : index
      %c3_144 = arith.constant 3 : index
      %166 = vector.load %arg5[%c1_142, %c14_143, %c3_144] : memref<2x22x22xf32, #tpu.memory_space<vmem>>, vector<1x1x16xf32>
      %167 = vector.shape_cast %166 : vector<1x1x16xf32> to vector<16xf32>
      %168 = vector.shape_cast %165 : vector<16xf32> to vector<1x1x16xf32>
      tpu.vector_store %arg5[%c1_142, %c14_143, %c3_144], %168 {strides = array<i32>} : memref<2x22x22xf32, #tpu.memory_space<vmem>>, vector<1x1x16xf32>,
      %c0_i32_145 = arith.constant 0 : i32
      %c0_i32_146 = arith.constant 0 : i32
      %169 = tpu.memref_slice %arg7[%c0_i32_145, %c0_i32_146] : memref<3x256xf32, #tpu.memory_space<vmem>> -> memref<1x256xf32, #tpu.memory_space<vmem>>
      %170 = tpu.memref_squeeze %169 : memref<1x256xf32, #tpu.memory_space<vmem>> -> memref<256xf32, #tpu.memory_space<vmem>>
      %c192 = arith.constant 192 : index
      %171 = vector.load %170[%c192] : memref<256xf32, #tpu.memory_space<vmem>>, vector<16xf32>
      %c0_147 = arith.constant 0 : index
      %c15 = arith.constant 15 : index
      %c3_148 = arith.constant 3 : index
      %172 = vector.load %arg5[%c0_147, %c15, %c3_148] : memref<2x22x22xf32, #tpu.memory_space<vmem>>, vector<1x1x16xf32>
      %173 = vector.shape_cast %172 : vector<1x1x16xf32> to vector<16xf32>
      %174 = vector.shape_cast %171 : vector<16xf32> to vector<1x1x16xf32>
      tpu.vector_store %arg5[%c0_147, %c15, %c3_148], %174 {strides = array<i32>} : memref<2x22x22xf32, #tpu.memory_space<vmem>>, vector<1x1x16xf32>,
      %c1_i32_149 = arith.constant 1 : i32
      %c0_i32_150 = arith.constant 0 : i32
      %175 = tpu.memref_slice %arg7[%c1_i32_149, %c0_i32_150] : memref<3x256xf32, #tpu.memory_space<vmem>> -> memref<1x256xf32, #tpu.memory_space<vmem>>
      %176 = tpu.memref_squeeze %175 : memref<1x256xf32, #tpu.memory_space<vmem>> -> memref<256xf32, #tpu.memory_space<vmem>>
      %c192_151 = arith.constant 192 : index
      %177 = vector.load %176[%c192_151] : memref<256xf32, #tpu.memory_space<vmem>>, vector<16xf32>
      %c1_152 = arith.constant 1 : index
      %c15_153 = arith.constant 15 : index
      %c3_154 = arith.constant 3 : index
      %178 = vector.load %arg5[%c1_152, %c15_153, %c3_154] : memref<2x22x22xf32, #tpu.memory_space<vmem>>, vector<1x1x16xf32>
      %179 = vector.shape_cast %178 : vector<1x1x16xf32> to vector<16xf32>
      %180 = vector.shape_cast %177 : vector<16xf32> to vector<1x1x16xf32>
      tpu.vector_store %arg5[%c1_152, %c15_153, %c3_154], %180 {strides = array<i32>} : memref<2x22x22xf32, #tpu.memory_space<vmem>>, vector<1x1x16xf32>,
      %c0_i32_155 = arith.constant 0 : i32
      %c0_i32_156 = arith.constant 0 : i32
      %181 = tpu.memref_slice %arg7[%c0_i32_155, %c0_i32_156] : memref<3x256xf32, #tpu.memory_space<vmem>> -> memref<1x256xf32, #tpu.memory_space<vmem>>
      %182 = tpu.memref_squeeze %181 : memref<1x256xf32, #tpu.memory_space<vmem>> -> memref<256xf32, #tpu.memory_space<vmem>>
      %c208 = arith.constant 208 : index
      %183 = vector.load %182[%c208] : memref<256xf32, #tpu.memory_space<vmem>>, vector<16xf32>
      %c0_157 = arith.constant 0 : index
      %c16_158 = arith.constant 16 : index
      %c3_159 = arith.constant 3 : index
      %184 = vector.load %arg5[%c0_157, %c16_158, %c3_159] : memref<2x22x22xf32, #tpu.memory_space<vmem>>, vector<1x1x16xf32>
      %185 = vector.shape_cast %184 : vector<1x1x16xf32> to vector<16xf32>
      %186 = vector.shape_cast %183 : vector<16xf32> to vector<1x1x16xf32>
      tpu.vector_store %arg5[%c0_157, %c16_158, %c3_159], %186 {strides = array<i32>} : memref<2x22x22xf32, #tpu.memory_space<vmem>>, vector<1x1x16xf32>,
      %c1_i32_160 = arith.constant 1 : i32
      %c0_i32_161 = arith.constant 0 : i32
      %187 = tpu.memref_slice %arg7[%c1_i32_160, %c0_i32_161] : memref<3x256xf32, #tpu.memory_space<vmem>> -> memref<1x256xf32, #tpu.memory_space<vmem>>
      %188 = tpu.memref_squeeze %187 : memref<1x256xf32, #tpu.memory_space<vmem>> -> memref<256xf32, #tpu.memory_space<vmem>>
      %c208_162 = arith.constant 208 : index
      %189 = vector.load %188[%c208_162] : memref<256xf32, #tpu.memory_space<vmem>>, vector<16xf32>
      %c1_163 = arith.constant 1 : index
      %c16_164 = arith.constant 16 : index
      %c3_165 = arith.constant 3 : index
      %190 = vector.load %arg5[%c1_163, %c16_164, %c3_165] : memref<2x22x22xf32, #tpu.memory_space<vmem>>, vector<1x1x16xf32>
      %191 = vector.shape_cast %190 : vector<1x1x16xf32> to vector<16xf32>
      %192 = vector.shape_cast %189 : vector<16xf32> to vector<1x1x16xf32>
      tpu.vector_store %arg5[%c1_163, %c16_164, %c3_165], %192 {strides = array<i32>} : memref<2x22x22xf32, #tpu.memory_space<vmem>>, vector<1x1x16xf32>,
      %c0_i32_166 = arith.constant 0 : i32
      %c0_i32_167 = arith.constant 0 : i32
      %193 = tpu.memref_slice %arg7[%c0_i32_166, %c0_i32_167] : memref<3x256xf32, #tpu.memory_space<vmem>> -> memref<1x256xf32, #tpu.memory_space<vmem>>
      %194 = tpu.memref_squeeze %193 : memref<1x256xf32, #tpu.memory_space<vmem>> -> memref<256xf32, #tpu.memory_space<vmem>>
      %c224 = arith.constant 224 : index
      %195 = vector.load %194[%c224] : memref<256xf32, #tpu.memory_space<vmem>>, vector<16xf32>
      %c0_168 = arith.constant 0 : index
      %c17 = arith.constant 17 : index
      %c3_169 = arith.constant 3 : index
      %196 = vector.load %arg5[%c0_168, %c17, %c3_169] : memref<2x22x22xf32, #tpu.memory_space<vmem>>, vector<1x1x16xf32>
      %197 = vector.shape_cast %196 : vector<1x1x16xf32> to vector<16xf32>
      %198 = vector.shape_cast %195 : vector<16xf32> to vector<1x1x16xf32>
      tpu.vector_store %arg5[%c0_168, %c17, %c3_169], %198 {strides = array<i32>} : memref<2x22x22xf32, #tpu.memory_space<vmem>>, vector<1x1x16xf32>,
      %c1_i32_170 = arith.constant 1 : i32
      %c0_i32_171 = arith.constant 0 : i32
      %199 = tpu.memref_slice %arg7[%c1_i32_170, %c0_i32_171] : memref<3x256xf32, #tpu.memory_space<vmem>> -> memref<1x256xf32, #tpu.memory_space<vmem>>
      %200 = tpu.memref_squeeze %199 : memref<1x256xf32, #tpu.memory_space<vmem>> -> memref<256xf32, #tpu.memory_space<vmem>>
      %c224_172 = arith.constant 224 : index
      %201 = vector.load %200[%c224_172] : memref<256xf32, #tpu.memory_space<vmem>>, vector<16xf32>
      %c1_173 = arith.constant 1 : index
      %c17_174 = arith.constant 17 : index
      %c3_175 = arith.constant 3 : index
      %202 = vector.load %arg5[%c1_173, %c17_174, %c3_175] : memref<2x22x22xf32, #tpu.memory_space<vmem>>, vector<1x1x16xf32>
      %203 = vector.shape_cast %202 : vector<1x1x16xf32> to vector<16xf32>
      %204 = vector.shape_cast %201 : vector<16xf32> to vector<1x1x16xf32>
      tpu.vector_store %arg5[%c1_173, %c17_174, %c3_175], %204 {strides = array<i32>} : memref<2x22x22xf32, #tpu.memory_space<vmem>>, vector<1x1x16xf32>,
      %c0_i32_176 = arith.constant 0 : i32
      %c0_i32_177 = arith.constant 0 : i32
      %205 = tpu.memref_slice %arg7[%c0_i32_176, %c0_i32_177] : memref<3x256xf32, #tpu.memory_space<vmem>> -> memref<1x256xf32, #tpu.memory_space<vmem>>
      %206 = tpu.memref_squeeze %205 : memref<1x256xf32, #tpu.memory_space<vmem>> -> memref<256xf32, #tpu.memory_space<vmem>>
      %c240 = arith.constant 240 : index
      %207 = vector.load %206[%c240] : memref<256xf32, #tpu.memory_space<vmem>>, vector<16xf32>
      %c0_178 = arith.constant 0 : index
      %c18 = arith.constant 18 : index
      %c3_179 = arith.constant 3 : index
      %208 = vector.load %arg5[%c0_178, %c18, %c3_179] : memref<2x22x22xf32, #tpu.memory_space<vmem>>, vector<1x1x16xf32>
      %209 = vector.shape_cast %208 : vector<1x1x16xf32> to vector<16xf32>
      %210 = vector.shape_cast %207 : vector<16xf32> to vector<1x1x16xf32>
      tpu.vector_store %arg5[%c0_178, %c18, %c3_179], %210 {strides = array<i32>} : memref<2x22x22xf32, #tpu.memory_space<vmem>>, vector<1x1x16xf32>,
      %c1_i32_180 = arith.constant 1 : i32
      %c0_i32_181 = arith.constant 0 : i32
      %211 = tpu.memref_slice %arg7[%c1_i32_180, %c0_i32_181] : memref<3x256xf32, #tpu.memory_space<vmem>> -> memref<1x256xf32, #tpu.memory_space<vmem>>
      %212 = tpu.memref_squeeze %211 : memref<1x256xf32, #tpu.memory_space<vmem>> -> memref<256xf32, #tpu.memory_space<vmem>>
      %c240_182 = arith.constant 240 : index
      %213 = vector.load %212[%c240_182] : memref<256xf32, #tpu.memory_space<vmem>>, vector<16xf32>
      %c1_183 = arith.constant 1 : index
      %c18_184 = arith.constant 18 : index
      %c3_185 = arith.constant 3 : index
      %214 = vector.load %arg5[%c1_183, %c18_184, %c3_185] : memref<2x22x22xf32, #tpu.memory_space<vmem>>, vector<1x1x16xf32>
      %215 = vector.shape_cast %214 : vector<1x1x16xf32> to vector<16xf32>
      %216 = vector.shape_cast %213 : vector<16xf32> to vector<1x1x16xf32>
      tpu.vector_store %arg5[%c1_183, %c18_184, %c3_185], %216 {strides = array<i32>} : memref<2x22x22xf32, #tpu.memory_space<vmem>>, vector<1x1x16xf32>,
      %c0_186 = arith.constant 0 : index
      %c0_187 = arith.constant 0 : index
      %c0_188 = arith.constant 0 : index
      %217 = vector.load %arg5[%c0_186, %c0_187, %c0_188] : memref<2x22x22xf32, #tpu.memory_space<vmem>>, vector<1x22x16xf32>
      %218 = vector.shape_cast %217 : vector<1x22x16xf32> to vector<22x16xf32>
      %c0_189 = arith.constant 0 : index
      %c0_190 = arith.constant 0 : index
      %c0_191 = arith.constant 0 : index
      %c0_192 = arith.constant 0 : index
      %219 = vector.load %arg6[%c0_189, %c0_190, %c0_191, %c0_192] : memref<2x7x22x16xf32, #tpu.memory_space<vmem>>, vector<1x1x22x16xf32>
      %220 = vector.shape_cast %219 : vector<1x1x22x16xf32> to vector<22x16xf32>
      %221 = vector.shape_cast %218 : vector<22x16xf32> to vector<1x1x22x16xf32>
      tpu.vector_store %arg6[%c0_189, %c0_190, %c0_191, %c0_192], %221 {strides = array<i32>} : memref<2x7x22x16xf32, #tpu.memory_space<vmem>>, vector<1x1x22x16xf32>,
      %c0_193 = arith.constant 0 : index
      %c0_194 = arith.constant 0 : index
      %c1_195 = arith.constant 1 : index
      %222 = vector.load %arg5[%c0_193, %c0_194, %c1_195] : memref<2x22x22xf32, #tpu.memory_space<vmem>>, vector<1x22x16xf32>
      %223 = vector.shape_cast %222 : vector<1x22x16xf32> to vector<22x16xf32>
      %c0_196 = arith.constant 0 : index
      %c1_197 = arith.constant 1 : index
      %c0_198 = arith.constant 0 : index
      %c0_199 = arith.constant 0 : index
      %224 = vector.load %arg6[%c0_196, %c1_197, %c0_198, %c0_199] : memref<2x7x22x16xf32, #tpu.memory_space<vmem>>, vector<1x1x22x16xf32>
      %225 = vector.shape_cast %224 : vector<1x1x22x16xf32> to vector<22x16xf32>
      %226 = vector.shape_cast %223 : vector<22x16xf32> to vector<1x1x22x16xf32>
      tpu.vector_store %arg6[%c0_196, %c1_197, %c0_198, %c0_199], %226 {strides = array<i32>} : memref<2x7x22x16xf32, #tpu.memory_space<vmem>>, vector<1x1x22x16xf32>,
      %c0_200 = arith.constant 0 : index
      %c0_201 = arith.constant 0 : index
      %c2 = arith.constant 2 : index
      %227 = vector.load %arg5[%c0_200, %c0_201, %c2] : memref<2x22x22xf32, #tpu.memory_space<vmem>>, vector<1x22x16xf32>
      %228 = vector.shape_cast %227 : vector<1x22x16xf32> to vector<22x16xf32>
      %c0_202 = arith.constant 0 : index
      %c2_203 = arith.constant 2 : index
      %c0_204 = arith.constant 0 : index
      %c0_205 = arith.constant 0 : index
      %229 = vector.load %arg6[%c0_202, %c2_203, %c0_204, %c0_205] : memref<2x7x22x16xf32, #tpu.memory_space<vmem>>, vector<1x1x22x16xf32>
      %230 = vector.shape_cast %229 : vector<1x1x22x16xf32> to vector<22x16xf32>
      %231 = vector.shape_cast %228 : vector<22x16xf32> to vector<1x1x22x16xf32>
      tpu.vector_store %arg6[%c0_202, %c2_203, %c0_204, %c0_205], %231 {strides = array<i32>} : memref<2x7x22x16xf32, #tpu.memory_space<vmem>>, vector<1x1x22x16xf32>,
      %c0_206 = arith.constant 0 : index
      %c0_207 = arith.constant 0 : index
      %c3_208 = arith.constant 3 : index
      %232 = vector.load %arg5[%c0_206, %c0_207, %c3_208] : memref<2x22x22xf32, #tpu.memory_space<vmem>>, vector<1x22x16xf32>
      %233 = vector.shape_cast %232 : vector<1x22x16xf32> to vector<22x16xf32>
      %c0_209 = arith.constant 0 : index
      %c3_210 = arith.constant 3 : index
      %c0_211 = arith.constant 0 : index
      %c0_212 = arith.constant 0 : index
      %234 = vector.load %arg6[%c0_209, %c3_210, %c0_211, %c0_212] : memref<2x7x22x16xf32, #tpu.memory_space<vmem>>, vector<1x1x22x16xf32>
      %235 = vector.shape_cast %234 : vector<1x1x22x16xf32> to vector<22x16xf32>
      %236 = vector.shape_cast %233 : vector<22x16xf32> to vector<1x1x22x16xf32>
      tpu.vector_store %arg6[%c0_209, %c3_210, %c0_211, %c0_212], %236 {strides = array<i32>} : memref<2x7x22x16xf32, #tpu.memory_space<vmem>>, vector<1x1x22x16xf32>,
      %c0_213 = arith.constant 0 : index
      %c0_214 = arith.constant 0 : index
      %c4_215 = arith.constant 4 : index
      %237 = vector.load %arg5[%c0_213, %c0_214, %c4_215] : memref<2x22x22xf32, #tpu.memory_space<vmem>>, vector<1x22x16xf32>
      %238 = vector.shape_cast %237 : vector<1x22x16xf32> to vector<22x16xf32>
      %c0_216 = arith.constant 0 : index
      %c4_217 = arith.constant 4 : index
      %c0_218 = arith.constant 0 : index
      %c0_219 = arith.constant 0 : index
      %239 = vector.load %arg6[%c0_216, %c4_217, %c0_218, %c0_219] : memref<2x7x22x16xf32, #tpu.memory_space<vmem>>, vector<1x1x22x16xf32>
      %240 = vector.shape_cast %239 : vector<1x1x22x16xf32> to vector<22x16xf32>
      %241 = vector.shape_cast %238 : vector<22x16xf32> to vector<1x1x22x16xf32>
      tpu.vector_store %arg6[%c0_216, %c4_217, %c0_218, %c0_219], %241 {strides = array<i32>} : memref<2x7x22x16xf32, #tpu.memory_space<vmem>>, vector<1x1x22x16xf32>,
      %c0_220 = arith.constant 0 : index
      %c0_221 = arith.constant 0 : index
      %c5_222 = arith.constant 5 : index
      %242 = vector.load %arg5[%c0_220, %c0_221, %c5_222] : memref<2x22x22xf32, #tpu.memory_space<vmem>>, vector<1x22x16xf32>
      %243 = vector.shape_cast %242 : vector<1x22x16xf32> to vector<22x16xf32>
      %c0_223 = arith.constant 0 : index
      %c5_224 = arith.constant 5 : index
      %c0_225 = arith.constant 0 : index
      %c0_226 = arith.constant 0 : index
      %244 = vector.load %arg6[%c0_223, %c5_224, %c0_225, %c0_226] : memref<2x7x22x16xf32, #tpu.memory_space<vmem>>, vector<1x1x22x16xf32>
      %245 = vector.shape_cast %244 : vector<1x1x22x16xf32> to vector<22x16xf32>
      %246 = vector.shape_cast %243 : vector<22x16xf32> to vector<1x1x22x16xf32>
      tpu.vector_store %arg6[%c0_223, %c5_224, %c0_225, %c0_226], %246 {strides = array<i32>} : memref<2x7x22x16xf32, #tpu.memory_space<vmem>>, vector<1x1x22x16xf32>,
      %c0_227 = arith.constant 0 : index
      %c0_228 = arith.constant 0 : index
      %c6_229 = arith.constant 6 : index
      %247 = vector.load %arg5[%c0_227, %c0_228, %c6_229] : memref<2x22x22xf32, #tpu.memory_space<vmem>>, vector<1x22x16xf32>
      %248 = vector.shape_cast %247 : vector<1x22x16xf32> to vector<22x16xf32>
      %c0_230 = arith.constant 0 : index
      %c6_231 = arith.constant 6 : index
      %c0_232 = arith.constant 0 : index
      %c0_233 = arith.constant 0 : index
      %249 = vector.load %arg6[%c0_230, %c6_231, %c0_232, %c0_233] : memref<2x7x22x16xf32, #tpu.memory_space<vmem>>, vector<1x1x22x16xf32>
      %250 = vector.shape_cast %249 : vector<1x1x22x16xf32> to vector<22x16xf32>
      %251 = vector.shape_cast %248 : vector<22x16xf32> to vector<1x1x22x16xf32>
      tpu.vector_store %arg6[%c0_230, %c6_231, %c0_232, %c0_233], %251 {strides = array<i32>} : memref<2x7x22x16xf32, #tpu.memory_space<vmem>>, vector<1x1x22x16xf32>,
      %c1_234 = arith.constant 1 : index
      %c0_235 = arith.constant 0 : index
      %c0_236 = arith.constant 0 : index
      %252 = vector.load %arg5[%c1_234, %c0_235, %c0_236] : memref<2x22x22xf32, #tpu.memory_space<vmem>>, vector<1x22x16xf32>
      %253 = vector.shape_cast %252 : vector<1x22x16xf32> to vector<22x16xf32>
      %c1_237 = arith.constant 1 : index
      %c0_238 = arith.constant 0 : index
      %c0_239 = arith.constant 0 : index
      %c0_240 = arith.constant 0 : index
      %254 = vector.load %arg6[%c1_237, %c0_238, %c0_239, %c0_240] : memref<2x7x22x16xf32, #tpu.memory_space<vmem>>, vector<1x1x22x16xf32>
      %255 = vector.shape_cast %254 : vector<1x1x22x16xf32> to vector<22x16xf32>
      %256 = vector.shape_cast %253 : vector<22x16xf32> to vector<1x1x22x16xf32>
      tpu.vector_store %arg6[%c1_237, %c0_238, %c0_239, %c0_240], %256 {strides = array<i32>} : memref<2x7x22x16xf32, #tpu.memory_space<vmem>>, vector<1x1x22x16xf32>,
      %c1_241 = arith.constant 1 : index
      %c0_242 = arith.constant 0 : index
      %c1_243 = arith.constant 1 : index
      %257 = vector.load %arg5[%c1_241, %c0_242, %c1_243] : memref<2x22x22xf32, #tpu.memory_space<vmem>>, vector<1x22x16xf32>
      %258 = vector.shape_cast %257 : vector<1x22x16xf32> to vector<22x16xf32>
      %c1_244 = arith.constant 1 : index
      %c1_245 = arith.constant 1 : index
      %c0_246 = arith.constant 0 : index
      %c0_247 = arith.constant 0 : index
      %259 = vector.load %arg6[%c1_244, %c1_245, %c0_246, %c0_247] : memref<2x7x22x16xf32, #tpu.memory_space<vmem>>, vector<1x1x22x16xf32>
      %260 = vector.shape_cast %259 : vector<1x1x22x16xf32> to vector<22x16xf32>
      %261 = vector.shape_cast %258 : vector<22x16xf32> to vector<1x1x22x16xf32>
      tpu.vector_store %arg6[%c1_244, %c1_245, %c0_246, %c0_247], %261 {strides = array<i32>} : memref<2x7x22x16xf32, #tpu.memory_space<vmem>>, vector<1x1x22x16xf32>,
      %c1_248 = arith.constant 1 : index
      %c0_249 = arith.constant 0 : index
      %c2_250 = arith.constant 2 : index
      %262 = vector.load %arg5[%c1_248, %c0_249, %c2_250] : memref<2x22x22xf32, #tpu.memory_space<vmem>>, vector<1x22x16xf32>
      %263 = vector.shape_cast %262 : vector<1x22x16xf32> to vector<22x16xf32>
      %c1_251 = arith.constant 1 : index
      %c2_252 = arith.constant 2 : index
      %c0_253 = arith.constant 0 : index
      %c0_254 = arith.constant 0 : index
      %264 = vector.load %arg6[%c1_251, %c2_252, %c0_253, %c0_254] : memref<2x7x22x16xf32, #tpu.memory_space<vmem>>, vector<1x1x22x16xf32>
      %265 = vector.shape_cast %264 : vector<1x1x22x16xf32> to vector<22x16xf32>
      %266 = vector.shape_cast %263 : vector<22x16xf32> to vector<1x1x22x16xf32>
      tpu.vector_store %arg6[%c1_251, %c2_252, %c0_253, %c0_254], %266 {strides = array<i32>} : memref<2x7x22x16xf32, #tpu.memory_space<vmem>>, vector<1x1x22x16xf32>,
      %c1_255 = arith.constant 1 : index
      %c0_256 = arith.constant 0 : index
      %c3_257 = arith.constant 3 : index
      %267 = vector.load %arg5[%c1_255, %c0_256, %c3_257] : memref<2x22x22xf32, #tpu.memory_space<vmem>>, vector<1x22x16xf32>
      %268 = vector.shape_cast %267 : vector<1x22x16xf32> to vector<22x16xf32>
      %c1_258 = arith.constant 1 : index
      %c3_259 = arith.constant 3 : index
      %c0_260 = arith.constant 0 : index
      %c0_261 = arith.constant 0 : index
      %269 = vector.load %arg6[%c1_258, %c3_259, %c0_260, %c0_261] : memref<2x7x22x16xf32, #tpu.memory_space<vmem>>, vector<1x1x22x16xf32>
      %270 = vector.shape_cast %269 : vector<1x1x22x16xf32> to vector<22x16xf32>
      %271 = vector.shape_cast %268 : vector<22x16xf32> to vector<1x1x22x16xf32>
      tpu.vector_store %arg6[%c1_258, %c3_259, %c0_260, %c0_261], %271 {strides = array<i32>} : memref<2x7x22x16xf32, #tpu.memory_space<vmem>>, vector<1x1x22x16xf32>,
      %c1_262 = arith.constant 1 : index
      %c0_263 = arith.constant 0 : index
      %c4_264 = arith.constant 4 : index
      %272 = vector.load %arg5[%c1_262, %c0_263, %c4_264] : memref<2x22x22xf32, #tpu.memory_space<vmem>>, vector<1x22x16xf32>
      %273 = vector.shape_cast %272 : vector<1x22x16xf32> to vector<22x16xf32>
      %c1_265 = arith.constant 1 : index
      %c4_266 = arith.constant 4 : index
      %c0_267 = arith.constant 0 : index
      %c0_268 = arith.constant 0 : index
      %274 = vector.load %arg6[%c1_265, %c4_266, %c0_267, %c0_268] : memref<2x7x22x16xf32, #tpu.memory_space<vmem>>, vector<1x1x22x16xf32>
      %275 = vector.shape_cast %274 : vector<1x1x22x16xf32> to vector<22x16xf32>
      %276 = vector.shape_cast %273 : vector<22x16xf32> to vector<1x1x22x16xf32>
      tpu.vector_store %arg6[%c1_265, %c4_266, %c0_267, %c0_268], %276 {strides = array<i32>} : memref<2x7x22x16xf32, #tpu.memory_space<vmem>>, vector<1x1x22x16xf32>,
      %c1_269 = arith.constant 1 : index
      %c0_270 = arith.constant 0 : index
      %c5_271 = arith.constant 5 : index
      %277 = vector.load %arg5[%c1_269, %c0_270, %c5_271] : memref<2x22x22xf32, #tpu.memory_space<vmem>>, vector<1x22x16xf32>
      %278 = vector.shape_cast %277 : vector<1x22x16xf32> to vector<22x16xf32>
      %c1_272 = arith.constant 1 : index
      %c5_273 = arith.constant 5 : index
      %c0_274 = arith.constant 0 : index
      %c0_275 = arith.constant 0 : index
      %279 = vector.load %arg6[%c1_272, %c5_273, %c0_274, %c0_275] : memref<2x7x22x16xf32, #tpu.memory_space<vmem>>, vector<1x1x22x16xf32>
      %280 = vector.shape_cast %279 : vector<1x1x22x16xf32> to vector<22x16xf32>
      %281 = vector.shape_cast %278 : vector<22x16xf32> to vector<1x1x22x16xf32>
      tpu.vector_store %arg6[%c1_272, %c5_273, %c0_274, %c0_275], %281 {strides = array<i32>} : memref<2x7x22x16xf32, #tpu.memory_space<vmem>>, vector<1x1x22x16xf32>,
      %c1_276 = arith.constant 1 : index
      %c0_277 = arith.constant 0 : index
      %c6_278 = arith.constant 6 : index
      %282 = vector.load %arg5[%c1_276, %c0_277, %c6_278] : memref<2x22x22xf32, #tpu.memory_space<vmem>>, vector<1x22x16xf32>
      %283 = vector.shape_cast %282 : vector<1x22x16xf32> to vector<22x16xf32>
      %c1_279 = arith.constant 1 : index
      %c6_280 = arith.constant 6 : index
      %c0_281 = arith.constant 0 : index
      %c0_282 = arith.constant 0 : index
      %284 = vector.load %arg6[%c1_279, %c6_280, %c0_281, %c0_282] : memref<2x7x22x16xf32, #tpu.memory_space<vmem>>, vector<1x1x22x16xf32>
      %285 = vector.shape_cast %284 : vector<1x1x22x16xf32> to vector<22x16xf32>
      %286 = vector.shape_cast %283 : vector<22x16xf32> to vector<1x1x22x16xf32>
      tpu.vector_store %arg6[%c1_279, %c6_280, %c0_281, %c0_282], %286 {strides = array<i32>} : memref<2x7x22x16xf32, #tpu.memory_space<vmem>>, vector<1x1x22x16xf32>,
      %cst_283 = arith.constant 0.000000e+00 : f32
      %287 = vector.broadcast %cst_283 : f32 to vector<16x16xf32>
      %c0_284 = arith.constant 0 : index
      %288 = memref.load %arg3[%c0_284] : memref<1xf32, #tpu.memory_space<smem>>
      %289 = vector.broadcast %288 : f32 to vector<16x16xf32>
      %290 = arith.addf %287, %289 : vector<16x16xf32>
      %cst_285 = arith.constant 0.000000e+00 : f32
      %291 = vector.broadcast %cst_285 : f32 to vector<16x16xf32>
      %cst_286 = arith.constant 0.000000e+00 : f32
      %292 = vector.broadcast %cst_286 : f32 to vector<16x16xf32>
      %cst_287 = arith.constant 0.000000e+00 : f32
      %293 = vector.broadcast %cst_287 : f32 to vector<16x16xf32>
      %c0_288 = arith.constant 0 : index
      %294 = memref.load %arg2[%c0_288] : memref<98xf32, #tpu.memory_space<smem>>
      %c0_289 = arith.constant 0 : index
      %c0_290 = arith.constant 0 : index
      %c0_291 = arith.constant 0 : index
      %c0_292 = arith.constant 0 : index
      %295 = vector.load %arg6[%c0_289, %c0_290, %c0_291, %c0_292] : memref<2x7x22x16xf32, #tpu.memory_space<vmem>>, vector<1x1x16x16xf32>
      %296 = vector.shape_cast %295 : vector<1x1x16x16xf32> to vector<16x16xf32>
      %297 = vector.broadcast %294 : f32 to vector<16x16xf32>
      %298 = arith.mulf %297, %296 : vector<16x16xf32>
      %299 = arith.addf %290, %298 : vector<16x16xf32>
      %c1_293 = arith.constant 1 : index
      %300 = memref.load %arg2[%c1_293] : memref<98xf32, #tpu.memory_space<smem>>
      %c0_294 = arith.constant 0 : index
      %c1_295 = arith.constant 1 : index
      %c0_296 = arith.constant 0 : index
      %c0_297 = arith.constant 0 : index
      %301 = vector.load %arg6[%c0_294, %c1_295, %c0_296, %c0_297] : memref<2x7x22x16xf32, #tpu.memory_space<vmem>>, vector<1x1x16x16xf32>
      %302 = vector.shape_cast %301 : vector<1x1x16x16xf32> to vector<16x16xf32>
      %303 = vector.broadcast %300 : f32 to vector<16x16xf32>
      %304 = arith.mulf %303, %302 : vector<16x16xf32>
      %305 = arith.addf %291, %304 : vector<16x16xf32>
      %c2_298 = arith.constant 2 : index
      %306 = memref.load %arg2[%c2_298] : memref<98xf32, #tpu.memory_space<smem>>
      %c0_299 = arith.constant 0 : index
      %c2_300 = arith.constant 2 : index
      %c0_301 = arith.constant 0 : index
      %c0_302 = arith.constant 0 : index
      %307 = vector.load %arg6[%c0_299, %c2_300, %c0_301, %c0_302] : memref<2x7x22x16xf32, #tpu.memory_space<vmem>>, vector<1x1x16x16xf32>
      %308 = vector.shape_cast %307 : vector<1x1x16x16xf32> to vector<16x16xf32>
      %309 = vector.broadcast %306 : f32 to vector<16x16xf32>
      %310 = arith.mulf %309, %308 : vector<16x16xf32>
      %311 = arith.addf %292, %310 : vector<16x16xf32>
      %c3_303 = arith.constant 3 : index
      %312 = memref.load %arg2[%c3_303] : memref<98xf32, #tpu.memory_space<smem>>
      %c0_304 = arith.constant 0 : index
      %c3_305 = arith.constant 3 : index
      %c0_306 = arith.constant 0 : index
      %c0_307 = arith.constant 0 : index
      %313 = vector.load %arg6[%c0_304, %c3_305, %c0_306, %c0_307] : memref<2x7x22x16xf32, #tpu.memory_space<vmem>>, vector<1x1x16x16xf32>
      %314 = vector.shape_cast %313 : vector<1x1x16x16xf32> to vector<16x16xf32>
      %315 = vector.broadcast %312 : f32 to vector<16x16xf32>
      %316 = arith.mulf %315, %314 : vector<16x16xf32>
      %317 = arith.addf %293, %316 : vector<16x16xf32>
      %c4_308 = arith.constant 4 : index
      %318 = memref.load %arg2[%c4_308] : memref<98xf32, #tpu.memory_space<smem>>
      %c0_309 = arith.constant 0 : index
      %c4_310 = arith.constant 4 : index
      %c0_311 = arith.constant 0 : index
      %c0_312 = arith.constant 0 : index
      %319 = vector.load %arg6[%c0_309, %c4_310, %c0_311, %c0_312] : memref<2x7x22x16xf32, #tpu.memory_space<vmem>>, vector<1x1x16x16xf32>
      %320 = vector.shape_cast %319 : vector<1x1x16x16xf32> to vector<16x16xf32>
      %321 = vector.broadcast %318 : f32 to vector<16x16xf32>
      %322 = arith.mulf %321, %320 : vector<16x16xf32>
      %323 = arith.addf %299, %322 : vector<16x16xf32>
      %c5_313 = arith.constant 5 : index
      %324 = memref.load %arg2[%c5_313] : memref<98xf32, #tpu.memory_space<smem>>
      %c0_314 = arith.constant 0 : index
      %c5_315 = arith.constant 5 : index
      %c0_316 = arith.constant 0 : index
      %c0_317 = arith.constant 0 : index
      %325 = vector.load %arg6[%c0_314, %c5_315, %c0_316, %c0_317] : memref<2x7x22x16xf32, #tpu.memory_space<vmem>>, vector<1x1x16x16xf32>
      %326 = vector.shape_cast %325 : vector<1x1x16x16xf32> to vector<16x16xf32>
      %327 = vector.broadcast %324 : f32 to vector<16x16xf32>
      %328 = arith.mulf %327, %326 : vector<16x16xf32>
      %329 = arith.addf %305, %328 : vector<16x16xf32>
      %c6_318 = arith.constant 6 : index
      %330 = memref.load %arg2[%c6_318] : memref<98xf32, #tpu.memory_space<smem>>
      %c0_319 = arith.constant 0 : index
      %c6_320 = arith.constant 6 : index
      %c0_321 = arith.constant 0 : index
      %c0_322 = arith.constant 0 : index
      %331 = vector.load %arg6[%c0_319, %c6_320, %c0_321, %c0_322] : memref<2x7x22x16xf32, #tpu.memory_space<vmem>>, vector<1x1x16x16xf32>
      %332 = vector.shape_cast %331 : vector<1x1x16x16xf32> to vector<16x16xf32>
      %333 = vector.broadcast %330 : f32 to vector<16x16xf32>
      %334 = arith.mulf %333, %332 : vector<16x16xf32>
      %335 = arith.addf %311, %334 : vector<16x16xf32>
      %c7_323 = arith.constant 7 : index
      %336 = memref.load %arg2[%c7_323] : memref<98xf32, #tpu.memory_space<smem>>
      %c0_324 = arith.constant 0 : index
      %c0_325 = arith.constant 0 : index
      %c1_326 = arith.constant 1 : index
      %c0_327 = arith.constant 0 : index
      %337 = vector.load %arg6[%c0_324, %c0_325, %c1_326, %c0_327] : memref<2x7x22x16xf32, #tpu.memory_space<vmem>>, vector<1x1x16x16xf32>
      %338 = vector.shape_cast %337 : vector<1x1x16x16xf32> to vector<16x16xf32>
      %339 = vector.broadcast %336 : f32 to vector<16x16xf32>
      %340 = arith.mulf %339, %338 : vector<16x16xf32>
      %341 = arith.addf %317, %340 : vector<16x16xf32>
      %c8_328 = arith.constant 8 : index
      %342 = memref.load %arg2[%c8_328] : memref<98xf32, #tpu.memory_space<smem>>
      %c0_329 = arith.constant 0 : index
      %c1_330 = arith.constant 1 : index
      %c1_331 = arith.constant 1 : index
      %c0_332 = arith.constant 0 : index
      %343 = vector.load %arg6[%c0_329, %c1_330, %c1_331, %c0_332] : memref<2x7x22x16xf32, #tpu.memory_space<vmem>>, vector<1x1x16x16xf32>
      %344 = vector.shape_cast %343 : vector<1x1x16x16xf32> to vector<16x16xf32>
      %345 = vector.broadcast %342 : f32 to vector<16x16xf32>
      %346 = arith.mulf %345, %344 : vector<16x16xf32>
      %347 = arith.addf %323, %346 : vector<16x16xf32>
      %c9_333 = arith.constant 9 : index
      %348 = memref.load %arg2[%c9_333] : memref<98xf32, #tpu.memory_space<smem>>
      %c0_334 = arith.constant 0 : index
      %c2_335 = arith.constant 2 : index
      %c1_336 = arith.constant 1 : index
      %c0_337 = arith.constant 0 : index
      %349 = vector.load %arg6[%c0_334, %c2_335, %c1_336, %c0_337] : memref<2x7x22x16xf32, #tpu.memory_space<vmem>>, vector<1x1x16x16xf32>
      %350 = vector.shape_cast %349 : vector<1x1x16x16xf32> to vector<16x16xf32>
      %351 = vector.broadcast %348 : f32 to vector<16x16xf32>
      %352 = arith.mulf %351, %350 : vector<16x16xf32>
      %353 = arith.addf %329, %352 : vector<16x16xf32>
      %c10_338 = arith.constant 10 : index
      %354 = memref.load %arg2[%c10_338] : memref<98xf32, #tpu.memory_space<smem>>
      %c0_339 = arith.constant 0 : index
      %c3_340 = arith.constant 3 : index
      %c1_341 = arith.constant 1 : index
      %c0_342 = arith.constant 0 : index
      %355 = vector.load %arg6[%c0_339, %c3_340, %c1_341, %c0_342] : memref<2x7x22x16xf32, #tpu.memory_space<vmem>>, vector<1x1x16x16xf32>
      %356 = vector.shape_cast %355 : vector<1x1x16x16xf32> to vector<16x16xf32>
      %357 = vector.broadcast %354 : f32 to vector<16x16xf32>
      %358 = arith.mulf %357, %356 : vector<16x16xf32>
      %359 = arith.addf %335, %358 : vector<16x16xf32>
      %c11_343 = arith.constant 11 : index
      %360 = memref.load %arg2[%c11_343] : memref<98xf32, #tpu.memory_space<smem>>
      %c0_344 = arith.constant 0 : index
      %c4_345 = arith.constant 4 : index
      %c1_346 = arith.constant 1 : index
      %c0_347 = arith.constant 0 : index
      %361 = vector.load %arg6[%c0_344, %c4_345, %c1_346, %c0_347] : memref<2x7x22x16xf32, #tpu.memory_space<vmem>>, vector<1x1x16x16xf32>
      %362 = vector.shape_cast %361 : vector<1x1x16x16xf32> to vector<16x16xf32>
      %363 = vector.broadcast %360 : f32 to vector<16x16xf32>
      %364 = arith.mulf %363, %362 : vector<16x16xf32>
      %365 = arith.addf %341, %364 : vector<16x16xf32>
      %c12_348 = arith.constant 12 : index
      %366 = memref.load %arg2[%c12_348] : memref<98xf32, #tpu.memory_space<smem>>
      %c0_349 = arith.constant 0 : index
      %c5_350 = arith.constant 5 : index
      %c1_351 = arith.constant 1 : index
      %c0_352 = arith.constant 0 : index
      %367 = vector.load %arg6[%c0_349, %c5_350, %c1_351, %c0_352] : memref<2x7x22x16xf32, #tpu.memory_space<vmem>>, vector<1x1x16x16xf32>
      %368 = vector.shape_cast %367 : vector<1x1x16x16xf32> to vector<16x16xf32>
      %369 = vector.broadcast %366 : f32 to vector<16x16xf32>
      %370 = arith.mulf %369, %368 : vector<16x16xf32>
      %371 = arith.addf %347, %370 : vector<16x16xf32>
      %c13_353 = arith.constant 13 : index
      %372 = memref.load %arg2[%c13_353] : memref<98xf32, #tpu.memory_space<smem>>
      %c0_354 = arith.constant 0 : index
      %c6_355 = arith.constant 6 : index
      %c1_356 = arith.constant 1 : index
      %c0_357 = arith.constant 0 : index
      %373 = vector.load %arg6[%c0_354, %c6_355, %c1_356, %c0_357] : memref<2x7x22x16xf32, #tpu.memory_space<vmem>>, vector<1x1x16x16xf32>
      %374 = vector.shape_cast %373 : vector<1x1x16x16xf32> to vector<16x16xf32>
      %375 = vector.broadcast %372 : f32 to vector<16x16xf32>
      %376 = arith.mulf %375, %374 : vector<16x16xf32>
      %377 = arith.addf %353, %376 : vector<16x16xf32>
      %c14_358 = arith.constant 14 : index
      %378 = memref.load %arg2[%c14_358] : memref<98xf32, #tpu.memory_space<smem>>
      %c0_359 = arith.constant 0 : index
      %c0_360 = arith.constant 0 : index
      %c2_361 = arith.constant 2 : index
      %c0_362 = arith.constant 0 : index
      %379 = vector.load %arg6[%c0_359, %c0_360, %c2_361, %c0_362] : memref<2x7x22x16xf32, #tpu.memory_space<vmem>>, vector<1x1x16x16xf32>
      %380 = vector.shape_cast %379 : vector<1x1x16x16xf32> to vector<16x16xf32>
      %381 = vector.broadcast %378 : f32 to vector<16x16xf32>
      %382 = arith.mulf %381, %380 : vector<16x16xf32>
      %383 = arith.addf %359, %382 : vector<16x16xf32>
      %c15_363 = arith.constant 15 : index
      %384 = memref.load %arg2[%c15_363] : memref<98xf32, #tpu.memory_space<smem>>
      %c0_364 = arith.constant 0 : index
      %c1_365 = arith.constant 1 : index
      %c2_366 = arith.constant 2 : index
      %c0_367 = arith.constant 0 : index
      %385 = vector.load %arg6[%c0_364, %c1_365, %c2_366, %c0_367] : memref<2x7x22x16xf32, #tpu.memory_space<vmem>>, vector<1x1x16x16xf32>
      %386 = vector.shape_cast %385 : vector<1x1x16x16xf32> to vector<16x16xf32>
      %387 = vector.broadcast %384 : f32 to vector<16x16xf32>
      %388 = arith.mulf %387, %386 : vector<16x16xf32>
      %389 = arith.addf %365, %388 : vector<16x16xf32>
      %c16_368 = arith.constant 16 : index
      %390 = memref.load %arg2[%c16_368] : memref<98xf32, #tpu.memory_space<smem>>
      %c0_369 = arith.constant 0 : index
      %c2_370 = arith.constant 2 : index
      %c2_371 = arith.constant 2 : index
      %c0_372 = arith.constant 0 : index
      %391 = vector.load %arg6[%c0_369, %c2_370, %c2_371, %c0_372] : memref<2x7x22x16xf32, #tpu.memory_space<vmem>>, vector<1x1x16x16xf32>
      %392 = vector.shape_cast %391 : vector<1x1x16x16xf32> to vector<16x16xf32>
      %393 = vector.broadcast %390 : f32 to vector<16x16xf32>
      %394 = arith.mulf %393, %392 : vector<16x16xf32>
      %395 = arith.addf %371, %394 : vector<16x16xf32>
      %c17_373 = arith.constant 17 : index
      %396 = memref.load %arg2[%c17_373] : memref<98xf32, #tpu.memory_space<smem>>
      %c0_374 = arith.constant 0 : index
      %c3_375 = arith.constant 3 : index
      %c2_376 = arith.constant 2 : index
      %c0_377 = arith.constant 0 : index
      %397 = vector.load %arg6[%c0_374, %c3_375, %c2_376, %c0_377] : memref<2x7x22x16xf32, #tpu.memory_space<vmem>>, vector<1x1x16x16xf32>
      %398 = vector.shape_cast %397 : vector<1x1x16x16xf32> to vector<16x16xf32>
      %399 = vector.broadcast %396 : f32 to vector<16x16xf32>
      %400 = arith.mulf %399, %398 : vector<16x16xf32>
      %401 = arith.addf %377, %400 : vector<16x16xf32>
      %c18_378 = arith.constant 18 : index
      %402 = memref.load %arg2[%c18_378] : memref<98xf32, #tpu.memory_space<smem>>
      %c0_379 = arith.constant 0 : index
      %c4_380 = arith.constant 4 : index
      %c2_381 = arith.constant 2 : index
      %c0_382 = arith.constant 0 : index
      %403 = vector.load %arg6[%c0_379, %c4_380, %c2_381, %c0_382] : memref<2x7x22x16xf32, #tpu.memory_space<vmem>>, vector<1x1x16x16xf32>
      %404 = vector.shape_cast %403 : vector<1x1x16x16xf32> to vector<16x16xf32>
      %405 = vector.broadcast %402 : f32 to vector<16x16xf32>
      %406 = arith.mulf %405, %404 : vector<16x16xf32>
      %407 = arith.addf %383, %406 : vector<16x16xf32>
      %c19_383 = arith.constant 19 : index
      %408 = memref.load %arg2[%c19_383] : memref<98xf32, #tpu.memory_space<smem>>
      %c0_384 = arith.constant 0 : index
      %c5_385 = arith.constant 5 : index
      %c2_386 = arith.constant 2 : index
      %c0_387 = arith.constant 0 : index
      %409 = vector.load %arg6[%c0_384, %c5_385, %c2_386, %c0_387] : memref<2x7x22x16xf32, #tpu.memory_space<vmem>>, vector<1x1x16x16xf32>
      %410 = vector.shape_cast %409 : vector<1x1x16x16xf32> to vector<16x16xf32>
      %411 = vector.broadcast %408 : f32 to vector<16x16xf32>
      %412 = arith.mulf %411, %410 : vector<16x16xf32>
      %413 = arith.addf %389, %412 : vector<16x16xf32>
      %c20 = arith.constant 20 : index
      %414 = memref.load %arg2[%c20] : memref<98xf32, #tpu.memory_space<smem>>
      %c0_388 = arith.constant 0 : index
      %c6_389 = arith.constant 6 : index
      %c2_390 = arith.constant 2 : index
      %c0_391 = arith.constant 0 : index
      %415 = vector.load %arg6[%c0_388, %c6_389, %c2_390, %c0_391] : memref<2x7x22x16xf32, #tpu.memory_space<vmem>>, vector<1x1x16x16xf32>
      %416 = vector.shape_cast %415 : vector<1x1x16x16xf32> to vector<16x16xf32>
      %417 = vector.broadcast %414 : f32 to vector<16x16xf32>
      %418 = arith.mulf %417, %416 : vector<16x16xf32>
      %419 = arith.addf %395, %418 : vector<16x16xf32>
      %c21 = arith.constant 21 : index
      %420 = memref.load %arg2[%c21] : memref<98xf32, #tpu.memory_space<smem>>
      %c0_392 = arith.constant 0 : index
      %c0_393 = arith.constant 0 : index
      %c3_394 = arith.constant 3 : index
      %c0_395 = arith.constant 0 : index
      %421 = vector.load %arg6[%c0_392, %c0_393, %c3_394, %c0_395] : memref<2x7x22x16xf32, #tpu.memory_space<vmem>>, vector<1x1x16x16xf32>
      %422 = vector.shape_cast %421 : vector<1x1x16x16xf32> to vector<16x16xf32>
      %423 = vector.broadcast %420 : f32 to vector<16x16xf32>
      %424 = arith.mulf %423, %422 : vector<16x16xf32>
      %425 = arith.addf %401, %424 : vector<16x16xf32>
      %c22 = arith.constant 22 : index
      %426 = memref.load %arg2[%c22] : memref<98xf32, #tpu.memory_space<smem>>
      %c0_396 = arith.constant 0 : index
      %c1_397 = arith.constant 1 : index
      %c3_398 = arith.constant 3 : index
      %c0_399 = arith.constant 0 : index
      %427 = vector.load %arg6[%c0_396, %c1_397, %c3_398, %c0_399] : memref<2x7x22x16xf32, #tpu.memory_space<vmem>>, vector<1x1x16x16xf32>
      %428 = vector.shape_cast %427 : vector<1x1x16x16xf32> to vector<16x16xf32>
      %429 = vector.broadcast %426 : f32 to vector<16x16xf32>
      %430 = arith.mulf %429, %428 : vector<16x16xf32>
      %431 = arith.addf %407, %430 : vector<16x16xf32>
      %c23 = arith.constant 23 : index
      %432 = memref.load %arg2[%c23] : memref<98xf32, #tpu.memory_space<smem>>
      %c0_400 = arith.constant 0 : index
      %c2_401 = arith.constant 2 : index
      %c3_402 = arith.constant 3 : index
      %c0_403 = arith.constant 0 : index
      %433 = vector.load %arg6[%c0_400, %c2_401, %c3_402, %c0_403] : memref<2x7x22x16xf32, #tpu.memory_space<vmem>>, vector<1x1x16x16xf32>
      %434 = vector.shape_cast %433 : vector<1x1x16x16xf32> to vector<16x16xf32>
      %435 = vector.broadcast %432 : f32 to vector<16x16xf32>
      %436 = arith.mulf %435, %434 : vector<16x16xf32>
      %437 = arith.addf %413, %436 : vector<16x16xf32>
      %c24 = arith.constant 24 : index
      %438 = memref.load %arg2[%c24] : memref<98xf32, #tpu.memory_space<smem>>
      %c0_404 = arith.constant 0 : index
      %c3_405 = arith.constant 3 : index
      %c3_406 = arith.constant 3 : index
      %c0_407 = arith.constant 0 : index
      %439 = vector.load %arg6[%c0_404, %c3_405, %c3_406, %c0_407] : memref<2x7x22x16xf32, #tpu.memory_space<vmem>>, vector<1x1x16x16xf32>
      %440 = vector.shape_cast %439 : vector<1x1x16x16xf32> to vector<16x16xf32>
      %441 = vector.broadcast %438 : f32 to vector<16x16xf32>
      %442 = arith.mulf %441, %440 : vector<16x16xf32>
      %443 = arith.addf %419, %442 : vector<16x16xf32>
      %c25 = arith.constant 25 : index
      %444 = memref.load %arg2[%c25] : memref<98xf32, #tpu.memory_space<smem>>
      %c0_408 = arith.constant 0 : index
      %c4_409 = arith.constant 4 : index
      %c3_410 = arith.constant 3 : index
      %c0_411 = arith.constant 0 : index
      %445 = vector.load %arg6[%c0_408, %c4_409, %c3_410, %c0_411] : memref<2x7x22x16xf32, #tpu.memory_space<vmem>>, vector<1x1x16x16xf32>
      %446 = vector.shape_cast %445 : vector<1x1x16x16xf32> to vector<16x16xf32>
      %447 = vector.broadcast %444 : f32 to vector<16x16xf32>
      %448 = arith.mulf %447, %446 : vector<16x16xf32>
      %449 = arith.addf %425, %448 : vector<16x16xf32>
      %c26 = arith.constant 26 : index
      %450 = memref.load %arg2[%c26] : memref<98xf32, #tpu.memory_space<smem>>
      %c0_412 = arith.constant 0 : index
      %c5_413 = arith.constant 5 : index
      %c3_414 = arith.constant 3 : index
      %c0_415 = arith.constant 0 : index
      %451 = vector.load %arg6[%c0_412, %c5_413, %c3_414, %c0_415] : memref<2x7x22x16xf32, #tpu.memory_space<vmem>>, vector<1x1x16x16xf32>
      %452 = vector.shape_cast %451 : vector<1x1x16x16xf32> to vector<16x16xf32>
      %453 = vector.broadcast %450 : f32 to vector<16x16xf32>
      %454 = arith.mulf %453, %452 : vector<16x16xf32>
      %455 = arith.addf %431, %454 : vector<16x16xf32>
      %c27 = arith.constant 27 : index
      %456 = memref.load %arg2[%c27] : memref<98xf32, #tpu.memory_space<smem>>
      %c0_416 = arith.constant 0 : index
      %c6_417 = arith.constant 6 : index
      %c3_418 = arith.constant 3 : index
      %c0_419 = arith.constant 0 : index
      %457 = vector.load %arg6[%c0_416, %c6_417, %c3_418, %c0_419] : memref<2x7x22x16xf32, #tpu.memory_space<vmem>>, vector<1x1x16x16xf32>
      %458 = vector.shape_cast %457 : vector<1x1x16x16xf32> to vector<16x16xf32>
      %459 = vector.broadcast %456 : f32 to vector<16x16xf32>
      %460 = arith.mulf %459, %458 : vector<16x16xf32>
      %461 = arith.addf %437, %460 : vector<16x16xf32>
      %c28 = arith.constant 28 : index
      %462 = memref.load %arg2[%c28] : memref<98xf32, #tpu.memory_space<smem>>
      %c0_420 = arith.constant 0 : index
      %c0_421 = arith.constant 0 : index
      %c4_422 = arith.constant 4 : index
      %c0_423 = arith.constant 0 : index
      %463 = vector.load %arg6[%c0_420, %c0_421, %c4_422, %c0_423] : memref<2x7x22x16xf32, #tpu.memory_space<vmem>>, vector<1x1x16x16xf32>
      %464 = vector.shape_cast %463 : vector<1x1x16x16xf32> to vector<16x16xf32>
      %465 = vector.broadcast %462 : f32 to vector<16x16xf32>
      %466 = arith.mulf %465, %464 : vector<16x16xf32>
      %467 = arith.addf %443, %466 : vector<16x16xf32>
      %c29 = arith.constant 29 : index
      %468 = memref.load %arg2[%c29] : memref<98xf32, #tpu.memory_space<smem>>
      %c0_424 = arith.constant 0 : index
      %c1_425 = arith.constant 1 : index
      %c4_426 = arith.constant 4 : index
      %c0_427 = arith.constant 0 : index
      %469 = vector.load %arg6[%c0_424, %c1_425, %c4_426, %c0_427] : memref<2x7x22x16xf32, #tpu.memory_space<vmem>>, vector<1x1x16x16xf32>
      %470 = vector.shape_cast %469 : vector<1x1x16x16xf32> to vector<16x16xf32>
      %471 = vector.broadcast %468 : f32 to vector<16x16xf32>
      %472 = arith.mulf %471, %470 : vector<16x16xf32>
      %473 = arith.addf %449, %472 : vector<16x16xf32>
      %c30 = arith.constant 30 : index
      %474 = memref.load %arg2[%c30] : memref<98xf32, #tpu.memory_space<smem>>
      %c0_428 = arith.constant 0 : index
      %c2_429 = arith.constant 2 : index
      %c4_430 = arith.constant 4 : index
      %c0_431 = arith.constant 0 : index
      %475 = vector.load %arg6[%c0_428, %c2_429, %c4_430, %c0_431] : memref<2x7x22x16xf32, #tpu.memory_space<vmem>>, vector<1x1x16x16xf32>
      %476 = vector.shape_cast %475 : vector<1x1x16x16xf32> to vector<16x16xf32>
      %477 = vector.broadcast %474 : f32 to vector<16x16xf32>
      %478 = arith.mulf %477, %476 : vector<16x16xf32>
      %479 = arith.addf %455, %478 : vector<16x16xf32>
      %c31 = arith.constant 31 : index
      %480 = memref.load %arg2[%c31] : memref<98xf32, #tpu.memory_space<smem>>
      %c0_432 = arith.constant 0 : index
      %c3_433 = arith.constant 3 : index
      %c4_434 = arith.constant 4 : index
      %c0_435 = arith.constant 0 : index
      %481 = vector.load %arg6[%c0_432, %c3_433, %c4_434, %c0_435] : memref<2x7x22x16xf32, #tpu.memory_space<vmem>>, vector<1x1x16x16xf32>
      %482 = vector.shape_cast %481 : vector<1x1x16x16xf32> to vector<16x16xf32>
      %483 = vector.broadcast %480 : f32 to vector<16x16xf32>
      %484 = arith.mulf %483, %482 : vector<16x16xf32>
      %485 = arith.addf %461, %484 : vector<16x16xf32>
      %c32_436 = arith.constant 32 : index
      %486 = memref.load %arg2[%c32_436] : memref<98xf32, #tpu.memory_space<smem>>
      %c0_437 = arith.constant 0 : index
      %c4_438 = arith.constant 4 : index
      %c4_439 = arith.constant 4 : index
      %c0_440 = arith.constant 0 : index
      %487 = vector.load %arg6[%c0_437, %c4_438, %c4_439, %c0_440] : memref<2x7x22x16xf32, #tpu.memory_space<vmem>>, vector<1x1x16x16xf32>
      %488 = vector.shape_cast %487 : vector<1x1x16x16xf32> to vector<16x16xf32>
      %489 = vector.broadcast %486 : f32 to vector<16x16xf32>
      %490 = arith.mulf %489, %488 : vector<16x16xf32>
      %491 = arith.addf %467, %490 : vector<16x16xf32>
      %c33 = arith.constant 33 : index
      %492 = memref.load %arg2[%c33] : memref<98xf32, #tpu.memory_space<smem>>
      %c0_441 = arith.constant 0 : index
      %c5_442 = arith.constant 5 : index
      %c4_443 = arith.constant 4 : index
      %c0_444 = arith.constant 0 : index
      %493 = vector.load %arg6[%c0_441, %c5_442, %c4_443, %c0_444] : memref<2x7x22x16xf32, #tpu.memory_space<vmem>>, vector<1x1x16x16xf32>
      %494 = vector.shape_cast %493 : vector<1x1x16x16xf32> to vector<16x16xf32>
      %495 = vector.broadcast %492 : f32 to vector<16x16xf32>
      %496 = arith.mulf %495, %494 : vector<16x16xf32>
      %497 = arith.addf %473, %496 : vector<16x16xf32>
      %c34 = arith.constant 34 : index
      %498 = memref.load %arg2[%c34] : memref<98xf32, #tpu.memory_space<smem>>
      %c0_445 = arith.constant 0 : index
      %c6_446 = arith.constant 6 : index
      %c4_447 = arith.constant 4 : index
      %c0_448 = arith.constant 0 : index
      %499 = vector.load %arg6[%c0_445, %c6_446, %c4_447, %c0_448] : memref<2x7x22x16xf32, #tpu.memory_space<vmem>>, vector<1x1x16x16xf32>
      %500 = vector.shape_cast %499 : vector<1x1x16x16xf32> to vector<16x16xf32>
      %501 = vector.broadcast %498 : f32 to vector<16x16xf32>
      %502 = arith.mulf %501, %500 : vector<16x16xf32>
      %503 = arith.addf %479, %502 : vector<16x16xf32>
      %c35 = arith.constant 35 : index
      %504 = memref.load %arg2[%c35] : memref<98xf32, #tpu.memory_space<smem>>
      %c0_449 = arith.constant 0 : index
      %c0_450 = arith.constant 0 : index
      %c5_451 = arith.constant 5 : index
      %c0_452 = arith.constant 0 : index
      %505 = vector.load %arg6[%c0_449, %c0_450, %c5_451, %c0_452] : memref<2x7x22x16xf32, #tpu.memory_space<vmem>>, vector<1x1x16x16xf32>
      %506 = vector.shape_cast %505 : vector<1x1x16x16xf32> to vector<16x16xf32>
      %507 = vector.broadcast %504 : f32 to vector<16x16xf32>
      %508 = arith.mulf %507, %506 : vector<16x16xf32>
      %509 = arith.addf %485, %508 : vector<16x16xf32>
      %c36 = arith.constant 36 : index
      %510 = memref.load %arg2[%c36] : memref<98xf32, #tpu.memory_space<smem>>
      %c0_453 = arith.constant 0 : index
      %c1_454 = arith.constant 1 : index
      %c5_455 = arith.constant 5 : index
      %c0_456 = arith.constant 0 : index
      %511 = vector.load %arg6[%c0_453, %c1_454, %c5_455, %c0_456] : memref<2x7x22x16xf32, #tpu.memory_space<vmem>>, vector<1x1x16x16xf32>
      %512 = vector.shape_cast %511 : vector<1x1x16x16xf32> to vector<16x16xf32>
      %513 = vector.broadcast %510 : f32 to vector<16x16xf32>
      %514 = arith.mulf %513, %512 : vector<16x16xf32>
      %515 = arith.addf %491, %514 : vector<16x16xf32>
      %c37 = arith.constant 37 : index
      %516 = memref.load %arg2[%c37] : memref<98xf32, #tpu.memory_space<smem>>
      %c0_457 = arith.constant 0 : index
      %c2_458 = arith.constant 2 : index
      %c5_459 = arith.constant 5 : index
      %c0_460 = arith.constant 0 : index
      %517 = vector.load %arg6[%c0_457, %c2_458, %c5_459, %c0_460] : memref<2x7x22x16xf32, #tpu.memory_space<vmem>>, vector<1x1x16x16xf32>
      %518 = vector.shape_cast %517 : vector<1x1x16x16xf32> to vector<16x16xf32>
      %519 = vector.broadcast %516 : f32 to vector<16x16xf32>
      %520 = arith.mulf %519, %518 : vector<16x16xf32>
      %521 = arith.addf %497, %520 : vector<16x16xf32>
      %c38 = arith.constant 38 : index
      %522 = memref.load %arg2[%c38] : memref<98xf32, #tpu.memory_space<smem>>
      %c0_461 = arith.constant 0 : index
      %c3_462 = arith.constant 3 : index
      %c5_463 = arith.constant 5 : index
      %c0_464 = arith.constant 0 : index
      %523 = vector.load %arg6[%c0_461, %c3_462, %c5_463, %c0_464] : memref<2x7x22x16xf32, #tpu.memory_space<vmem>>, vector<1x1x16x16xf32>
      %524 = vector.shape_cast %523 : vector<1x1x16x16xf32> to vector<16x16xf32>
      %525 = vector.broadcast %522 : f32 to vector<16x16xf32>
      %526 = arith.mulf %525, %524 : vector<16x16xf32>
      %527 = arith.addf %503, %526 : vector<16x16xf32>
      %c39 = arith.constant 39 : index
      %528 = memref.load %arg2[%c39] : memref<98xf32, #tpu.memory_space<smem>>
      %c0_465 = arith.constant 0 : index
      %c4_466 = arith.constant 4 : index
      %c5_467 = arith.constant 5 : index
      %c0_468 = arith.constant 0 : index
      %529 = vector.load %arg6[%c0_465, %c4_466, %c5_467, %c0_468] : memref<2x7x22x16xf32, #tpu.memory_space<vmem>>, vector<1x1x16x16xf32>
      %530 = vector.shape_cast %529 : vector<1x1x16x16xf32> to vector<16x16xf32>
      %531 = vector.broadcast %528 : f32 to vector<16x16xf32>
      %532 = arith.mulf %531, %530 : vector<16x16xf32>
      %533 = arith.addf %509, %532 : vector<16x16xf32>
      %c40 = arith.constant 40 : index
      %534 = memref.load %arg2[%c40] : memref<98xf32, #tpu.memory_space<smem>>
      %c0_469 = arith.constant 0 : index
      %c5_470 = arith.constant 5 : index
      %c5_471 = arith.constant 5 : index
      %c0_472 = arith.constant 0 : index
      %535 = vector.load %arg6[%c0_469, %c5_470, %c5_471, %c0_472] : memref<2x7x22x16xf32, #tpu.memory_space<vmem>>, vector<1x1x16x16xf32>
      %536 = vector.shape_cast %535 : vector<1x1x16x16xf32> to vector<16x16xf32>
      %537 = vector.broadcast %534 : f32 to vector<16x16xf32>
      %538 = arith.mulf %537, %536 : vector<16x16xf32>
      %539 = arith.addf %515, %538 : vector<16x16xf32>
      %c41 = arith.constant 41 : index
      %540 = memref.load %arg2[%c41] : memref<98xf32, #tpu.memory_space<smem>>
      %c0_473 = arith.constant 0 : index
      %c6_474 = arith.constant 6 : index
      %c5_475 = arith.constant 5 : index
      %c0_476 = arith.constant 0 : index
      %541 = vector.load %arg6[%c0_473, %c6_474, %c5_475, %c0_476] : memref<2x7x22x16xf32, #tpu.memory_space<vmem>>, vector<1x1x16x16xf32>
      %542 = vector.shape_cast %541 : vector<1x1x16x16xf32> to vector<16x16xf32>
      %543 = vector.broadcast %540 : f32 to vector<16x16xf32>
      %544 = arith.mulf %543, %542 : vector<16x16xf32>
      %545 = arith.addf %521, %544 : vector<16x16xf32>
      %c42 = arith.constant 42 : index
      %546 = memref.load %arg2[%c42] : memref<98xf32, #tpu.memory_space<smem>>
      %c0_477 = arith.constant 0 : index
      %c0_478 = arith.constant 0 : index
      %c6_479 = arith.constant 6 : index
      %c0_480 = arith.constant 0 : index
      %547 = vector.load %arg6[%c0_477, %c0_478, %c6_479, %c0_480] : memref<2x7x22x16xf32, #tpu.memory_space<vmem>>, vector<1x1x16x16xf32>
      %548 = vector.shape_cast %547 : vector<1x1x16x16xf32> to vector<16x16xf32>
      %549 = vector.broadcast %546 : f32 to vector<16x16xf32>
      %550 = arith.mulf %549, %548 : vector<16x16xf32>
      %551 = arith.addf %527, %550 : vector<16x16xf32>
      %c43 = arith.constant 43 : index
      %552 = memref.load %arg2[%c43] : memref<98xf32, #tpu.memory_space<smem>>
      %c0_481 = arith.constant 0 : index
      %c1_482 = arith.constant 1 : index
      %c6_483 = arith.constant 6 : index
      %c0_484 = arith.constant 0 : index
      %553 = vector.load %arg6[%c0_481, %c1_482, %c6_483, %c0_484] : memref<2x7x22x16xf32, #tpu.memory_space<vmem>>, vector<1x1x16x16xf32>
      %554 = vector.shape_cast %553 : vector<1x1x16x16xf32> to vector<16x16xf32>
      %555 = vector.broadcast %552 : f32 to vector<16x16xf32>
      %556 = arith.mulf %555, %554 : vector<16x16xf32>
      %557 = arith.addf %533, %556 : vector<16x16xf32>
      %c44 = arith.constant 44 : index
      %558 = memref.load %arg2[%c44] : memref<98xf32, #tpu.memory_space<smem>>
      %c0_485 = arith.constant 0 : index
      %c2_486 = arith.constant 2 : index
      %c6_487 = arith.constant 6 : index
      %c0_488 = arith.constant 0 : index
      %559 = vector.load %arg6[%c0_485, %c2_486, %c6_487, %c0_488] : memref<2x7x22x16xf32, #tpu.memory_space<vmem>>, vector<1x1x16x16xf32>
      %560 = vector.shape_cast %559 : vector<1x1x16x16xf32> to vector<16x16xf32>
      %561 = vector.broadcast %558 : f32 to vector<16x16xf32>
      %562 = arith.mulf %561, %560 : vector<16x16xf32>
      %563 = arith.addf %539, %562 : vector<16x16xf32>
      %c45 = arith.constant 45 : index
      %564 = memref.load %arg2[%c45] : memref<98xf32, #tpu.memory_space<smem>>
      %c0_489 = arith.constant 0 : index
      %c3_490 = arith.constant 3 : index
      %c6_491 = arith.constant 6 : index
      %c0_492 = arith.constant 0 : index
      %565 = vector.load %arg6[%c0_489, %c3_490, %c6_491, %c0_492] : memref<2x7x22x16xf32, #tpu.memory_space<vmem>>, vector<1x1x16x16xf32>
      %566 = vector.shape_cast %565 : vector<1x1x16x16xf32> to vector<16x16xf32>
      %567 = vector.broadcast %564 : f32 to vector<16x16xf32>
      %568 = arith.mulf %567, %566 : vector<16x16xf32>
      %569 = arith.addf %545, %568 : vector<16x16xf32>
      %c46 = arith.constant 46 : index
      %570 = memref.load %arg2[%c46] : memref<98xf32, #tpu.memory_space<smem>>
      %c0_493 = arith.constant 0 : index
      %c4_494 = arith.constant 4 : index
      %c6_495 = arith.constant 6 : index
      %c0_496 = arith.constant 0 : index
      %571 = vector.load %arg6[%c0_493, %c4_494, %c6_495, %c0_496] : memref<2x7x22x16xf32, #tpu.memory_space<vmem>>, vector<1x1x16x16xf32>
      %572 = vector.shape_cast %571 : vector<1x1x16x16xf32> to vector<16x16xf32>
      %573 = vector.broadcast %570 : f32 to vector<16x16xf32>
      %574 = arith.mulf %573, %572 : vector<16x16xf32>
      %575 = arith.addf %551, %574 : vector<16x16xf32>
      %c47 = arith.constant 47 : index
      %576 = memref.load %arg2[%c47] : memref<98xf32, #tpu.memory_space<smem>>
      %c0_497 = arith.constant 0 : index
      %c5_498 = arith.constant 5 : index
      %c6_499 = arith.constant 6 : index
      %c0_500 = arith.constant 0 : index
      %577 = vector.load %arg6[%c0_497, %c5_498, %c6_499, %c0_500] : memref<2x7x22x16xf32, #tpu.memory_space<vmem>>, vector<1x1x16x16xf32>
      %578 = vector.shape_cast %577 : vector<1x1x16x16xf32> to vector<16x16xf32>
      %579 = vector.broadcast %576 : f32 to vector<16x16xf32>
      %580 = arith.mulf %579, %578 : vector<16x16xf32>
      %581 = arith.addf %557, %580 : vector<16x16xf32>
      %c48_501 = arith.constant 48 : index
      %582 = memref.load %arg2[%c48_501] : memref<98xf32, #tpu.memory_space<smem>>
      %c0_502 = arith.constant 0 : index
      %c6_503 = arith.constant 6 : index
      %c6_504 = arith.constant 6 : index
      %c0_505 = arith.constant 0 : index
      %583 = vector.load %arg6[%c0_502, %c6_503, %c6_504, %c0_505] : memref<2x7x22x16xf32, #tpu.memory_space<vmem>>, vector<1x1x16x16xf32>
      %584 = vector.shape_cast %583 : vector<1x1x16x16xf32> to vector<16x16xf32>
      %585 = vector.broadcast %582 : f32 to vector<16x16xf32>
      %586 = arith.mulf %585, %584 : vector<16x16xf32>
      %587 = arith.addf %563, %586 : vector<16x16xf32>
      %c49 = arith.constant 49 : index
      %588 = memref.load %arg2[%c49] : memref<98xf32, #tpu.memory_space<smem>>
      %c1_506 = arith.constant 1 : index
      %c0_507 = arith.constant 0 : index
      %c0_508 = arith.constant 0 : index
      %c0_509 = arith.constant 0 : index
      %589 = vector.load %arg6[%c1_506, %c0_507, %c0_508, %c0_509] : memref<2x7x22x16xf32, #tpu.memory_space<vmem>>, vector<1x1x16x16xf32>
      %590 = vector.shape_cast %589 : vector<1x1x16x16xf32> to vector<16x16xf32>
      %591 = vector.broadcast %588 : f32 to vector<16x16xf32>
      %592 = arith.mulf %591, %590 : vector<16x16xf32>
      %593 = arith.addf %569, %592 : vector<16x16xf32>
      %c50 = arith.constant 50 : index
      %594 = memref.load %arg2[%c50] : memref<98xf32, #tpu.memory_space<smem>>
      %c1_510 = arith.constant 1 : index
      %c1_511 = arith.constant 1 : index
      %c0_512 = arith.constant 0 : index
      %c0_513 = arith.constant 0 : index
      %595 = vector.load %arg6[%c1_510, %c1_511, %c0_512, %c0_513] : memref<2x7x22x16xf32, #tpu.memory_space<vmem>>, vector<1x1x16x16xf32>
      %596 = vector.shape_cast %595 : vector<1x1x16x16xf32> to vector<16x16xf32>
      %597 = vector.broadcast %594 : f32 to vector<16x16xf32>
      %598 = arith.mulf %597, %596 : vector<16x16xf32>
      %599 = arith.addf %575, %598 : vector<16x16xf32>
      %c51 = arith.constant 51 : index
      %600 = memref.load %arg2[%c51] : memref<98xf32, #tpu.memory_space<smem>>
      %c1_514 = arith.constant 1 : index
      %c2_515 = arith.constant 2 : index
      %c0_516 = arith.constant 0 : index
      %c0_517 = arith.constant 0 : index
      %601 = vector.load %arg6[%c1_514, %c2_515, %c0_516, %c0_517] : memref<2x7x22x16xf32, #tpu.memory_space<vmem>>, vector<1x1x16x16xf32>
      %602 = vector.shape_cast %601 : vector<1x1x16x16xf32> to vector<16x16xf32>
      %603 = vector.broadcast %600 : f32 to vector<16x16xf32>
      %604 = arith.mulf %603, %602 : vector<16x16xf32>
      %605 = arith.addf %581, %604 : vector<16x16xf32>
      %c52 = arith.constant 52 : index
      %606 = memref.load %arg2[%c52] : memref<98xf32, #tpu.memory_space<smem>>
      %c1_518 = arith.constant 1 : index
      %c3_519 = arith.constant 3 : index
      %c0_520 = arith.constant 0 : index
      %c0_521 = arith.constant 0 : index
      %607 = vector.load %arg6[%c1_518, %c3_519, %c0_520, %c0_521] : memref<2x7x22x16xf32, #tpu.memory_space<vmem>>, vector<1x1x16x16xf32>
      %608 = vector.shape_cast %607 : vector<1x1x16x16xf32> to vector<16x16xf32>
      %609 = vector.broadcast %606 : f32 to vector<16x16xf32>
      %610 = arith.mulf %609, %608 : vector<16x16xf32>
      %611 = arith.addf %587, %610 : vector<16x16xf32>
      %c53 = arith.constant 53 : index
      %612 = memref.load %arg2[%c53] : memref<98xf32, #tpu.memory_space<smem>>
      %c1_522 = arith.constant 1 : index
      %c4_523 = arith.constant 4 : index
      %c0_524 = arith.constant 0 : index
      %c0_525 = arith.constant 0 : index
      %613 = vector.load %arg6[%c1_522, %c4_523, %c0_524, %c0_525] : memref<2x7x22x16xf32, #tpu.memory_space<vmem>>, vector<1x1x16x16xf32>
      %614 = vector.shape_cast %613 : vector<1x1x16x16xf32> to vector<16x16xf32>
      %615 = vector.broadcast %612 : f32 to vector<16x16xf32>
      %616 = arith.mulf %615, %614 : vector<16x16xf32>
      %617 = arith.addf %593, %616 : vector<16x16xf32>
      %c54 = arith.constant 54 : index
      %618 = memref.load %arg2[%c54] : memref<98xf32, #tpu.memory_space<smem>>
      %c1_526 = arith.constant 1 : index
      %c5_527 = arith.constant 5 : index
      %c0_528 = arith.constant 0 : index
      %c0_529 = arith.constant 0 : index
      %619 = vector.load %arg6[%c1_526, %c5_527, %c0_528, %c0_529] : memref<2x7x22x16xf32, #tpu.memory_space<vmem>>, vector<1x1x16x16xf32>
      %620 = vector.shape_cast %619 : vector<1x1x16x16xf32> to vector<16x16xf32>
      %621 = vector.broadcast %618 : f32 to vector<16x16xf32>
      %622 = arith.mulf %621, %620 : vector<16x16xf32>
      %623 = arith.addf %599, %622 : vector<16x16xf32>
      %c55 = arith.constant 55 : index
      %624 = memref.load %arg2[%c55] : memref<98xf32, #tpu.memory_space<smem>>
      %c1_530 = arith.constant 1 : index
      %c6_531 = arith.constant 6 : index
      %c0_532 = arith.constant 0 : index
      %c0_533 = arith.constant 0 : index
      %625 = vector.load %arg6[%c1_530, %c6_531, %c0_532, %c0_533] : memref<2x7x22x16xf32, #tpu.memory_space<vmem>>, vector<1x1x16x16xf32>
      %626 = vector.shape_cast %625 : vector<1x1x16x16xf32> to vector<16x16xf32>
      %627 = vector.broadcast %624 : f32 to vector<16x16xf32>
      %628 = arith.mulf %627, %626 : vector<16x16xf32>
      %629 = arith.addf %605, %628 : vector<16x16xf32>
      %c56 = arith.constant 56 : index
      %630 = memref.load %arg2[%c56] : memref<98xf32, #tpu.memory_space<smem>>
      %c1_534 = arith.constant 1 : index
      %c0_535 = arith.constant 0 : index
      %c1_536 = arith.constant 1 : index
      %c0_537 = arith.constant 0 : index
      %631 = vector.load %arg6[%c1_534, %c0_535, %c1_536, %c0_537] : memref<2x7x22x16xf32, #tpu.memory_space<vmem>>, vector<1x1x16x16xf32>
      %632 = vector.shape_cast %631 : vector<1x1x16x16xf32> to vector<16x16xf32>
      %633 = vector.broadcast %630 : f32 to vector<16x16xf32>
      %634 = arith.mulf %633, %632 : vector<16x16xf32>
      %635 = arith.addf %611, %634 : vector<16x16xf32>
      %c57 = arith.constant 57 : index
      %636 = memref.load %arg2[%c57] : memref<98xf32, #tpu.memory_space<smem>>
      %c1_538 = arith.constant 1 : index
      %c1_539 = arith.constant 1 : index
      %c1_540 = arith.constant 1 : index
      %c0_541 = arith.constant 0 : index
      %637 = vector.load %arg6[%c1_538, %c1_539, %c1_540, %c0_541] : memref<2x7x22x16xf32, #tpu.memory_space<vmem>>, vector<1x1x16x16xf32>
      %638 = vector.shape_cast %637 : vector<1x1x16x16xf32> to vector<16x16xf32>
      %639 = vector.broadcast %636 : f32 to vector<16x16xf32>
      %640 = arith.mulf %639, %638 : vector<16x16xf32>
      %641 = arith.addf %617, %640 : vector<16x16xf32>
      %c58 = arith.constant 58 : index
      %642 = memref.load %arg2[%c58] : memref<98xf32, #tpu.memory_space<smem>>
      %c1_542 = arith.constant 1 : index
      %c2_543 = arith.constant 2 : index
      %c1_544 = arith.constant 1 : index
      %c0_545 = arith.constant 0 : index
      %643 = vector.load %arg6[%c1_542, %c2_543, %c1_544, %c0_545] : memref<2x7x22x16xf32, #tpu.memory_space<vmem>>, vector<1x1x16x16xf32>
      %644 = vector.shape_cast %643 : vector<1x1x16x16xf32> to vector<16x16xf32>
      %645 = vector.broadcast %642 : f32 to vector<16x16xf32>
      %646 = arith.mulf %645, %644 : vector<16x16xf32>
      %647 = arith.addf %623, %646 : vector<16x16xf32>
      %c59 = arith.constant 59 : index
      %648 = memref.load %arg2[%c59] : memref<98xf32, #tpu.memory_space<smem>>
      %c1_546 = arith.constant 1 : index
      %c3_547 = arith.constant 3 : index
      %c1_548 = arith.constant 1 : index
      %c0_549 = arith.constant 0 : index
      %649 = vector.load %arg6[%c1_546, %c3_547, %c1_548, %c0_549] : memref<2x7x22x16xf32, #tpu.memory_space<vmem>>, vector<1x1x16x16xf32>
      %650 = vector.shape_cast %649 : vector<1x1x16x16xf32> to vector<16x16xf32>
      %651 = vector.broadcast %648 : f32 to vector<16x16xf32>
      %652 = arith.mulf %651, %650 : vector<16x16xf32>
      %653 = arith.addf %629, %652 : vector<16x16xf32>
      %c60 = arith.constant 60 : index
      %654 = memref.load %arg2[%c60] : memref<98xf32, #tpu.memory_space<smem>>
      %c1_550 = arith.constant 1 : index
      %c4_551 = arith.constant 4 : index
      %c1_552 = arith.constant 1 : index
      %c0_553 = arith.constant 0 : index
      %655 = vector.load %arg6[%c1_550, %c4_551, %c1_552, %c0_553] : memref<2x7x22x16xf32, #tpu.memory_space<vmem>>, vector<1x1x16x16xf32>
      %656 = vector.shape_cast %655 : vector<1x1x16x16xf32> to vector<16x16xf32>
      %657 = vector.broadcast %654 : f32 to vector<16x16xf32>
      %658 = arith.mulf %657, %656 : vector<16x16xf32>
      %659 = arith.addf %635, %658 : vector<16x16xf32>
      %c61 = arith.constant 61 : index
      %660 = memref.load %arg2[%c61] : memref<98xf32, #tpu.memory_space<smem>>
      %c1_554 = arith.constant 1 : index
      %c5_555 = arith.constant 5 : index
      %c1_556 = arith.constant 1 : index
      %c0_557 = arith.constant 0 : index
      %661 = vector.load %arg6[%c1_554, %c5_555, %c1_556, %c0_557] : memref<2x7x22x16xf32, #tpu.memory_space<vmem>>, vector<1x1x16x16xf32>
      %662 = vector.shape_cast %661 : vector<1x1x16x16xf32> to vector<16x16xf32>
      %663 = vector.broadcast %660 : f32 to vector<16x16xf32>
      %664 = arith.mulf %663, %662 : vector<16x16xf32>
      %665 = arith.addf %641, %664 : vector<16x16xf32>
      %c62 = arith.constant 62 : index
      %666 = memref.load %arg2[%c62] : memref<98xf32, #tpu.memory_space<smem>>
      %c1_558 = arith.constant 1 : index
      %c6_559 = arith.constant 6 : index
      %c1_560 = arith.constant 1 : index
      %c0_561 = arith.constant 0 : index
      %667 = vector.load %arg6[%c1_558, %c6_559, %c1_560, %c0_561] : memref<2x7x22x16xf32, #tpu.memory_space<vmem>>, vector<1x1x16x16xf32>
      %668 = vector.shape_cast %667 : vector<1x1x16x16xf32> to vector<16x16xf32>
      %669 = vector.broadcast %666 : f32 to vector<16x16xf32>
      %670 = arith.mulf %669, %668 : vector<16x16xf32>
      %671 = arith.addf %647, %670 : vector<16x16xf32>
      %c63 = arith.constant 63 : index
      %672 = memref.load %arg2[%c63] : memref<98xf32, #tpu.memory_space<smem>>
      %c1_562 = arith.constant 1 : index
      %c0_563 = arith.constant 0 : index
      %c2_564 = arith.constant 2 : index
      %c0_565 = arith.constant 0 : index
      %673 = vector.load %arg6[%c1_562, %c0_563, %c2_564, %c0_565] : memref<2x7x22x16xf32, #tpu.memory_space<vmem>>, vector<1x1x16x16xf32>
      %674 = vector.shape_cast %673 : vector<1x1x16x16xf32> to vector<16x16xf32>
      %675 = vector.broadcast %672 : f32 to vector<16x16xf32>
      %676 = arith.mulf %675, %674 : vector<16x16xf32>
      %677 = arith.addf %653, %676 : vector<16x16xf32>
      %c64_566 = arith.constant 64 : index
      %678 = memref.load %arg2[%c64_566] : memref<98xf32, #tpu.memory_space<smem>>
      %c1_567 = arith.constant 1 : index
      %c1_568 = arith.constant 1 : index
      %c2_569 = arith.constant 2 : index
      %c0_570 = arith.constant 0 : index
      %679 = vector.load %arg6[%c1_567, %c1_568, %c2_569, %c0_570] : memref<2x7x22x16xf32, #tpu.memory_space<vmem>>, vector<1x1x16x16xf32>
      %680 = vector.shape_cast %679 : vector<1x1x16x16xf32> to vector<16x16xf32>
      %681 = vector.broadcast %678 : f32 to vector<16x16xf32>
      %682 = arith.mulf %681, %680 : vector<16x16xf32>
      %683 = arith.addf %659, %682 : vector<16x16xf32>
      %c65 = arith.constant 65 : index
      %684 = memref.load %arg2[%c65] : memref<98xf32, #tpu.memory_space<smem>>
      %c1_571 = arith.constant 1 : index
      %c2_572 = arith.constant 2 : index
      %c2_573 = arith.constant 2 : index
      %c0_574 = arith.constant 0 : index
      %685 = vector.load %arg6[%c1_571, %c2_572, %c2_573, %c0_574] : memref<2x7x22x16xf32, #tpu.memory_space<vmem>>, vector<1x1x16x16xf32>
      %686 = vector.shape_cast %685 : vector<1x1x16x16xf32> to vector<16x16xf32>
      %687 = vector.broadcast %684 : f32 to vector<16x16xf32>
      %688 = arith.mulf %687, %686 : vector<16x16xf32>
      %689 = arith.addf %665, %688 : vector<16x16xf32>
      %c66 = arith.constant 66 : index
      %690 = memref.load %arg2[%c66] : memref<98xf32, #tpu.memory_space<smem>>
      %c1_575 = arith.constant 1 : index
      %c3_576 = arith.constant 3 : index
      %c2_577 = arith.constant 2 : index
      %c0_578 = arith.constant 0 : index
      %691 = vector.load %arg6[%c1_575, %c3_576, %c2_577, %c0_578] : memref<2x7x22x16xf32, #tpu.memory_space<vmem>>, vector<1x1x16x16xf32>
      %692 = vector.shape_cast %691 : vector<1x1x16x16xf32> to vector<16x16xf32>
      %693 = vector.broadcast %690 : f32 to vector<16x16xf32>
      %694 = arith.mulf %693, %692 : vector<16x16xf32>
      %695 = arith.addf %671, %694 : vector<16x16xf32>
      %c67 = arith.constant 67 : index
      %696 = memref.load %arg2[%c67] : memref<98xf32, #tpu.memory_space<smem>>
      %c1_579 = arith.constant 1 : index
      %c4_580 = arith.constant 4 : index
      %c2_581 = arith.constant 2 : index
      %c0_582 = arith.constant 0 : index
      %697 = vector.load %arg6[%c1_579, %c4_580, %c2_581, %c0_582] : memref<2x7x22x16xf32, #tpu.memory_space<vmem>>, vector<1x1x16x16xf32>
      %698 = vector.shape_cast %697 : vector<1x1x16x16xf32> to vector<16x16xf32>
      %699 = vector.broadcast %696 : f32 to vector<16x16xf32>
      %700 = arith.mulf %699, %698 : vector<16x16xf32>
      %701 = arith.addf %677, %700 : vector<16x16xf32>
      %c68 = arith.constant 68 : index
      %702 = memref.load %arg2[%c68] : memref<98xf32, #tpu.memory_space<smem>>
      %c1_583 = arith.constant 1 : index
      %c5_584 = arith.constant 5 : index
      %c2_585 = arith.constant 2 : index
      %c0_586 = arith.constant 0 : index
      %703 = vector.load %arg6[%c1_583, %c5_584, %c2_585, %c0_586] : memref<2x7x22x16xf32, #tpu.memory_space<vmem>>, vector<1x1x16x16xf32>
      %704 = vector.shape_cast %703 : vector<1x1x16x16xf32> to vector<16x16xf32>
      %705 = vector.broadcast %702 : f32 to vector<16x16xf32>
      %706 = arith.mulf %705, %704 : vector<16x16xf32>
      %707 = arith.addf %683, %706 : vector<16x16xf32>
      %c69 = arith.constant 69 : index
      %708 = memref.load %arg2[%c69] : memref<98xf32, #tpu.memory_space<smem>>
      %c1_587 = arith.constant 1 : index
      %c6_588 = arith.constant 6 : index
      %c2_589 = arith.constant 2 : index
      %c0_590 = arith.constant 0 : index
      %709 = vector.load %arg6[%c1_587, %c6_588, %c2_589, %c0_590] : memref<2x7x22x16xf32, #tpu.memory_space<vmem>>, vector<1x1x16x16xf32>
      %710 = vector.shape_cast %709 : vector<1x1x16x16xf32> to vector<16x16xf32>
      %711 = vector.broadcast %708 : f32 to vector<16x16xf32>
      %712 = arith.mulf %711, %710 : vector<16x16xf32>
      %713 = arith.addf %689, %712 : vector<16x16xf32>
      %c70 = arith.constant 70 : index
      %714 = memref.load %arg2[%c70] : memref<98xf32, #tpu.memory_space<smem>>
      %c1_591 = arith.constant 1 : index
      %c0_592 = arith.constant 0 : index
      %c3_593 = arith.constant 3 : index
      %c0_594 = arith.constant 0 : index
      %715 = vector.load %arg6[%c1_591, %c0_592, %c3_593, %c0_594] : memref<2x7x22x16xf32, #tpu.memory_space<vmem>>, vector<1x1x16x16xf32>
      %716 = vector.shape_cast %715 : vector<1x1x16x16xf32> to vector<16x16xf32>
      %717 = vector.broadcast %714 : f32 to vector<16x16xf32>
      %718 = arith.mulf %717, %716 : vector<16x16xf32>
      %719 = arith.addf %695, %718 : vector<16x16xf32>
      %c71 = arith.constant 71 : index
      %720 = memref.load %arg2[%c71] : memref<98xf32, #tpu.memory_space<smem>>
      %c1_595 = arith.constant 1 : index
      %c1_596 = arith.constant 1 : index
      %c3_597 = arith.constant 3 : index
      %c0_598 = arith.constant 0 : index
      %721 = vector.load %arg6[%c1_595, %c1_596, %c3_597, %c0_598] : memref<2x7x22x16xf32, #tpu.memory_space<vmem>>, vector<1x1x16x16xf32>
      %722 = vector.shape_cast %721 : vector<1x1x16x16xf32> to vector<16x16xf32>
      %723 = vector.broadcast %720 : f32 to vector<16x16xf32>
      %724 = arith.mulf %723, %722 : vector<16x16xf32>
      %725 = arith.addf %701, %724 : vector<16x16xf32>
      %c72 = arith.constant 72 : index
      %726 = memref.load %arg2[%c72] : memref<98xf32, #tpu.memory_space<smem>>
      %c1_599 = arith.constant 1 : index
      %c2_600 = arith.constant 2 : index
      %c3_601 = arith.constant 3 : index
      %c0_602 = arith.constant 0 : index
      %727 = vector.load %arg6[%c1_599, %c2_600, %c3_601, %c0_602] : memref<2x7x22x16xf32, #tpu.memory_space<vmem>>, vector<1x1x16x16xf32>
      %728 = vector.shape_cast %727 : vector<1x1x16x16xf32> to vector<16x16xf32>
      %729 = vector.broadcast %726 : f32 to vector<16x16xf32>
      %730 = arith.mulf %729, %728 : vector<16x16xf32>
      %731 = arith.addf %707, %730 : vector<16x16xf32>
      %c73 = arith.constant 73 : index
      %732 = memref.load %arg2[%c73] : memref<98xf32, #tpu.memory_space<smem>>
      %c1_603 = arith.constant 1 : index
      %c3_604 = arith.constant 3 : index
      %c3_605 = arith.constant 3 : index
      %c0_606 = arith.constant 0 : index
      %733 = vector.load %arg6[%c1_603, %c3_604, %c3_605, %c0_606] : memref<2x7x22x16xf32, #tpu.memory_space<vmem>>, vector<1x1x16x16xf32>
      %734 = vector.shape_cast %733 : vector<1x1x16x16xf32> to vector<16x16xf32>
      %735 = vector.broadcast %732 : f32 to vector<16x16xf32>
      %736 = arith.mulf %735, %734 : vector<16x16xf32>
      %737 = arith.addf %713, %736 : vector<16x16xf32>
      %c74 = arith.constant 74 : index
      %738 = memref.load %arg2[%c74] : memref<98xf32, #tpu.memory_space<smem>>
      %c1_607 = arith.constant 1 : index
      %c4_608 = arith.constant 4 : index
      %c3_609 = arith.constant 3 : index
      %c0_610 = arith.constant 0 : index
      %739 = vector.load %arg6[%c1_607, %c4_608, %c3_609, %c0_610] : memref<2x7x22x16xf32, #tpu.memory_space<vmem>>, vector<1x1x16x16xf32>
      %740 = vector.shape_cast %739 : vector<1x1x16x16xf32> to vector<16x16xf32>
      %741 = vector.broadcast %738 : f32 to vector<16x16xf32>
      %742 = arith.mulf %741, %740 : vector<16x16xf32>
      %743 = arith.addf %719, %742 : vector<16x16xf32>
      %c75 = arith.constant 75 : index
      %744 = memref.load %arg2[%c75] : memref<98xf32, #tpu.memory_space<smem>>
      %c1_611 = arith.constant 1 : index
      %c5_612 = arith.constant 5 : index
      %c3_613 = arith.constant 3 : index
      %c0_614 = arith.constant 0 : index
      %745 = vector.load %arg6[%c1_611, %c5_612, %c3_613, %c0_614] : memref<2x7x22x16xf32, #tpu.memory_space<vmem>>, vector<1x1x16x16xf32>
      %746 = vector.shape_cast %745 : vector<1x1x16x16xf32> to vector<16x16xf32>
      %747 = vector.broadcast %744 : f32 to vector<16x16xf32>
      %748 = arith.mulf %747, %746 : vector<16x16xf32>
      %749 = arith.addf %725, %748 : vector<16x16xf32>
      %c76 = arith.constant 76 : index
      %750 = memref.load %arg2[%c76] : memref<98xf32, #tpu.memory_space<smem>>
      %c1_615 = arith.constant 1 : index
      %c6_616 = arith.constant 6 : index
      %c3_617 = arith.constant 3 : index
      %c0_618 = arith.constant 0 : index
      %751 = vector.load %arg6[%c1_615, %c6_616, %c3_617, %c0_618] : memref<2x7x22x16xf32, #tpu.memory_space<vmem>>, vector<1x1x16x16xf32>
      %752 = vector.shape_cast %751 : vector<1x1x16x16xf32> to vector<16x16xf32>
      %753 = vector.broadcast %750 : f32 to vector<16x16xf32>
      %754 = arith.mulf %753, %752 : vector<16x16xf32>
      %755 = arith.addf %731, %754 : vector<16x16xf32>
      %c77 = arith.constant 77 : index
      %756 = memref.load %arg2[%c77] : memref<98xf32, #tpu.memory_space<smem>>
      %c1_619 = arith.constant 1 : index
      %c0_620 = arith.constant 0 : index
      %c4_621 = arith.constant 4 : index
      %c0_622 = arith.constant 0 : index
      %757 = vector.load %arg6[%c1_619, %c0_620, %c4_621, %c0_622] : memref<2x7x22x16xf32, #tpu.memory_space<vmem>>, vector<1x1x16x16xf32>
      %758 = vector.shape_cast %757 : vector<1x1x16x16xf32> to vector<16x16xf32>
      %759 = vector.broadcast %756 : f32 to vector<16x16xf32>
      %760 = arith.mulf %759, %758 : vector<16x16xf32>
      %761 = arith.addf %737, %760 : vector<16x16xf32>
      %c78 = arith.constant 78 : index
      %762 = memref.load %arg2[%c78] : memref<98xf32, #tpu.memory_space<smem>>
      %c1_623 = arith.constant 1 : index
      %c1_624 = arith.constant 1 : index
      %c4_625 = arith.constant 4 : index
      %c0_626 = arith.constant 0 : index
      %763 = vector.load %arg6[%c1_623, %c1_624, %c4_625, %c0_626] : memref<2x7x22x16xf32, #tpu.memory_space<vmem>>, vector<1x1x16x16xf32>
      %764 = vector.shape_cast %763 : vector<1x1x16x16xf32> to vector<16x16xf32>
      %765 = vector.broadcast %762 : f32 to vector<16x16xf32>
      %766 = arith.mulf %765, %764 : vector<16x16xf32>
      %767 = arith.addf %743, %766 : vector<16x16xf32>
      %c79 = arith.constant 79 : index
      %768 = memref.load %arg2[%c79] : memref<98xf32, #tpu.memory_space<smem>>
      %c1_627 = arith.constant 1 : index
      %c2_628 = arith.constant 2 : index
      %c4_629 = arith.constant 4 : index
      %c0_630 = arith.constant 0 : index
      %769 = vector.load %arg6[%c1_627, %c2_628, %c4_629, %c0_630] : memref<2x7x22x16xf32, #tpu.memory_space<vmem>>, vector<1x1x16x16xf32>
      %770 = vector.shape_cast %769 : vector<1x1x16x16xf32> to vector<16x16xf32>
      %771 = vector.broadcast %768 : f32 to vector<16x16xf32>
      %772 = arith.mulf %771, %770 : vector<16x16xf32>
      %773 = arith.addf %749, %772 : vector<16x16xf32>
      %c80_631 = arith.constant 80 : index
      %774 = memref.load %arg2[%c80_631] : memref<98xf32, #tpu.memory_space<smem>>
      %c1_632 = arith.constant 1 : index
      %c3_633 = arith.constant 3 : index
      %c4_634 = arith.constant 4 : index
      %c0_635 = arith.constant 0 : index
      %775 = vector.load %arg6[%c1_632, %c3_633, %c4_634, %c0_635] : memref<2x7x22x16xf32, #tpu.memory_space<vmem>>, vector<1x1x16x16xf32>
      %776 = vector.shape_cast %775 : vector<1x1x16x16xf32> to vector<16x16xf32>
      %777 = vector.broadcast %774 : f32 to vector<16x16xf32>
      %778 = arith.mulf %777, %776 : vector<16x16xf32>
      %779 = arith.addf %755, %778 : vector<16x16xf32>
      %c81 = arith.constant 81 : index
      %780 = memref.load %arg2[%c81] : memref<98xf32, #tpu.memory_space<smem>>
      %c1_636 = arith.constant 1 : index
      %c4_637 = arith.constant 4 : index
      %c4_638 = arith.constant 4 : index
      %c0_639 = arith.constant 0 : index
      %781 = vector.load %arg6[%c1_636, %c4_637, %c4_638, %c0_639] : memref<2x7x22x16xf32, #tpu.memory_space<vmem>>, vector<1x1x16x16xf32>
      %782 = vector.shape_cast %781 : vector<1x1x16x16xf32> to vector<16x16xf32>
      %783 = vector.broadcast %780 : f32 to vector<16x16xf32>
      %784 = arith.mulf %783, %782 : vector<16x16xf32>
      %785 = arith.addf %761, %784 : vector<16x16xf32>
      %c82 = arith.constant 82 : index
      %786 = memref.load %arg2[%c82] : memref<98xf32, #tpu.memory_space<smem>>
      %c1_640 = arith.constant 1 : index
      %c5_641 = arith.constant 5 : index
      %c4_642 = arith.constant 4 : index
      %c0_643 = arith.constant 0 : index
      %787 = vector.load %arg6[%c1_640, %c5_641, %c4_642, %c0_643] : memref<2x7x22x16xf32, #tpu.memory_space<vmem>>, vector<1x1x16x16xf32>
      %788 = vector.shape_cast %787 : vector<1x1x16x16xf32> to vector<16x16xf32>
      %789 = vector.broadcast %786 : f32 to vector<16x16xf32>
      %790 = arith.mulf %789, %788 : vector<16x16xf32>
      %791 = arith.addf %767, %790 : vector<16x16xf32>
      %c83 = arith.constant 83 : index
      %792 = memref.load %arg2[%c83] : memref<98xf32, #tpu.memory_space<smem>>
      %c1_644 = arith.constant 1 : index
      %c6_645 = arith.constant 6 : index
      %c4_646 = arith.constant 4 : index
      %c0_647 = arith.constant 0 : index
      %793 = vector.load %arg6[%c1_644, %c6_645, %c4_646, %c0_647] : memref<2x7x22x16xf32, #tpu.memory_space<vmem>>, vector<1x1x16x16xf32>
      %794 = vector.shape_cast %793 : vector<1x1x16x16xf32> to vector<16x16xf32>
      %795 = vector.broadcast %792 : f32 to vector<16x16xf32>
      %796 = arith.mulf %795, %794 : vector<16x16xf32>
      %797 = arith.addf %773, %796 : vector<16x16xf32>
      %c84 = arith.constant 84 : index
      %798 = memref.load %arg2[%c84] : memref<98xf32, #tpu.memory_space<smem>>
      %c1_648 = arith.constant 1 : index
      %c0_649 = arith.constant 0 : index
      %c5_650 = arith.constant 5 : index
      %c0_651 = arith.constant 0 : index
      %799 = vector.load %arg6[%c1_648, %c0_649, %c5_650, %c0_651] : memref<2x7x22x16xf32, #tpu.memory_space<vmem>>, vector<1x1x16x16xf32>
      %800 = vector.shape_cast %799 : vector<1x1x16x16xf32> to vector<16x16xf32>
      %801 = vector.broadcast %798 : f32 to vector<16x16xf32>
      %802 = arith.mulf %801, %800 : vector<16x16xf32>
      %803 = arith.addf %779, %802 : vector<16x16xf32>
      %c85 = arith.constant 85 : index
      %804 = memref.load %arg2[%c85] : memref<98xf32, #tpu.memory_space<smem>>
      %c1_652 = arith.constant 1 : index
      %c1_653 = arith.constant 1 : index
      %c5_654 = arith.constant 5 : index
      %c0_655 = arith.constant 0 : index
      %805 = vector.load %arg6[%c1_652, %c1_653, %c5_654, %c0_655] : memref<2x7x22x16xf32, #tpu.memory_space<vmem>>, vector<1x1x16x16xf32>
      %806 = vector.shape_cast %805 : vector<1x1x16x16xf32> to vector<16x16xf32>
      %807 = vector.broadcast %804 : f32 to vector<16x16xf32>
      %808 = arith.mulf %807, %806 : vector<16x16xf32>
      %809 = arith.addf %785, %808 : vector<16x16xf32>
      %c86 = arith.constant 86 : index
      %810 = memref.load %arg2[%c86] : memref<98xf32, #tpu.memory_space<smem>>
      %c1_656 = arith.constant 1 : index
      %c2_657 = arith.constant 2 : index
      %c5_658 = arith.constant 5 : index
      %c0_659 = arith.constant 0 : index
      %811 = vector.load %arg6[%c1_656, %c2_657, %c5_658, %c0_659] : memref<2x7x22x16xf32, #tpu.memory_space<vmem>>, vector<1x1x16x16xf32>
      %812 = vector.shape_cast %811 : vector<1x1x16x16xf32> to vector<16x16xf32>
      %813 = vector.broadcast %810 : f32 to vector<16x16xf32>
      %814 = arith.mulf %813, %812 : vector<16x16xf32>
      %815 = arith.addf %791, %814 : vector<16x16xf32>
      %c87 = arith.constant 87 : index
      %816 = memref.load %arg2[%c87] : memref<98xf32, #tpu.memory_space<smem>>
      %c1_660 = arith.constant 1 : index
      %c3_661 = arith.constant 3 : index
      %c5_662 = arith.constant 5 : index
      %c0_663 = arith.constant 0 : index
      %817 = vector.load %arg6[%c1_660, %c3_661, %c5_662, %c0_663] : memref<2x7x22x16xf32, #tpu.memory_space<vmem>>, vector<1x1x16x16xf32>
      %818 = vector.shape_cast %817 : vector<1x1x16x16xf32> to vector<16x16xf32>
      %819 = vector.broadcast %816 : f32 to vector<16x16xf32>
      %820 = arith.mulf %819, %818 : vector<16x16xf32>
      %821 = arith.addf %797, %820 : vector<16x16xf32>
      %c88 = arith.constant 88 : index
      %822 = memref.load %arg2[%c88] : memref<98xf32, #tpu.memory_space<smem>>
      %c1_664 = arith.constant 1 : index
      %c4_665 = arith.constant 4 : index
      %c5_666 = arith.constant 5 : index
      %c0_667 = arith.constant 0 : index
      %823 = vector.load %arg6[%c1_664, %c4_665, %c5_666, %c0_667] : memref<2x7x22x16xf32, #tpu.memory_space<vmem>>, vector<1x1x16x16xf32>
      %824 = vector.shape_cast %823 : vector<1x1x16x16xf32> to vector<16x16xf32>
      %825 = vector.broadcast %822 : f32 to vector<16x16xf32>
      %826 = arith.mulf %825, %824 : vector<16x16xf32>
      %827 = arith.addf %803, %826 : vector<16x16xf32>
      %c89 = arith.constant 89 : index
      %828 = memref.load %arg2[%c89] : memref<98xf32, #tpu.memory_space<smem>>
      %c1_668 = arith.constant 1 : index
      %c5_669 = arith.constant 5 : index
      %c5_670 = arith.constant 5 : index
      %c0_671 = arith.constant 0 : index
      %829 = vector.load %arg6[%c1_668, %c5_669, %c5_670, %c0_671] : memref<2x7x22x16xf32, #tpu.memory_space<vmem>>, vector<1x1x16x16xf32>
      %830 = vector.shape_cast %829 : vector<1x1x16x16xf32> to vector<16x16xf32>
      %831 = vector.broadcast %828 : f32 to vector<16x16xf32>
      %832 = arith.mulf %831, %830 : vector<16x16xf32>
      %833 = arith.addf %809, %832 : vector<16x16xf32>
      %c90 = arith.constant 90 : index
      %834 = memref.load %arg2[%c90] : memref<98xf32, #tpu.memory_space<smem>>
      %c1_672 = arith.constant 1 : index
      %c6_673 = arith.constant 6 : index
      %c5_674 = arith.constant 5 : index
      %c0_675 = arith.constant 0 : index
      %835 = vector.load %arg6[%c1_672, %c6_673, %c5_674, %c0_675] : memref<2x7x22x16xf32, #tpu.memory_space<vmem>>, vector<1x1x16x16xf32>
      %836 = vector.shape_cast %835 : vector<1x1x16x16xf32> to vector<16x16xf32>
      %837 = vector.broadcast %834 : f32 to vector<16x16xf32>
      %838 = arith.mulf %837, %836 : vector<16x16xf32>
      %839 = arith.addf %815, %838 : vector<16x16xf32>
      %c91 = arith.constant 91 : index
      %840 = memref.load %arg2[%c91] : memref<98xf32, #tpu.memory_space<smem>>
      %c1_676 = arith.constant 1 : index
      %c0_677 = arith.constant 0 : index
      %c6_678 = arith.constant 6 : index
      %c0_679 = arith.constant 0 : index
      %841 = vector.load %arg6[%c1_676, %c0_677, %c6_678, %c0_679] : memref<2x7x22x16xf32, #tpu.memory_space<vmem>>, vector<1x1x16x16xf32>
      %842 = vector.shape_cast %841 : vector<1x1x16x16xf32> to vector<16x16xf32>
      %843 = vector.broadcast %840 : f32 to vector<16x16xf32>
      %844 = arith.mulf %843, %842 : vector<16x16xf32>
      %845 = arith.addf %821, %844 : vector<16x16xf32>
      %c92 = arith.constant 92 : index
      %846 = memref.load %arg2[%c92] : memref<98xf32, #tpu.memory_space<smem>>
      %c1_680 = arith.constant 1 : index
      %c1_681 = arith.constant 1 : index
      %c6_682 = arith.constant 6 : index
      %c0_683 = arith.constant 0 : index
      %847 = vector.load %arg6[%c1_680, %c1_681, %c6_682, %c0_683] : memref<2x7x22x16xf32, #tpu.memory_space<vmem>>, vector<1x1x16x16xf32>
      %848 = vector.shape_cast %847 : vector<1x1x16x16xf32> to vector<16x16xf32>
      %849 = vector.broadcast %846 : f32 to vector<16x16xf32>
      %850 = arith.mulf %849, %848 : vector<16x16xf32>
      %851 = arith.addf %827, %850 : vector<16x16xf32>
      %c93 = arith.constant 93 : index
      %852 = memref.load %arg2[%c93] : memref<98xf32, #tpu.memory_space<smem>>
      %c1_684 = arith.constant 1 : index
      %c2_685 = arith.constant 2 : index
      %c6_686 = arith.constant 6 : index
      %c0_687 = arith.constant 0 : index
      %853 = vector.load %arg6[%c1_684, %c2_685, %c6_686, %c0_687] : memref<2x7x22x16xf32, #tpu.memory_space<vmem>>, vector<1x1x16x16xf32>
      %854 = vector.shape_cast %853 : vector<1x1x16x16xf32> to vector<16x16xf32>
      %855 = vector.broadcast %852 : f32 to vector<16x16xf32>
      %856 = arith.mulf %855, %854 : vector<16x16xf32>
      %857 = arith.addf %833, %856 : vector<16x16xf32>
      %c94 = arith.constant 94 : index
      %858 = memref.load %arg2[%c94] : memref<98xf32, #tpu.memory_space<smem>>
      %c1_688 = arith.constant 1 : index
      %c3_689 = arith.constant 3 : index
      %c6_690 = arith.constant 6 : index
      %c0_691 = arith.constant 0 : index
      %859 = vector.load %arg6[%c1_688, %c3_689, %c6_690, %c0_691] : memref<2x7x22x16xf32, #tpu.memory_space<vmem>>, vector<1x1x16x16xf32>
      %860 = vector.shape_cast %859 : vector<1x1x16x16xf32> to vector<16x16xf32>
      %861 = vector.broadcast %858 : f32 to vector<16x16xf32>
      %862 = arith.mulf %861, %860 : vector<16x16xf32>
      %863 = arith.addf %839, %862 : vector<16x16xf32>
      %c95 = arith.constant 95 : index
      %864 = memref.load %arg2[%c95] : memref<98xf32, #tpu.memory_space<smem>>
      %c1_692 = arith.constant 1 : index
      %c4_693 = arith.constant 4 : index
      %c6_694 = arith.constant 6 : index
      %c0_695 = arith.constant 0 : index
      %865 = vector.load %arg6[%c1_692, %c4_693, %c6_694, %c0_695] : memref<2x7x22x16xf32, #tpu.memory_space<vmem>>, vector<1x1x16x16xf32>
      %866 = vector.shape_cast %865 : vector<1x1x16x16xf32> to vector<16x16xf32>
      %867 = vector.broadcast %864 : f32 to vector<16x16xf32>
      %868 = arith.mulf %867, %866 : vector<16x16xf32>
      %869 = arith.addf %845, %868 : vector<16x16xf32>
      %c96_696 = arith.constant 96 : index
      %870 = memref.load %arg2[%c96_696] : memref<98xf32, #tpu.memory_space<smem>>
      %c1_697 = arith.constant 1 : index
      %c5_698 = arith.constant 5 : index
      %c6_699 = arith.constant 6 : index
      %c0_700 = arith.constant 0 : index
      %871 = vector.load %arg6[%c1_697, %c5_698, %c6_699, %c0_700] : memref<2x7x22x16xf32, #tpu.memory_space<vmem>>, vector<1x1x16x16xf32>
      %872 = vector.shape_cast %871 : vector<1x1x16x16xf32> to vector<16x16xf32>
      %873 = vector.broadcast %870 : f32 to vector<16x16xf32>
      %874 = arith.mulf %873, %872 : vector<16x16xf32>
      %875 = arith.addf %851, %874 : vector<16x16xf32>
      %c97 = arith.constant 97 : index
      %876 = memref.load %arg2[%c97] : memref<98xf32, #tpu.memory_space<smem>>
      %c1_701 = arith.constant 1 : index
      %c6_702 = arith.constant 6 : index
      %c6_703 = arith.constant 6 : index
      %c0_704 = arith.constant 0 : index
      %877 = vector.load %arg6[%c1_701, %c6_702, %c6_703, %c0_704] : memref<2x7x22x16xf32, #tpu.memory_space<vmem>>, vector<1x1x16x16xf32>
      %878 = vector.shape_cast %877 : vector<1x1x16x16xf32> to vector<16x16xf32>
      %879 = vector.broadcast %876 : f32 to vector<16x16xf32>
      %880 = arith.mulf %879, %878 : vector<16x16xf32>
      %881 = arith.addf %857, %880 : vector<16x16xf32>
      %882 = arith.addf %875, %881 : vector<16x16xf32>
      %883 = arith.addf %882, %863 : vector<16x16xf32>
      %884 = arith.addf %883, %869 : vector<16x16xf32>
      %885 = arith.negf %884 : vector<16x16xf32>
      %886 = math.exp %885 : vector<16x16xf32>
      %cst_705 = arith.constant 1.000000e+00 : f32
      %887 = vector.broadcast %cst_705 : f32 to vector<16x16xf32>
      %888 = arith.addf %887, %886 : vector<16x16xf32>
      %889 = arith.divf %887, %888 : vector<16x16xf32>
      %c0_706 = arith.constant 0 : index
      %c3_707 = arith.constant 3 : index
      %c3_708 = arith.constant 3 : index
      %890 = vector.load %arg5[%c0_706, %c3_707, %c3_708] : memref<2x22x22xf32, #tpu.memory_space<vmem>>, vector<1x16x16xf32>
      %891 = vector.shape_cast %890 : vector<1x16x16xf32> to vector<16x16xf32>
      %892 = vector.shape_cast %889 : vector<16x16xf32> to vector<1x16x16xf32>
      tpu.vector_store %arg5[%c0_706, %c3_707, %c3_708], %892 {strides = array<i32>} : memref<2x22x22xf32, #tpu.memory_space<vmem>>, vector<1x16x16xf32>,
      %c0_709 = arith.constant 0 : index
      %c3_710 = arith.constant 3 : index
      %c3_711 = arith.constant 3 : index
      %893 = vector.load %arg5[%c0_709, %c3_710, %c3_711] : memref<2x22x22xf32, #tpu.memory_space<vmem>>, vector<1x1x16xf32>
      %894 = vector.shape_cast %893 : vector<1x1x16xf32> to vector<16xf32>
      %c2_i32_712 = arith.constant 2 : i32
      %c0_i32_713 = arith.constant 0 : i32
      %895 = tpu.memref_slice %arg7[%c2_i32_712, %c0_i32_713] : memref<3x256xf32, #tpu.memory_space<vmem>> -> memref<1x256xf32, #tpu.memory_space<vmem>>
      %896 = tpu.memref_squeeze %895 : memref<1x256xf32, #tpu.memory_space<vmem>> -> memref<256xf32, #tpu.memory_space<vmem>>
      %c0_714 = arith.constant 0 : index
      %897 = vector.load %896[%c0_714] : memref<256xf32, #tpu.memory_space<vmem>>, vector<16xf32>
      tpu.vector_store %896[%c0_714], %894 {strides = array<i32>} : memref<256xf32, #tpu.memory_space<vmem>>, vector<16xf32>,
      %c0_715 = arith.constant 0 : index
      %c4_716 = arith.constant 4 : index
      %c3_717 = arith.constant 3 : index
      %898 = vector.load %arg5[%c0_715, %c4_716, %c3_717] : memref<2x22x22xf32, #tpu.memory_space<vmem>>, vector<1x1x16xf32>
      %899 = vector.shape_cast %898 : vector<1x1x16xf32> to vector<16xf32>
      %c2_i32_718 = arith.constant 2 : i32
      %c0_i32_719 = arith.constant 0 : i32
      %900 = tpu.memref_slice %arg7[%c2_i32_718, %c0_i32_719] : memref<3x256xf32, #tpu.memory_space<vmem>> -> memref<1x256xf32, #tpu.memory_space<vmem>>
      %901 = tpu.memref_squeeze %900 : memref<1x256xf32, #tpu.memory_space<vmem>> -> memref<256xf32, #tpu.memory_space<vmem>>
      %c16_720 = arith.constant 16 : index
      %902 = vector.load %901[%c16_720] : memref<256xf32, #tpu.memory_space<vmem>>, vector<16xf32>
      tpu.vector_store %901[%c16_720], %899 {strides = array<i32>} : memref<256xf32, #tpu.memory_space<vmem>>, vector<16xf32>,
      %c0_721 = arith.constant 0 : index
      %c5_722 = arith.constant 5 : index
      %c3_723 = arith.constant 3 : index
      %903 = vector.load %arg5[%c0_721, %c5_722, %c3_723] : memref<2x22x22xf32, #tpu.memory_space<vmem>>, vector<1x1x16xf32>
      %904 = vector.shape_cast %903 : vector<1x1x16xf32> to vector<16xf32>
      %c2_i32_724 = arith.constant 2 : i32
      %c0_i32_725 = arith.constant 0 : i32
      %905 = tpu.memref_slice %arg7[%c2_i32_724, %c0_i32_725] : memref<3x256xf32, #tpu.memory_space<vmem>> -> memref<1x256xf32, #tpu.memory_space<vmem>>
      %906 = tpu.memref_squeeze %905 : memref<1x256xf32, #tpu.memory_space<vmem>> -> memref<256xf32, #tpu.memory_space<vmem>>
      %c32_726 = arith.constant 32 : index
      %907 = vector.load %906[%c32_726] : memref<256xf32, #tpu.memory_space<vmem>>, vector<16xf32>
      tpu.vector_store %906[%c32_726], %904 {strides = array<i32>} : memref<256xf32, #tpu.memory_space<vmem>>, vector<16xf32>,
      %c0_727 = arith.constant 0 : index
      %c6_728 = arith.constant 6 : index
      %c3_729 = arith.constant 3 : index
      %908 = vector.load %arg5[%c0_727, %c6_728, %c3_729] : memref<2x22x22xf32, #tpu.memory_space<vmem>>, vector<1x1x16xf32>
      %909 = vector.shape_cast %908 : vector<1x1x16xf32> to vector<16xf32>
      %c2_i32_730 = arith.constant 2 : i32
      %c0_i32_731 = arith.constant 0 : i32
      %910 = tpu.memref_slice %arg7[%c2_i32_730, %c0_i32_731] : memref<3x256xf32, #tpu.memory_space<vmem>> -> memref<1x256xf32, #tpu.memory_space<vmem>>
      %911 = tpu.memref_squeeze %910 : memref<1x256xf32, #tpu.memory_space<vmem>> -> memref<256xf32, #tpu.memory_space<vmem>>
      %c48_732 = arith.constant 48 : index
      %912 = vector.load %911[%c48_732] : memref<256xf32, #tpu.memory_space<vmem>>, vector<16xf32>
      tpu.vector_store %911[%c48_732], %909 {strides = array<i32>} : memref<256xf32, #tpu.memory_space<vmem>>, vector<16xf32>,
      %c0_733 = arith.constant 0 : index
      %c7_734 = arith.constant 7 : index
      %c3_735 = arith.constant 3 : index
      %913 = vector.load %arg5[%c0_733, %c7_734, %c3_735] : memref<2x22x22xf32, #tpu.memory_space<vmem>>, vector<1x1x16xf32>
      %914 = vector.shape_cast %913 : vector<1x1x16xf32> to vector<16xf32>
      %c2_i32_736 = arith.constant 2 : i32
      %c0_i32_737 = arith.constant 0 : i32
      %915 = tpu.memref_slice %arg7[%c2_i32_736, %c0_i32_737] : memref<3x256xf32, #tpu.memory_space<vmem>> -> memref<1x256xf32, #tpu.memory_space<vmem>>
      %916 = tpu.memref_squeeze %915 : memref<1x256xf32, #tpu.memory_space<vmem>> -> memref<256xf32, #tpu.memory_space<vmem>>
      %c64_738 = arith.constant 64 : index
      %917 = vector.load %916[%c64_738] : memref<256xf32, #tpu.memory_space<vmem>>, vector<16xf32>
      tpu.vector_store %916[%c64_738], %914 {strides = array<i32>} : memref<256xf32, #tpu.memory_space<vmem>>, vector<16xf32>,
      %c0_739 = arith.constant 0 : index
      %c8_740 = arith.constant 8 : index
      %c3_741 = arith.constant 3 : index
      %918 = vector.load %arg5[%c0_739, %c8_740, %c3_741] : memref<2x22x22xf32, #tpu.memory_space<vmem>>, vector<1x1x16xf32>
      %919 = vector.shape_cast %918 : vector<1x1x16xf32> to vector<16xf32>
      %c2_i32_742 = arith.constant 2 : i32
      %c0_i32_743 = arith.constant 0 : i32
      %920 = tpu.memref_slice %arg7[%c2_i32_742, %c0_i32_743] : memref<3x256xf32, #tpu.memory_space<vmem>> -> memref<1x256xf32, #tpu.memory_space<vmem>>
      %921 = tpu.memref_squeeze %920 : memref<1x256xf32, #tpu.memory_space<vmem>> -> memref<256xf32, #tpu.memory_space<vmem>>
      %c80_744 = arith.constant 80 : index
      %922 = vector.load %921[%c80_744] : memref<256xf32, #tpu.memory_space<vmem>>, vector<16xf32>
      tpu.vector_store %921[%c80_744], %919 {strides = array<i32>} : memref<256xf32, #tpu.memory_space<vmem>>, vector<16xf32>,
      %c0_745 = arith.constant 0 : index
      %c9_746 = arith.constant 9 : index
      %c3_747 = arith.constant 3 : index
      %923 = vector.load %arg5[%c0_745, %c9_746, %c3_747] : memref<2x22x22xf32, #tpu.memory_space<vmem>>, vector<1x1x16xf32>
      %924 = vector.shape_cast %923 : vector<1x1x16xf32> to vector<16xf32>
      %c2_i32_748 = arith.constant 2 : i32
      %c0_i32_749 = arith.constant 0 : i32
      %925 = tpu.memref_slice %arg7[%c2_i32_748, %c0_i32_749] : memref<3x256xf32, #tpu.memory_space<vmem>> -> memref<1x256xf32, #tpu.memory_space<vmem>>
      %926 = tpu.memref_squeeze %925 : memref<1x256xf32, #tpu.memory_space<vmem>> -> memref<256xf32, #tpu.memory_space<vmem>>
      %c96_750 = arith.constant 96 : index
      %927 = vector.load %926[%c96_750] : memref<256xf32, #tpu.memory_space<vmem>>, vector<16xf32>
      tpu.vector_store %926[%c96_750], %924 {strides = array<i32>} : memref<256xf32, #tpu.memory_space<vmem>>, vector<16xf32>,
      %c0_751 = arith.constant 0 : index
      %c10_752 = arith.constant 10 : index
      %c3_753 = arith.constant 3 : index
      %928 = vector.load %arg5[%c0_751, %c10_752, %c3_753] : memref<2x22x22xf32, #tpu.memory_space<vmem>>, vector<1x1x16xf32>
      %929 = vector.shape_cast %928 : vector<1x1x16xf32> to vector<16xf32>
      %c2_i32_754 = arith.constant 2 : i32
      %c0_i32_755 = arith.constant 0 : i32
      %930 = tpu.memref_slice %arg7[%c2_i32_754, %c0_i32_755] : memref<3x256xf32, #tpu.memory_space<vmem>> -> memref<1x256xf32, #tpu.memory_space<vmem>>
      %931 = tpu.memref_squeeze %930 : memref<1x256xf32, #tpu.memory_space<vmem>> -> memref<256xf32, #tpu.memory_space<vmem>>
      %c112_756 = arith.constant 112 : index
      %932 = vector.load %931[%c112_756] : memref<256xf32, #tpu.memory_space<vmem>>, vector<16xf32>
      tpu.vector_store %931[%c112_756], %929 {strides = array<i32>} : memref<256xf32, #tpu.memory_space<vmem>>, vector<16xf32>,
      %c0_757 = arith.constant 0 : index
      %c11_758 = arith.constant 11 : index
      %c3_759 = arith.constant 3 : index
      %933 = vector.load %arg5[%c0_757, %c11_758, %c3_759] : memref<2x22x22xf32, #tpu.memory_space<vmem>>, vector<1x1x16xf32>
      %934 = vector.shape_cast %933 : vector<1x1x16xf32> to vector<16xf32>
      %c2_i32_760 = arith.constant 2 : i32
      %c0_i32_761 = arith.constant 0 : i32
      %935 = tpu.memref_slice %arg7[%c2_i32_760, %c0_i32_761] : memref<3x256xf32, #tpu.memory_space<vmem>> -> memref<1x256xf32, #tpu.memory_space<vmem>>
      %936 = tpu.memref_squeeze %935 : memref<1x256xf32, #tpu.memory_space<vmem>> -> memref<256xf32, #tpu.memory_space<vmem>>
      %c128_762 = arith.constant 128 : index
      %937 = vector.load %936[%c128_762] : memref<256xf32, #tpu.memory_space<vmem>>, vector<16xf32>
      tpu.vector_store %936[%c128_762], %934 {strides = array<i32>} : memref<256xf32, #tpu.memory_space<vmem>>, vector<16xf32>,
      %c0_763 = arith.constant 0 : index
      %c12_764 = arith.constant 12 : index
      %c3_765 = arith.constant 3 : index
      %938 = vector.load %arg5[%c0_763, %c12_764, %c3_765] : memref<2x22x22xf32, #tpu.memory_space<vmem>>, vector<1x1x16xf32>
      %939 = vector.shape_cast %938 : vector<1x1x16xf32> to vector<16xf32>
      %c2_i32_766 = arith.constant 2 : i32
      %c0_i32_767 = arith.constant 0 : i32
      %940 = tpu.memref_slice %arg7[%c2_i32_766, %c0_i32_767] : memref<3x256xf32, #tpu.memory_space<vmem>> -> memref<1x256xf32, #tpu.memory_space<vmem>>
      %941 = tpu.memref_squeeze %940 : memref<1x256xf32, #tpu.memory_space<vmem>> -> memref<256xf32, #tpu.memory_space<vmem>>
      %c144_768 = arith.constant 144 : index
      %942 = vector.load %941[%c144_768] : memref<256xf32, #tpu.memory_space<vmem>>, vector<16xf32>
      tpu.vector_store %941[%c144_768], %939 {strides = array<i32>} : memref<256xf32, #tpu.memory_space<vmem>>, vector<16xf32>,
      %c0_769 = arith.constant 0 : index
      %c13_770 = arith.constant 13 : index
      %c3_771 = arith.constant 3 : index
      %943 = vector.load %arg5[%c0_769, %c13_770, %c3_771] : memref<2x22x22xf32, #tpu.memory_space<vmem>>, vector<1x1x16xf32>
      %944 = vector.shape_cast %943 : vector<1x1x16xf32> to vector<16xf32>
      %c2_i32_772 = arith.constant 2 : i32
      %c0_i32_773 = arith.constant 0 : i32
      %945 = tpu.memref_slice %arg7[%c2_i32_772, %c0_i32_773] : memref<3x256xf32, #tpu.memory_space<vmem>> -> memref<1x256xf32, #tpu.memory_space<vmem>>
      %946 = tpu.memref_squeeze %945 : memref<1x256xf32, #tpu.memory_space<vmem>> -> memref<256xf32, #tpu.memory_space<vmem>>
      %c160_774 = arith.constant 160 : index
      %947 = vector.load %946[%c160_774] : memref<256xf32, #tpu.memory_space<vmem>>, vector<16xf32>
      tpu.vector_store %946[%c160_774], %944 {strides = array<i32>} : memref<256xf32, #tpu.memory_space<vmem>>, vector<16xf32>,
      %c0_775 = arith.constant 0 : index
      %c14_776 = arith.constant 14 : index
      %c3_777 = arith.constant 3 : index
      %948 = vector.load %arg5[%c0_775, %c14_776, %c3_777] : memref<2x22x22xf32, #tpu.memory_space<vmem>>, vector<1x1x16xf32>
      %949 = vector.shape_cast %948 : vector<1x1x16xf32> to vector<16xf32>
      %c2_i32_778 = arith.constant 2 : i32
      %c0_i32_779 = arith.constant 0 : i32
      %950 = tpu.memref_slice %arg7[%c2_i32_778, %c0_i32_779] : memref<3x256xf32, #tpu.memory_space<vmem>> -> memref<1x256xf32, #tpu.memory_space<vmem>>
      %951 = tpu.memref_squeeze %950 : memref<1x256xf32, #tpu.memory_space<vmem>> -> memref<256xf32, #tpu.memory_space<vmem>>
      %c176_780 = arith.constant 176 : index
      %952 = vector.load %951[%c176_780] : memref<256xf32, #tpu.memory_space<vmem>>, vector<16xf32>
      tpu.vector_store %951[%c176_780], %949 {strides = array<i32>} : memref<256xf32, #tpu.memory_space<vmem>>, vector<16xf32>,
      %c0_781 = arith.constant 0 : index
      %c15_782 = arith.constant 15 : index
      %c3_783 = arith.constant 3 : index
      %953 = vector.load %arg5[%c0_781, %c15_782, %c3_783] : memref<2x22x22xf32, #tpu.memory_space<vmem>>, vector<1x1x16xf32>
      %954 = vector.shape_cast %953 : vector<1x1x16xf32> to vector<16xf32>
      %c2_i32_784 = arith.constant 2 : i32
      %c0_i32_785 = arith.constant 0 : i32
      %955 = tpu.memref_slice %arg7[%c2_i32_784, %c0_i32_785] : memref<3x256xf32, #tpu.memory_space<vmem>> -> memref<1x256xf32, #tpu.memory_space<vmem>>
      %956 = tpu.memref_squeeze %955 : memref<1x256xf32, #tpu.memory_space<vmem>> -> memref<256xf32, #tpu.memory_space<vmem>>
      %c192_786 = arith.constant 192 : index
      %957 = vector.load %956[%c192_786] : memref<256xf32, #tpu.memory_space<vmem>>, vector<16xf32>
      tpu.vector_store %956[%c192_786], %954 {strides = array<i32>} : memref<256xf32, #tpu.memory_space<vmem>>, vector<16xf32>,
      %c0_787 = arith.constant 0 : index
      %c16_788 = arith.constant 16 : index
      %c3_789 = arith.constant 3 : index
      %958 = vector.load %arg5[%c0_787, %c16_788, %c3_789] : memref<2x22x22xf32, #tpu.memory_space<vmem>>, vector<1x1x16xf32>
      %959 = vector.shape_cast %958 : vector<1x1x16xf32> to vector<16xf32>
      %c2_i32_790 = arith.constant 2 : i32
      %c0_i32_791 = arith.constant 0 : i32
      %960 = tpu.memref_slice %arg7[%c2_i32_790, %c0_i32_791] : memref<3x256xf32, #tpu.memory_space<vmem>> -> memref<1x256xf32, #tpu.memory_space<vmem>>
      %961 = tpu.memref_squeeze %960 : memref<1x256xf32, #tpu.memory_space<vmem>> -> memref<256xf32, #tpu.memory_space<vmem>>
      %c208_792 = arith.constant 208 : index
      %962 = vector.load %961[%c208_792] : memref<256xf32, #tpu.memory_space<vmem>>, vector<16xf32>
      tpu.vector_store %961[%c208_792], %959 {strides = array<i32>} : memref<256xf32, #tpu.memory_space<vmem>>, vector<16xf32>,
      %c0_793 = arith.constant 0 : index
      %c17_794 = arith.constant 17 : index
      %c3_795 = arith.constant 3 : index
      %963 = vector.load %arg5[%c0_793, %c17_794, %c3_795] : memref<2x22x22xf32, #tpu.memory_space<vmem>>, vector<1x1x16xf32>
      %964 = vector.shape_cast %963 : vector<1x1x16xf32> to vector<16xf32>
      %c2_i32_796 = arith.constant 2 : i32
      %c0_i32_797 = arith.constant 0 : i32
      %965 = tpu.memref_slice %arg7[%c2_i32_796, %c0_i32_797] : memref<3x256xf32, #tpu.memory_space<vmem>> -> memref<1x256xf32, #tpu.memory_space<vmem>>
      %966 = tpu.memref_squeeze %965 : memref<1x256xf32, #tpu.memory_space<vmem>> -> memref<256xf32, #tpu.memory_space<vmem>>
      %c224_798 = arith.constant 224 : index
      %967 = vector.load %966[%c224_798] : memref<256xf32, #tpu.memory_space<vmem>>, vector<16xf32>
      tpu.vector_store %966[%c224_798], %964 {strides = array<i32>} : memref<256xf32, #tpu.memory_space<vmem>>, vector<16xf32>,
      %c0_799 = arith.constant 0 : index
      %c18_800 = arith.constant 18 : index
      %c3_801 = arith.constant 3 : index
      %968 = vector.load %arg5[%c0_799, %c18_800, %c3_801] : memref<2x22x22xf32, #tpu.memory_space<vmem>>, vector<1x1x16xf32>
      %969 = vector.shape_cast %968 : vector<1x1x16xf32> to vector<16xf32>
      %c2_i32_802 = arith.constant 2 : i32
      %c0_i32_803 = arith.constant 0 : i32
      %970 = tpu.memref_slice %arg7[%c2_i32_802, %c0_i32_803] : memref<3x256xf32, #tpu.memory_space<vmem>> -> memref<1x256xf32, #tpu.memory_space<vmem>>
      %971 = tpu.memref_squeeze %970 : memref<1x256xf32, #tpu.memory_space<vmem>> -> memref<256xf32, #tpu.memory_space<vmem>>
      %c240_804 = arith.constant 240 : index
      %972 = vector.load %971[%c240_804] : memref<256xf32, #tpu.memory_space<vmem>>, vector<16xf32>
      tpu.vector_store %971[%c240_804], %969 {strides = array<i32>} : memref<256xf32, #tpu.memory_space<vmem>>, vector<16xf32>,
      %c2_805 = arith.constant 2 : index
      %c0_806 = arith.constant 0 : index
      %973 = vector.load %arg7[%c2_805, %c0_806] : memref<3x256xf32, #tpu.memory_space<vmem>>, vector<1x256xf32>
      %974 = vector.shape_cast %973 : vector<1x256xf32> to vector<256xf32>
      %975 = arith.index_cast %8 : i32 to index
      %c0_807 = arith.constant 0 : index
      %c0_808 = arith.constant 0 : index
      %976 = vector.load %arg1[%975, %c0_807, %c0_808] : memref<2x4x256xf32, #tpu.memory_space<vmem>>, vector<1x4x256xf32>
      %977 = vector.shape_cast %976 : vector<1x4x256xf32> to vector<4x256xf32>
      %978 = vector.shape_cast %974 : vector<256xf32> to vector<1x256xf32>
      %979 = vector.broadcast %978 : vector<1x256xf32> to vector<4x256xf32>
      %980 = arith.mulf %977, %979 : vector<4x256xf32>
      %981 = arith.index_cast %8 : i32 to index
      %c0_809 = arith.constant 0 : index
      %c0_810 = arith.constant 0 : index
      %982 = vector.load %arg4[%981, %c0_809, %c0_810] : memref<2x4x256xf32, #tpu.memory_space<vmem>>, vector<1x4x256xf32>
      %983 = vector.shape_cast %982 : vector<1x4x256xf32> to vector<4x256xf32>
      %984 = vector.shape_cast %980 : vector<4x256xf32> to vector<1x4x256xf32>
      tpu.vector_store %arg4[%981, %c0_809, %c0_810], %984 {strides = array<i32>} : memref<2x4x256xf32, #tpu.memory_space<vmem>>, vector<1x4x256xf32>,
    }
    %c2_i32_11 = arith.constant 2 : i32
    return
  }
  func.func @transform_0(%arg0: i32) -> (i32, i32, i32) {
    %c0_i32 = arith.constant 0 : i32
    %c0_i32_0 = arith.constant 0 : i32
    %c0_i32_1 = arith.constant 0 : i32
    return %arg0, %c0_i32, %c0_i32_0 : i32, i32, i32
  }
  func.func @transform_1(%arg0: i32) -> i32 {
    %c0_i32 = arith.constant 0 : i32
    %c0_i32_0 = arith.constant 0 : i32
    return %c0_i32 : i32
  }
  func.func @transform_2(%arg0: i32) -> i32 {
    %c0_i32 = arith.constant 0 : i32
    %c0_i32_0 = arith.constant 0 : i32
    return %c0_i32 : i32
  }
  func.func @transform_3(%arg0: i32) -> (i32, i32, i32) {
    %c0_i32 = arith.constant 0 : i32
    %c0_i32_0 = arith.constant 0 : i32
    %c0_i32_1 = arith.constant 0 : i32
    return %arg0, %c0_i32, %c0_i32_0 : i32, i32, i32
  }
}

</mosaic_0001>

<bundles_post_ra>
// kernel: tpu_custom_call.1
= control target key start
LH: loop header
LB: loop body
LE: loop exit
PB: predicated region body
PF: predicated region fallthrough
CT: control target
= control target key end

     0   :  { %s3618_s0 = inlined_call_operand.hbm [shape: f32[2,4,256], index: 0, kind: input, shape index: {}]   ;;  %s3619_s1 = inlined_call_operand.vmem [shape: f32[98], index: 1, kind: input, shape index: {}]   ;;  %s3620_s2 = inlined_call_operand.<no memory space> [shape: f32[1], index: 2, kind: input, shape index: {}]   ;;  %s3621_s3 = inlined_call_operand.hbm [shape: f32[2,4,256], index: 3, kind: output, shape index: {}]  }
   0x1   :  { %3755 = sst [smem:[#allocation145_spill]] %s3621_s3 }
   0x2   :  { %8 = sst [smem:[#allocation5]] %s3620_s2 }
   0x3   :  { %9 = vsyncpa [#allocation7], 0 }
   0x4   :  { %10 = vsyncpa [#allocation9], 0 }
   0x5   :  { %11 = vsyncpa [#allocation8], 0  ;;  %s2166_s14 = smov [#allocation6]   ;;  %s30_s18 = sshll.u32 %s3619_s1, 4  ;;  %s31_s18 = int_to_ptr.vmem [resolvable:$true] %s30_s18 }
   0x6   :  { %s17_s15 = sshll.u32 %s2166_s14, 4  ;;  %s2096_s21 = scalar_lea.hbm %s3618_s0, 256  ;;  %s18_s15 = int_to_ptr.vmem [resolvable:$true] %s17_s15 }
   0x7   :  { %p2097_p0 = scmp.ne.s32.totalorder %s3618_s0, %s2096_s21  ;;  %p2100_p1 = scmp.lt.u32.totalorder %s2096_s21, %s3618_s0 }
   0x9   :  { %p2102_p2 = pnand %p2100_p1, %p2097_p0 }
   0xb   :  { %2105 = shalt.err (!%p2102_p2)
}
   0xc   :  { %s2106_s25 = scalar_lea.vmem %s18_s15, 256  ;;  %p2111_p4 = scmp.lt.s32.totalorder %s18_s15, %s18_s15 }
   0xd   :  { %p2107_p3 = scmp.ne.s32.totalorder %s18_s15, %s2106_s25  ;;  %p2112_p5 = scmp.lt.s32.totalorder %s2106_s25, %s2106_s25 }
   0xf   :  { %p2113_p6 = por %p2112_p5, %p2111_p4 }
  0x11   :  { %p2114_p7 = pnand %p2113_p6, %p2107_p3 }
  0x13   :  { %2117 = shalt.err (!%p2114_p7)
}
  0x14   :  { %s3622_s1 = smov 128   ;;  %s3623_s26 = smov 8  }
  0x15   :  { %23 = dma.hbm_to_vmem [thread:$0]  %s3618_s0, 256, %s18_s15, [#allocation7], %s3622_s1, %s3622_s1, %s3623_s26  }
  0x16   :  { %s2118_s29 = scalar_lea.vmem %s31_s18, 16  ;;  %p2123_p9 = scmp.lt.s32.totalorder %s31_s18, %s31_s18 }
  0x17   :  { %p2119_p8 = scmp.ne.s32.totalorder %s31_s18, %s2118_s29  ;;  %p2124_p10 = scmp.lt.s32.totalorder %s2118_s29, %s2118_s29 }
  0x19   :  { %p2125_p11 = por %p2124_p10, %p2123_p9 }
  0x1b   :  { %p2126_p12 = pnand %p2125_p11, %p2119_p8 }
  0x1d   :  { %2129 = shalt.err (!%p2126_p12)
}
  0x1e   :  { %s2169_s30 = smov [#allocation10]  }
  0x1f   :  { %33 = dma.vmem_to_smem %s31_s18, 16, %s2169_s30, [#allocation9]  }
  0x20   :  { %2156 = dma.done.wait [#allocation7], 256  }
  0x21   :  { %2157 = vsyncadd [#allocation7], 4294967040 }
  0x22   :  { %2158 = dma.done.wait [#allocation9], 16  }
  0x23   :  { %2159 = vsyncadd [#allocation9], 4294967280 }
  0x24   :  { %42 = sfence }
  0x25   :  { %vm43_vm0 = vcmask 174080   ;;  %vm48_vm1 = vcmask 23552   ;;  %vm51_vm2 = vcmask 21504   ;;  %v2170_v0 = vmov 0.0   ;;  %s2235_s0 = smov 0  }
  0x26   :  { %44 = vst.msk [vmem:[#allocation2] sm:$0x7] %vm43_vm0, %v2170_v0  ;;  %45 = vst.msk [vmem:[#allocation2 + $0x18] sm:$0x7] %vm43_vm0, %v2170_v0  ;;  %vm56_vm3 = vcmask 179352   ;;  %vm59_vm4 = vcmask 177304  }
  0x27   :  { %46 = vst.msk [vmem:[#allocation2 + $0x13] sm:$0x7] %vm43_vm0, %v2170_v0  ;;  %47 = vst.msk [vmem:[#allocation2 + $0x2b] sm:$0x7] %vm43_vm0, %v2170_v0 }
  0x28   :  { %50 = vst.msk [vmem:[#allocation2 + $0x8] sm:$0xff] %vm48_vm1, %v2170_v0  ;;  %54 = vst.msk [vmem:[#allocation2 + $0x20] sm:$0xff] %vm48_vm1, %v2170_v0 }
  0x29   :  { %49 = vst.msk [vmem:[#allocation2] sm:$0xff] %vm48_vm1, %v2170_v0  ;;  %53 = vst.msk [vmem:[#allocation2 + $0x18] sm:$0xff] %vm48_vm1, %v2170_v0 }
  0x2a   :  { %52 = vst.msk [vmem:[#allocation2 + $0x10] sm:$0x3f] %vm51_vm2, %v2170_v0  ;;  %55 = vst.msk [vmem:[#allocation2 + $0x28] sm:$0x3f] %vm51_vm2, %v2170_v0 }
  0x2b   :  { %58 = vst.msk [vmem:[#allocation2 + $0x8] sm:$0xff] %vm56_vm3, %v2170_v0  ;;  %62 = vst.msk [vmem:[#allocation2 + $0x20] sm:$0xff] %vm56_vm3, %v2170_v0 }
  0x2c   :  { %57 = vst.msk [vmem:[#allocation2] sm:$0xff] %vm56_vm3, %v2170_v0  ;;  %61 = vst.msk [vmem:[#allocation2 + $0x18] sm:$0xff] %vm56_vm3, %v2170_v0 }
  0x2d   :  { %60 = vst.msk [vmem:[#allocation2 + $0x10] sm:$0x3f] %vm59_vm4, %v2170_v0  ;;  %63 = vst.msk [vmem:[#allocation2 + $0x28] sm:$0x3f] %vm59_vm4, %v2170_v0 }
  0x2e LB: > { %3756 = sst [smem:[#allocation15_spill]] %s2164_s0  ;;  %s3624_s4 = sshll.u32 %s2164_s0, 3  ;;  %vm77_vm5 = vcmask 1043456   ;;  %v2171_v13 = vmov 1966171168   ;;  %v3689_v15 = vlaneseq  ;;  %vm164_vm7 = vcmask 147480   ;;  %s2164_s0 = sphi %s2235_s0, %s69_s0  }
  0x2f   : > { %s2243_s5 = scalar_lea.vmem [#allocation6], %s3624_s4  ;;  %v98_v14 = vunpack.c.l.s4 %v2171_v13  ;;  %s2172_s6 = smov 115   ;;  %vm483_vm8 = vcmask 130048   ;;  %vm486_vm9 = vcmask 128000   ;;  %vm1536_vm10 = vcmask 154648  }
  0x30   : > { %3757 = sst [smem:[#allocation16_spill]] %s2243_s5  ;;  %v117_v1 = vld [vmem:[%s2243_s5] sm:$0xff]  ;;  %v2247_v25 = vshrl.u32 %v3689_v15, 7  ;;  %vm114_vm6 = vcmp.lt.s32.totalorder %v3689_v15, 256  ;;  %s3627_s7 = smov 3  }
  0x31   : > { %v119_v2 = vcombine.high %v117_v1, %v117_v1  ;;  %v121_v3 = vsel %vm77_vm5, %v117_v1, -inf  ;;  %v78_v4 = vsel %vm77_vm5, %v117_v1, 0.0  ;;  %v99_v24 = vunpack.c.0.s8 %v98_v14  ;;  %s2174_s8 = smov 83   ;;  %s2175_s9 = smov 99  }
  0x32   : > { %v122_v5 = vrot.slane %v121_v3, 4  ;;  %v79_v6 = vrot.slane %v78_v4, 4  ;;  %3758 = vst [vmem:[#allocation17_spill] sm:$0xff] %v2247_v25  ;;  %v2258_v45 = vsub.s32 0, %v2247_v25  ;;  %s2176_s10 = smov 51   ;;  %s2177_s11 = smov 67  }
  0x33   : > { %v128_v7 = vsel %vm77_vm5, %v119_v2, -inf  ;;  %v85_v8 = vsel %vm77_vm5, %v119_v2, 0.0  ;;  %v2250_v34 = vsub.s32 %v99_v24, %v2247_v25  ;;  %s2178_s12 = smov 19   ;;  %s2179_s13 = smov 35  }
  0x34   : > { %v123_v9 = vmax.f32 %v121_v3, %v122_v5  ;;  %v129_v10 = vrot.slane %v128_v7, 4  ;;  %v80_v11 = vadd.f32 %v79_v6, %v78_v4  ;;  %v86_v12 = vrot.slane %v85_v8, 4  ;;  %3760 = vst [vmem:[#allocation19_spill] sm:$0xff] %v2258_v45  ;;  %s3625_s14 = smov 125   ;;  %s2181_s15 = smov 124  }
  0x35   : > { %3759 = vst [vmem:[#allocation18_spill] sm:$0xff] %v2250_v34  ;;  %s2182_s16 = smov 127   ;;  %s2183_s17 = smov 123  }
  0x36   : > { %v124_v16 = vrot.slane %v123_v9, 2  ;;  %v130_v17 = vmax.f32 %v128_v7, %v129_v10  ;;  %v81_v18 = vrot.slane %v80_v11, 2  ;;  %v87_v19 = vadd.f32 %v86_v12, %v85_v8  ;;  %s2184_s18 = smov 126   ;;  %s2185_s19 = smov 122  }
  0x37   : > { %s2425_s20 = sld [smem:[#allocation5]]  ;;  %s2427_s21 = sld [smem:[#allocation10]] }
  0x38   : > { %v125_v20 = vmax.f32 %v123_v9, %v124_v16  ;;  %v131_v21 = vrot.slane %v130_v17, 2  ;;  %v82_v22 = vadd.f32 %v81_v18, %v80_v11  ;;  %v88_v23 = vrot.slane %v87_v19, 2  ;;  %s2429_s22 = sld [smem:[#allocation10 + $0x7]]  ;;  %s2431_s23 = sld [smem:[#allocation10 + $0xe]] }
  0x39   : > { %s2433_s24 = sld [smem:[#allocation10 + $0x15]]  ;;  %s2435_s2 = sld [smem:[#allocation10 + $0x1c]] }
  0x3a   : > { %v126_v26 = vrot.slane %v125_v20, 1  ;;  %v132_v27 = vmax.f32 %v130_v17, %v131_v21  ;;  %v83_v28 = vrot.slane %v82_v22, 1  ;;  %v89_v29 = vadd.f32 %v88_v23, %v87_v19  ;;  %s2437_s25 = sld [smem:[#allocation10 + $0x23]]  ;;  %s2439_s27 = sld [smem:[#allocation10 + $0x2a]] }
  0x3b   : > { %s2441_s28 = sld [smem:[#allocation10 + $0x31]]  ;;  %s2443_s29 = sld [smem:[#allocation10 + $0x38]] }
  0x3c   : > { %v127_v30 = vmax.f32 %v125_v20, %v126_v26  ;;  %v133_v31 = vrot.slane %v132_v27, 1  ;;  %v84_v32 = vadd.f32 %v83_v28, %v82_v22  ;;  %v90_v33 = vrot.slane %v89_v29, 1  ;;  %s2445_s30 = sld [smem:[#allocation10 + $0x3f]]  ;;  %s2473_s26 = sld [smem:[#allocation10 + $0x5e]] }
  0x3d   : > { %s2471_s1 = sld [smem:[#allocation10 + $0x57]]  ;;  %s2475_s4 = sld [smem:[#allocation10 + $0x5]] }
  0x3e   : > { %v134_v35 = vmax.f32 %v132_v27, %v133_v31  ;;  %v91_v36 = vadd.f32 %v90_v33, %v89_v29  ;;  %v92_v37 = vmul.f32 0.25, %v84_v32  ;;  %s2481_s3 = sld [smem:[#allocation10 + $0x4a]]  ;;  %s2483_s0 = sld [smem:[#allocation10 + $0x51]] }
  0x3f   : > { %s2485_s5 = sld [smem:[#allocation10 + $0x58]] }
  0x40   : > { %v137_v38 = vcombine.low %v127_v30, %v134_v35  ;;  %v93_v39 = vmul.f32 0.25, %v91_v36 }
  0x42   : > { %v144_v40 = vrot.slane %v137_v38, %v2250_v34  ;;  %v96_v41 = vcombine.low %v92_v37, %v93_v39  ;;  %3771 = sst [smem:[#allocation30_spill]] %s2473_s26  ;;  %s2493_s26 = sld [smem:[#allocation10 + $0x1d]] }
  0x43   : > { %3770 = sst [smem:[#allocation29_spill]] %s2471_s1  ;;  %s2491_s1 = sld [smem:[#allocation10 + $0x16]] }
  0x44   : > { %v151_v42 = vrot.slane %v144_v40, %v2250_v34  ;;  %v103_v43 = vrot.slane %v96_v41, %v2250_v34  ;;  %3772 = sst [smem:[#allocation31_spill]] %s2475_s4  ;;  %s2495_s4 = sld [smem:[#allocation10 + $0x24]] }
  0x45   : > { %3775 = sst [smem:[#allocation34_spill]] %s2481_s3  ;;  %s2501_s3 = sld [smem:[#allocation10 + $0xb]] }
  0x46   : > { %154 = vst.msk [vmem:[#allocation4 + $0x1] ss:$4 sm:$0x3] %vm114_vm6, %v151_v42  ;;  %v110_v44 = vrot.slane %v103_v43, %v2250_v34  ;;  %3776 = sst [smem:[#allocation35_spill]] %s2483_s0  ;;  %s2503_s0 = sld [smem:[#allocation10 + $0x12]] }
  0x47   : > { %3777 = sst [smem:[#allocation36_spill]] %s2485_s5  ;;  %s2505_s5 = sld [smem:[#allocation10 + $0x19]] }
  0x48   : > { %116 = vst.msk [vmem:[#allocation4] ss:$4 sm:$0x3] %vm114_vm6, %v110_v44  ;;  %3781 = sst [smem:[#allocation40_spill]] %s2493_s26 }
  0x49   : > { %3780 = sst [smem:[#allocation39_spill]] %s2491_s1  ;;  %s2510_s1 = sld [smem:[#allocation10 + $0x27]] }
  0x4a   : > { %3782 = sst [smem:[#allocation41_spill]] %s2495_s4  ;;  %s2512_s26 = sld [smem:[#allocation10 + $0x2e]] }
  0x4b   : > { %3785 = sst [smem:[#allocation44_spill]] %s2501_s3  ;;  %s2517_s3 = sld [smem:[#allocation10 + $0x13]] }
  0x4c   : > { %3786 = sst [smem:[#allocation45_spill]] %s2503_s0  ;;  %s2519_s0 = sld [smem:[#allocation10 + $0x1a]] }
  0x4d   : > { %v188_v46 = vld [vmem:[#allocation4 + $0x1] ss:$4 sm:$0x1]  ;;  %v350_v32 = vld [vmem:[#allocation4 + $0x5] ss:$4 sm:$0x1] }
  0x4e   : > { %v167_v47 = vld [vmem:[#allocation4 + $0x1] ss:$4 sm:$0x1]  ;;  %v193_v48 = vrot.slane %v188_v46, %v2258_v45  ;;  %v330_v33 = vld [vmem:[#allocation4 + $0x5] ss:$4 sm:$0x1]  ;;  %v355_v35 = vrot.slane %v350_v32, %v2258_v45 }
  0x4f   : > { %v172_v49 = vrot.slane %v167_v47, %v2258_v45  ;;  %v228_v50 = vld [vmem:[#allocation4 + $0x1] ss:$4 sm:$0x1]  ;;  %v198_v54 = vld [vmem:[#allocation4] ss:$4 sm:$0x1]  ;;  %v335_v36 = vrot.slane %v330_v33, %v2258_v45 }
  0x50   : > { %v208_v51 = vld [vmem:[#allocation4 + $0x1] ss:$4 sm:$0x1]  ;;  %194 = vrot.lane.b32.xlu1 %v193_v48, %s2172_s6  ;;  %v233_v52 = vrot.slane %v228_v50, %v2258_v45  ;;  %v155_v55 = vld [vmem:[#allocation4] ss:$4 sm:$0x1]  ;;  %v203_v56 = vrot.slane %v198_v54, %v2258_v45 }
  0x51   : > { %173 = vrot.lane.b32.xlu0 %v172_v49, %s3627_s7  ;;  %v213_v53 = vrot.slane %v208_v51, %v2258_v45  ;;  %v160_v57 = vrot.slane %v155_v55, %v2258_v45  ;;  %v218_v58 = vld [vmem:[#allocation4] ss:$4 sm:$0x1]  ;;  %v340_v6 = vld [vmem:[#allocation4 + $0x4] ss:$4 sm:$0x1] }
  0x52   : > { %v178_v59 = vld [vmem:[#allocation4] ss:$4 sm:$0x1]  ;;  %v223_v60 = vrot.slane %v218_v58, %v2258_v45  ;;  %v319_v7 = vld [vmem:[#allocation4 + $0x4] ss:$4 sm:$0x1]  ;;  %v345_v8 = vrot.slane %v340_v6, %v2258_v45 }
  0x53   : > { %v183_v61 = vrot.slane %v178_v59, %v2258_v45  ;;  %v258_v62 = vld [vmem:[#allocation4] ss:$4 sm:$0x1]  ;;  %v324_v9 = vrot.slane %v319_v7, %v2258_v45  ;;  %v380_v10 = vld [vmem:[#allocation4 + $0x4] ss:$4 sm:$0x1] }
  0x54   : > { %234 = vrot.lane.b32.xlu1 %v233_v52, %s2174_s8  ;;  %v238_v63 = vld [vmem:[#allocation4] ss:$4 sm:$0x1]  ;;  %v263_v0 = vrot.slane %v258_v62, %v2258_v45  ;;  %v360_v11 = vld [vmem:[#allocation4 + $0x4] ss:$4 sm:$0x1]  ;;  %v385_v12 = vrot.slane %v380_v10, %v2258_v45 }
  0x55   : > { %214 = vrot.lane.b32.xlu0 %v213_v53, %s2175_s9  ;;  %v243_v1 = vrot.slane %v238_v63, %v2258_v45  ;;  %v298_v2 = vld [vmem:[#allocation4] ss:$4 sm:$0x1]  ;;  %v365_v13 = vrot.slane %v360_v11, %v2258_v45  ;;  %v420_v14 = vld [vmem:[#allocation4 + $0x4] ss:$4 sm:$0x1] }
  0x56   : > { %v278_v3 = vld [vmem:[#allocation4] ss:$4 sm:$0x1]  ;;  %v303_v4 = vrot.slane %v298_v2, %v2258_v45  ;;  %v400_v16 = vld [vmem:[#allocation4 + $0x4] ss:$4 sm:$0x1]  ;;  %v425_v17 = vrot.slane %v420_v14, %v2258_v45 }
  0x57   : > { %v283_v5 = vrot.slane %v278_v3, %v2258_v45  ;;  %v405_v18 = vrot.slane %v400_v16, %v2258_v45  ;;  %v460_v19 = vld [vmem:[#allocation4 + $0x4] ss:$4 sm:$0x1]  ;;  %v268_v23 = vld [vmem:[#allocation4 + $0x1] ss:$4 sm:$0x1] }
  0x58   : > { %204 = vrot.lane.b32.xlu1 %v203_v56, %s2175_s9  ;;  %v440_v20 = vld [vmem:[#allocation4 + $0x4] ss:$4 sm:$0x1]  ;;  %v465_v21 = vrot.slane %v460_v19, %v2258_v45  ;;  %v248_v24 = vld [vmem:[#allocation4 + $0x1] ss:$4 sm:$0x1]  ;;  %v273_v26 = vrot.slane %v268_v23, %v2258_v45 }
  0x59   : > { %161 = vrot.lane.b32.xlu0 %v160_v57, %s3627_s7  ;;  %v445_v22 = vrot.slane %v440_v20, %v2258_v45  ;;  %v253_v27 = vrot.slane %v248_v24, %v2258_v45  ;;  %v308_v28 = vld [vmem:[#allocation4 + $0x1] ss:$4 sm:$0x1]  ;;  %v390_v37 = vld [vmem:[#allocation4 + $0x5] ss:$4 sm:$0x1] }
  0x5a   : > { %v288_v29 = vld [vmem:[#allocation4 + $0x1] ss:$4 sm:$0x1]  ;;  %v313_v30 = vrot.slane %v308_v28, %v2258_v45  ;;  %v370_v38 = vld [vmem:[#allocation4 + $0x5] ss:$4 sm:$0x1]  ;;  %v395_v39 = vrot.slane %v390_v37, %v2258_v45 }
  0x5b   : > { %v293_v31 = vrot.slane %v288_v29, %v2258_v45  ;;  %v375_v40 = vrot.slane %v370_v38, %v2258_v45  ;;  %v430_v41 = vld [vmem:[#allocation4 + $0x5] ss:$4 sm:$0x1]  ;;  %3787 = sst [smem:[#allocation46_spill]] %s2505_s5  ;;  %s2521_s5 = sld [smem:[#allocation10 + $0x21]] }
  0x5c   : > { %224 = vrot.lane.b32.xlu1 %v223_v60, %s2174_s8  ;;  %v410_v42 = vld [vmem:[#allocation4 + $0x5] ss:$4 sm:$0x1]  ;;  %v435_v43 = vrot.slane %v430_v41, %v2258_v45  ;;  %3789 = sst [smem:[#allocation48_spill]] %s2510_s1  ;;  %v729_v41 = vstv %s2427_s21  ;;  %s2525_s1 = sld [smem:[#allocation10 + $0x2f]] }
  0x5d   : > { %184 = vrot.lane.b32.xlu0 %v183_v61, %s2172_s6  ;;  %v415_v44 = vrot.slane %v410_v42, %v2258_v45  ;;  %v470_v46 = vld [vmem:[#allocation4 + $0x5] ss:$4 sm:$0x1]  ;;  %3790 = sst [smem:[#allocation49_spill]] %s2512_s26  ;;  %s2529_s21 = sld [smem:[#allocation10 + $0x6]] }
  0x5e   : > { %v450_v47 = vld [vmem:[#allocation4 + $0x5] ss:$4 sm:$0x1]  ;;  %v475_v48 = vrot.slane %v470_v46, %v2258_v45  ;;  %3792 = sst [smem:[#allocation51_spill]] %s2517_s3  ;;  %v724_v46 = vstv %s2425_s20  ;;  %s2542_s20 = sld [smem:[#allocation10 + $0x1e]] }
  0x5f   : > { %v455_v49 = vrot.slane %v450_v47, %v2258_v45  ;;  %3793 = sst [smem:[#allocation52_spill]] %s2519_s0  ;;  %s2531_s3 = sld [smem:[#allocation10 + $0x9]] }
  0x60   : > { %264 = vrot.lane.b32.xlu1 %v263_v0, %s2176_s10  ;;  %s2700_s4 = sld [smem:[#allocation10 + $0x48]]  ;;  %s2729_s26 = sld [smem:[#allocation10 + $0x37]] }
  0x61   : > { %244 = vrot.lane.b32.xlu0 %v243_v1, %s2177_s11  ;;  %3794 = sst [smem:[#allocation53_spill]] %s2521_s5  ;;  %s2741_s5 = sld [smem:[#allocation10 + $0x44]] }
  0x62   : > { %3796 = sst [smem:[#allocation55_spill]] %s2525_s1  ;;  %s2535_s1 = sld [smem:[#allocation10 + $0x10]] }
  0x63   : > { %3797 = sst [smem:[#allocation56_spill]] %s2529_s21  ;;  %s2775_s0 = sld [smem:[#allocation10 + $0x53]] }
  0x64   : > { %304 = vrot.lane.b32.xlu1 %v303_v4, %s2178_s12  ;;  %3801 = sst [smem:[#allocation60_spill]] %s2542_s20  ;;  %s2609_s20 = sld [smem:[#allocation10 + $0x11]] }
  0x65   : > { %284 = vrot.lane.b32.xlu0 %v283_v5, %s2179_s13  ;;  %3798 = sst [smem:[#allocation57_spill]] %s2531_s3  ;;  %s2657_s3 = sld [smem:[#allocation10 + $0x4e]] }
  0x66   : > { %3855 = sst [smem:[#allocation94_spill]] %s2700_s4  ;;  %s2760_s4 = sld [smem:[#allocation10 + $0x3e]] }
  0x67   : > { %s2785_s21 = sld [smem:[#allocation10 + $0x61]] }
  0x68   : > { %346 = vrot.lane.b32.xlu1 %v345_v8, %s2172_s6  ;;  %3799 = sst [smem:[#allocation58_spill]] %s2535_s1 }
  0x69   : > { %325 = vrot.lane.b32.xlu0 %v324_v9, %s3627_s7  ;;  %s2647_s1 = sld [smem:[#allocation10 + $0x40]]  ;;  %3892 = sst [smem:[#allocation108_spill]] %s2775_s0 }
  0x6a   : > { %3823 = sst [smem:[#allocation75_spill]] %s2609_s20  ;;  %s2629_s20 = sld [smem:[#allocation10 + $0x26]] }
  0x6b   : > { %s3918_s0 = sld [smem:[#allocation30_spill]] }
  0x6c   : > { %386 = vrot.lane.b32.xlu1 %v385_v12, %s2174_s8  ;;  %3889 = sst [smem:[#allocation105_spill]] %s2760_s4 }
  0x6d   : > { %366 = vrot.lane.b32.xlu0 %v365_v13, %s2175_s9 }
  0x70   : > { %426 = vrot.lane.b32.xlu1 %v425_v17, %s2176_s10  ;;  %3832 = sst [smem:[#allocation80_spill]] %s2629_s20 }
  0x71   : > { %406 = vrot.lane.b32.xlu0 %v405_v18, %s2177_s11 }
  0x74   : > { %466 = vrot.lane.b32.xlu1 %v465_v21, %s2178_s12 }
  0x75   : > { %446 = vrot.lane.b32.xlu0 %v445_v22, %s2179_s13 }
  0x78   : > { %274 = vrot.lane.b32.xlu1 %v273_v26, %s2176_s10 }
  0x79   : > { %254 = vrot.lane.b32.xlu0 %v253_v27, %s2177_s11 }
  0x7c   : > { %314 = vrot.lane.b32.xlu1 %v313_v30, %s2178_s12 }
  0x7d   : > { %294 = vrot.lane.b32.xlu0 %v293_v31, %s2179_s13 }
  0x80   : > { %356 = vrot.lane.b32.xlu1 %v355_v35, %s2172_s6  ;;  %s2447_s6 = sld [smem:[#allocation10 + $0x46]] }
  0x81   : > { %336 = vrot.lane.b32.xlu0 %v335_v36, %s3627_s7  ;;  %s2479_s7 = sld [smem:[#allocation10 + $0x43]] }
  0x84   : > { %396 = vrot.lane.b32.xlu1 %v395_v39, %s2174_s8  ;;  %s2449_s8 = sld [smem:[#allocation10 + $0x4d]] }
  0x85   : > { %376 = vrot.lane.b32.xlu0 %v375_v40, %s2175_s9  ;;  %s2451_s9 = sld [smem:[#allocation10 + $0x54]] }
  0x87   : > { %3774 = sst [smem:[#allocation33_spill]] %s2479_s7  ;;  %s2499_s7 = sld [smem:[#allocation10 + $0x2]] }
  0x88   : > { %436 = vrot.lane.b32.xlu1 %v435_v43, %s2176_s10  ;;  %s2453_s10 = sld [smem:[#allocation10 + $0x34]] }
  0x89   : > { %416 = vrot.lane.b32.xlu0 %v415_v44, %s2177_s11  ;;  %s2455_s11 = sld [smem:[#allocation10 + $0x5b]] }
  0x8c   : > { %476 = vrot.lane.b32.xlu1 %v475_v48, %s2178_s12  ;;  %s2457_s12 = sld [smem:[#allocation10 + $0x35]]  ;;  %v785_v48 = vstv %s2429_s22 }
  0x8d   : > { %456 = vrot.lane.b32.xlu0 %v455_v49, %s2179_s13  ;;  %s2459_s13 = sld [smem:[#allocation10 + $0x1]]  ;;  %s2544_s22 = sld [smem:[#allocation10 + $0x25]] }
  0x8e   : > { %3761 = sst [smem:[#allocation20_spill]] %s2453_s10 }
  0x8f   : > { %3762 = sst [smem:[#allocation21_spill]] %s2455_s11 }
  0x90   : > { %3784 = sst [smem:[#allocation43_spill]] %s2499_s7  ;;  %s2515_s7 = sld [smem:[#allocation10 + $0xc]] }
  0x92   : > { %3763 = sst [smem:[#allocation22_spill]] %s2457_s12 }
  0x93   : > { %3764 = sst [smem:[#allocation23_spill]] %s2459_s13 }
  0x94   : > { %3802 = sst [smem:[#allocation61_spill]] %s2544_s22 }
  0x95   : > { %s2637_s22 = sld [smem:[#allocation10 + $0x33]] }
  0x96   : > { %3791 = sst [smem:[#allocation50_spill]] %s2515_s7  ;;  %s2767_s7 = sld [smem:[#allocation10 + $0x45]] }
  0x9c   : > { %3890 = sst [smem:[#allocation106_spill]] %s2767_s7  ;;  %s3981_s7 = sld [smem:[#allocation51_spill]] }
  0xc2   : > { %v195_v50 = vpop.permute.xlu1 %194 }
  0xc3   : > { %v174_v51 = vpop.permute.xlu0 %173  ;;  %197 = vst.msk [vmem:[#allocation2 + $0x1c] sm:$0x1] %vm164_vm7, %v195_v50  ;;  %v841_v50 = vstv %s2431_s23  ;;  %s2550_s23 = sld [smem:[#allocation10 + $0x2c]] }
  0xc4   : > { %177 = vst.msk [vmem:[#allocation2 + $0x1b] sm:$0x1] %vm164_vm7, %v174_v51 }
  0xc6   : > { %v235_v52 = vpop.permute.xlu1 %234 }
  0xc7   : > { %v215_v53 = vpop.permute.xlu0 %214  ;;  %237 = vst.msk [vmem:[#allocation2 + $0x1e] sm:$0x1] %vm164_vm7, %v235_v52 }
  0xc8   : > { %217 = vst.msk [vmem:[#allocation2 + $0x1d] sm:$0x1] %vm164_vm7, %v215_v53  ;;  %v897_v53 = vstv %s2433_s24  ;;  %s2552_s24 = sld [smem:[#allocation10 + $0x3]] }
  0xc9   : > { %3803 = sst [smem:[#allocation62_spill]] %s2550_s23  ;;  %s2594_s23 = sld [smem:[#allocation10 + $0x32]] }
  0xca   : > { %v205_v54 = vpop.permute.xlu1 %204 }
  0xcb   : > { %v162_v55 = vpop.permute.xlu0 %161  ;;  %207 = vst.msk [vmem:[#allocation2 + $0x5] sm:$0x1] %vm164_vm7, %v205_v54 }
  0xcc   : > { %165 = vst.msk [vmem:[#allocation2 + $0x3] sm:$0x1] %vm164_vm7, %v162_v55  ;;  %v953_v55 = vstv %s2435_s2  ;;  %s2565_s2 = sld [smem:[#allocation10 + $0xd]] }
  0xce   : > { %v225_v56 = vpop.permute.xlu1 %224  ;;  %3804 = sst [smem:[#allocation63_spill]] %s2552_s24  ;;  %s2573_s24 = sld [smem:[#allocation10 + $0x1b]] }
  0xcf   : > { %v185_v57 = vpop.permute.xlu0 %184  ;;  %227 = vst.msk [vmem:[#allocation2 + $0x6] sm:$0x1] %vm164_vm7, %v225_v56  ;;  %3816 = sst [smem:[#allocation72_spill]] %s2594_s23  ;;  %s2751_s23 = sld [smem:[#allocation10 + $0x52]] }
  0xd0   : > { %187 = vst.msk [vmem:[#allocation2 + $0x4] sm:$0x1] %vm164_vm7, %v185_v57  ;;  %v1009_v57 = vstv %s2437_s25  ;;  %s2567_s25 = sld [smem:[#allocation10 + $0x5f]] }
  0xd2   : > { %v265_v58 = vpop.permute.xlu1 %264  ;;  %3805 = sst [smem:[#allocation64_spill]] %s2565_s2  ;;  %s2665_s2 = sld [smem:[#allocation10 + $0x5c]] }
  0xd3   : > { %v245_v59 = vpop.permute.xlu0 %244  ;;  %267 = vst.msk [vmem:[#allocation2 + $0x8] sm:$0x1] %vm164_vm7, %v265_v58 }
  0xd4   : > { %247 = vst.msk [vmem:[#allocation2 + $0x7] sm:$0x1] %vm164_vm7, %v245_v59  ;;  %3808 = sst [smem:[#allocation67_spill]] %s2573_s24 }
  0xd6   : > { %v305_v60 = vpop.permute.xlu1 %304  ;;  %3806 = sst [smem:[#allocation65_spill]] %s2567_s25  ;;  %s2592_s25 = sld [smem:[#allocation10 + $0x30]] }
  0xd7   : > { %v285_v61 = vpop.permute.xlu0 %284  ;;  %307 = vst.msk [vmem:[#allocation2 + $0xa] sm:$0x1] %vm164_vm7, %v305_v60  ;;  %v1065_v60 = vstv %s2439_s27  ;;  %s2571_s27 = sld [smem:[#allocation10 + $0x14]] }
  0xd8   : > { %287 = vst.msk [vmem:[#allocation2 + $0x9] sm:$0x1] %vm164_vm7, %v285_v61  ;;  %v1121_v61 = vstv %s2441_s28  ;;  %s3868_s28 = sld [smem:[#allocation60_spill]] }
  0xd9   : > { %3877 = sst [smem:[#allocation60_spill]] %s2741_s5  ;;  %s2758_s5 = sld [smem:[#allocation10 + $0x60]] }
  0xda   : > { %v347_v63 = vpop.permute.xlu1 %346 }
  0xdb   : > { %v2336_v62 = vld [vmem:[#allocation2] sm:$0xff]  ;;  %v326_v0 = vpop.permute.xlu0 %325  ;;  %349 = vst.msk [vmem:[#allocation2 + $0xc] sm:$0x1] %vm164_vm7, %v347_v63  ;;  %v1233_v63 = vstv %s2445_s30 }
  0xdc   : > { %484 = vst.msk [vmem:[#allocation3] sm:$0xff] %vm483_vm8, %v2336_v62  ;;  %3814 = sst [smem:[#allocation71_spill]] %s2592_s25  ;;  %s2607_s25 = sld [smem:[#allocation10 + $0xa]] }
  0xdd   : > { %328 = vst.msk [vmem:[#allocation2 + $0xb] sm:$0x1] %vm164_vm7, %v326_v0  ;;  %3807 = sst [smem:[#allocation66_spill]] %s2571_s27  ;;  %s2702_s27 = sld [smem:[#allocation10 + $0x4f]] }
  0xde   : > { %v387_v1 = vpop.permute.xlu1 %386 }
  0xdf   : > { %v367_v2 = vpop.permute.xlu0 %366  ;;  %389 = vst.msk [vmem:[#allocation2 + $0xe] sm:$0x1] %vm164_vm7, %v387_v1  ;;  %3888 = sst [smem:[#allocation104_spill]] %s2758_s5 }
  0xe0   : > { %369 = vst.msk [vmem:[#allocation2 + $0xd] sm:$0x1] %vm164_vm7, %v367_v2 }
  0xe2   : > { %v427_v3 = vpop.permute.xlu1 %426  ;;  %3822 = sst [smem:[#allocation74_spill]] %s2607_s25  ;;  %s3907_s25 = sld [smem:[#allocation31_spill]] }
  0xe3   : > { %v407_v4 = vpop.permute.xlu0 %406  ;;  %429 = vst.msk [vmem:[#allocation2 + $0x10] sm:$0x1] %vm164_vm7, %v427_v3  ;;  %v727_v40 = vld [vmem:[#allocation3] sm:$0xff]  ;;  %v1289_v3 = vstv %s2447_s6  ;;  %3856 = sst [smem:[#allocation95_spill]] %s2702_s27  ;;  %s2731_s27 = sld [smem:[#allocation10 + $0x3d]] }
  0xe4   : > { %409 = vst.msk [vmem:[#allocation2 + $0xf] sm:$0x1] %vm164_vm7, %v407_v4  ;;  %v730_v47 = vmul.f32 %v729_v41, %v727_v40  ;;  %v1345_v4 = vstv %s2449_s8  ;;  %s3874_s8 = sld [smem:[#allocation63_spill]]  ;;  %s2769_s6 = sld [smem:[#allocation10 + $0x4c]] }
  0xe6   : > { %v467_v5 = vpop.permute.xlu1 %466 }
  0xe7   : > { %v447_v6 = vpop.permute.xlu0 %446  ;;  %469 = vst.msk [vmem:[#allocation2 + $0x12] sm:$0x1] %vm164_vm7, %v467_v5  ;;  %v1401_v5 = vstv %s2451_s9 }
  0xe8   : > { %449 = vst.msk [vmem:[#allocation2 + $0x11] sm:$0x1] %vm164_vm7, %v447_v6  ;;  %v3693_v6 = vstv %s2455_s11  ;;  %s2753_s11 = sld [smem:[#allocation10 + $0x59]] }
  0xea   : > { %v275_v8 = vpop.permute.xlu1 %274  ;;  %3891 = sst [smem:[#allocation107_spill]] %s2769_s6  ;;  %s3929_s6 = sld [smem:[#allocation34_spill]] }
  0xeb   : > { %v2348_v7 = vld [vmem:[#allocation2 + $0x8] sm:$0xff]  ;;  %v255_v9 = vpop.permute.xlu0 %254  ;;  %277 = vst.msk [vmem:[#allocation2 + $0x20] sm:$0x1] %vm164_vm7, %v275_v8  ;;  %v3744_v8 = vstv %s2457_s12  ;;  %s2582_s12 = sld [smem:[#allocation10 + $0x22]] }
  0xec   : > { %485 = vst.msk [vmem:[#allocation3 + $0x8] sm:$0xff] %vm483_vm8, %v2348_v7 }
  0xed   : > { %257 = vst.msk [vmem:[#allocation2 + $0x1f] sm:$0x1] %vm164_vm7, %v255_v9  ;;  %v2561_v9 = vadd.f32 %v730_v47, %v724_v46 }
  0xee   : > { %v315_v11 = vpop.permute.xlu1 %314  ;;  %3885 = sst [smem:[#allocation103_spill]] %s2753_s11 }
  0xef   : > { %v482_v10 = vld [vmem:[#allocation2 + $0x10] sm:$0x3f]  ;;  %v295_v12 = vpop.permute.xlu0 %294  ;;  %317 = vst.msk [vmem:[#allocation2 + $0x22] sm:$0x1] %vm164_vm7, %v315_v11 }
  0xf0   : > { %487 = vst.msk [vmem:[#allocation3 + $0x10] sm:$0x3f] %vm486_vm9, %v482_v10  ;;  %v490_v26 = vld [vmem:[#allocation2 + $0x10] sm:$0x3f] }
  0xf1   : > { %297 = vst.msk [vmem:[#allocation2 + $0x21] sm:$0x1] %vm164_vm7, %v295_v12  ;;  %v566_v27 = vld [vmem:[#allocation2 + $0x10] sm:$0x3f]  ;;  %3809 = sst [smem:[#allocation68_spill]] %s2582_s12  ;;  %s2639_s12 = sld [smem:[#allocation10 + $0x39]] }
  0xf2   : > { %v357_v14 = vpop.permute.xlu1 %356  ;;  %v528_v28 = vld [vmem:[#allocation2 + $0x10] sm:$0x3f] }
  0xf3   : > { %v337_v16 = vpop.permute.xlu0 %336  ;;  %359 = vst.msk [vmem:[#allocation2 + $0x24] sm:$0x1] %vm164_vm7, %v357_v14  ;;  %v509_v29 = vld [vmem:[#allocation2 + $0x10] sm:$0x3f]  ;;  %v728_v42 = vld [vmem:[#allocation3 + $0x8] sm:$0xff] }
  0xf4   : > { %v2357_v13 = vld [vmem:[#allocation2 + $0x18] sm:$0xff]  ;;  %339 = vst.msk [vmem:[#allocation2 + $0x23] sm:$0x1] %vm164_vm7, %v337_v16  ;;  %v585_v31 = vld [vmem:[#allocation2 + $0x10] sm:$0x3f]  ;;  %v731_v52 = vmul.f32 %v729_v41, %v728_v42 }
  0xf5   : > { %606 = vst.msk [vmem:[#allocation3 + $0xa8] sm:$0xff] %vm483_vm8, %v2357_v13  ;;  %653 = vrot.lane.b32.xlu0 %v2357_v13, %s3625_s14  ;;  %v547_v33 = vld [vmem:[#allocation2 + $0x10] sm:$0x3f]  ;;  %v1063_v59 = vld [vmem:[#allocation3 + $0x6] sm:$0xff] }
  0xf6   : > { %v397_v17 = vpop.permute.xlu1 %396  ;;  %v783_v44 = vld [vmem:[#allocation3 + $0x1] sm:$0xff] }
  0xf7   : > { %v377_v18 = vpop.permute.xlu0 %376  ;;  %399 = vst.msk [vmem:[#allocation2 + $0x26] sm:$0x1] %vm164_vm7, %v397_v17  ;;  %v839_v49 = vld [vmem:[#allocation3 + $0x2] sm:$0xff]  ;;  %v840_v1 = vld [vmem:[#allocation3 + $0xa] sm:$0xff]  ;;  %v2563_v10 = vmul.f32 %v785_v48, %v783_v44  ;;  %3837 = sst [smem:[#allocation82_spill]] %s2639_s12  ;;  %s3953_s12 = sld [smem:[#allocation41_spill]] }
  0xf8   : > { %379 = vst.msk [vmem:[#allocation2 + $0x25] sm:$0x1] %vm164_vm7, %v377_v18  ;;  %v895_v51 = vld [vmem:[#allocation3 + $0x3] sm:$0xff]  ;;  %v896_v2 = vld [vmem:[#allocation3 + $0xb] sm:$0xff]  ;;  %v2575_v14 = vmul.f32 %v841_v50, %v839_v49 }
  0xf9   : > { %672 = vrot.lane.b32.xlu0 %v2357_v13, %s2181_s15  ;;  %v951_v54 = vld [vmem:[#allocation3 + $0x4] sm:$0xff]  ;;  %v952_v11 = vld [vmem:[#allocation3 + $0xc] sm:$0xff]  ;;  %v2577_v16 = vmul.f32 %v897_v53, %v895_v51 }
  0xfa   : > { %v437_v19 = vpop.permute.xlu1 %436  ;;  %v1007_v56 = vld [vmem:[#allocation3 + $0x5] sm:$0xff]  ;;  %v1008_v12 = vld [vmem:[#allocation3 + $0xd] sm:$0xff]  ;;  %v2579_v17 = vmul.f32 %v953_v55, %v951_v54 }
  0xfb   : > { %v417_v20 = vpop.permute.xlu0 %416  ;;  %439 = vst.msk [vmem:[#allocation2 + $0x28] sm:$0x1] %vm164_vm7, %v437_v19  ;;  %v784_v58 = vld [vmem:[#allocation3 + $0x9] sm:$0xff] }
  0xfc   : > { %419 = vst.msk [vmem:[#allocation2 + $0x27] sm:$0x1] %vm164_vm7, %v417_v20  ;;  %v1119_v18 = vld [vmem:[#allocation3 + $0xa8] sm:$0xff]  ;;  %v3743_v20 = vstv %s2459_s13  ;;  %s2716_s13 = sld [smem:[#allocation10 + $0x5d]] }
  0xfd   : > { %494 = vrot.lane.b32.xlu0 %v2336_v62, %s2182_s16  ;;  %v1064_v19 = vld [vmem:[#allocation3 + $0xe] sm:$0xff] }
  0xfe   : > { %v477_v21 = vpop.permute.xlu1 %476 }
  0xff   : > { %v457_v22 = vpop.permute.xlu0 %456  ;;  %479 = vst.msk [vmem:[#allocation2 + $0x2a] sm:$0x1] %vm164_vm7, %v477_v21  ;;  %v2586_v21 = vmul.f32 %v785_v48, %v784_v58 }
 0x100   : > { %459 = vst.msk [vmem:[#allocation2 + $0x29] sm:$0x1] %vm164_vm7, %v457_v22  ;;  %v2588_v22 = vmul.f32 %v1009_v57, %v1007_v56 }
 0x101   : > { %551 = vrot.lane.b32.xlu0 %v2336_v62, %s2181_s15 }
 0x102   : > { %3863 = sst [smem:[#allocation99_spill]] %s2716_s13  ;;  %s3875_s13 = sld [smem:[#allocation64_spill]] }
 0x103   : > { %v603_v23 = vld [vmem:[#allocation2 + $0x20] sm:$0xff]  ;;  %3883 = sst [smem:[#allocation64_spill]] %s2751_s23 }
 0x104   : > { %607 = vst.msk [vmem:[#allocation3 + $0xb0] sm:$0xff] %vm483_vm8, %v603_v23  ;;  %655 = vrot.lane.b32.xlu1 %v603_v23, %s3625_s14 }
 0x105   : > { %570 = vrot.lane.b32.xlu0 %v2336_v62, %s2183_s17 }
 0x107   : > { %v604_v24 = vld [vmem:[#allocation2 + $0x28] sm:$0x3f] }
 0x108   : > { %608 = vst.msk [vmem:[#allocation3 + $0xb8] sm:$0x3f] %vm486_vm9, %v604_v24  ;;  %674 = vrot.lane.b32.xlu1 %v603_v23, %s2181_s15  ;;  %v611_v30 = vld [vmem:[#allocation2 + $0x28] sm:$0x3f] }
 0x109   : > { %498 = vrot.lane.b32.xlu0 %v490_v26, %s2182_s16  ;;  %v687_v32 = vld [vmem:[#allocation2 + $0x28] sm:$0x3f]  ;;  %v2596_v26 = vmul.f32 %v841_v50, %v840_v1 }
 0x10a   : > { %v668_v35 = vld [vmem:[#allocation2 + $0x28] sm:$0x3f] }
 0x10b   : > { %v649_v36 = vld [vmem:[#allocation2 + $0x28] sm:$0x3f]  ;;  %v1175_v40 = vld [vmem:[#allocation3 + $0xa9] sm:$0xff] }
 0x10c   : > { %496 = vrot.lane.b32.xlu1 %v2348_v7, %s2182_s16  ;;  %v630_v37 = vld [vmem:[#allocation2 + $0x28] sm:$0x3f]  ;;  %v1287_v47 = vld [vmem:[#allocation3 + $0xab] sm:$0xff] }
 0x10d   : > { %515 = vrot.lane.b32.xlu0 %v2348_v7, %s2184_s18  ;;  %v706_v38 = vld [vmem:[#allocation2 + $0x28] sm:$0x3f]  ;;  %v1343_v54 = vld [vmem:[#allocation3 + $0xac] sm:$0xff] }
 0x110   : > { %553 = vrot.lane.b32.xlu1 %v2348_v7, %s2181_s15 }
 0x111   : > { %574 = vrot.lane.b32.xlu0 %v566_v27, %s2183_s17  ;;  %v2598_v27 = vmul.f32 %v897_v53, %v896_v2 }
 0x114   : > { %572 = vrot.lane.b32.xlu1 %v2348_v7, %s2183_s17 }
 0x115   : > { %591 = vrot.lane.b32.xlu0 %v2348_v7, %s2185_s19 }
 0x118   : > { %513 = vrot.lane.b32.xlu1 %v2336_v62, %s2184_s18 }
 0x119   : > { %532 = vrot.lane.b32.xlu0 %v2336_v62, %s3625_s14 }
 0x11c   : > { %517 = vrot.lane.b32.xlu1 %v509_v29, %s2184_s18  ;;  %v2602_v29 = vmul.f32 %v1009_v57, %v1008_v12  ;;  %v1176_v12 = vld [vmem:[#allocation3 + $0xb1] sm:$0xff] }
 0x11d   : > { %536 = vrot.lane.b32.xlu0 %v528_v28, %s3625_s14  ;;  %v2600_v28 = vmul.f32 %v953_v55, %v952_v11  ;;  %v1399_v55 = vld [vmem:[#allocation3 + $0xad] sm:$0xff] }
 0x11e   : > { %3817 = vst [vmem:[#allocation73_spill] sm:$0xff] %v2602_v29 }
 0x120   : > { %589 = vrot.lane.b32.xlu1 %v2336_v62, %s2185_s19  ;;  %v1177_v62 = vstv %s2443_s29  ;;  %s3866_s29 = sld [smem:[#allocation58_spill]] }
 0x121   : > { %615 = vrot.lane.b32.xlu0 %v2357_v13, %s2182_s16  ;;  %v2663_v11 = vmul.f32 %v1177_v62, %v1175_v40  ;;  %v1288_v40 = vld [vmem:[#allocation3 + $0xb3] sm:$0xff]  ;;  %3869 = sst [smem:[#allocation58_spill]] %s2729_s26  ;;  %s2743_s26 = sld [smem:[#allocation10 + $0x4b]] }
 0x122   : > { %s3902_s20 = sld [smem:[#allocation58_spill]] }
 0x123   : > { %3843 = vst [vmem:[#allocation85_spill] sm:$0xff] %v2663_v11 }
 0x124   : > { %593 = vrot.lane.b32.xlu1 %v585_v31, %s2185_s19 }
 0x125   : > { %619 = vrot.lane.b32.xlu0 %v611_v30, %s2182_s16 }
 0x127   : > { %3879 = sst [smem:[#allocation63_spill]] %s2743_s26  ;;  %s3898_s26 = sld [smem:[#allocation94_spill]] }
 0x128   : > { %534 = vrot.lane.b32.xlu1 %v2348_v7, %s3625_s14  ;;  %v1145_v7 = vstv %s2453_s10  ;;  %s2584_s10 = sld [smem:[#allocation10 + $0x29]] }
 0x129   : > { %636 = vrot.lane.b32.xlu0 %v603_v23, %s2184_s18 }
 0x12c   : > { %617 = vrot.lane.b32.xlu1 %v603_v23, %s2182_s16  ;;  %s2463_s16 = sld [smem:[#allocation10 + $0x3b]] }
 0x12d   : > { %691 = vrot.lane.b32.xlu0 %v2357_v13, %s2183_s17 }
 0x12e   : > { %3810 = sst [smem:[#allocation69_spill]] %s2584_s10  ;;  %s3819_s10 = sld [smem:[#allocation31_spill]] }
 0x130   : > { %555 = vrot.lane.b32.xlu1 %v547_v33, %s2181_s15  ;;  %v2615_v33 = vmul.f32 %v1065_v60, %v1064_v19  ;;  %v2675_v19 = vmul.f32 %v1289_v3, %v1287_v47  ;;  %v2706_v47 = vmul.f32 %v1177_v62, %v1176_v12 }
 0x131   : > { %695 = vrot.lane.b32.xlu0 %v687_v32, %s2183_s17  ;;  %v2613_v32 = vmul.f32 %v1121_v61, %v1119_v18  ;;  %v1232_v18 = vld [vmem:[#allocation3 + $0xb2] sm:$0xff] }
 0x132   : > { %3766 = sst [smem:[#allocation25_spill]] %s2463_s16  ;;  %v3749_v31 = vstv %s2463_s16  ;;  %3825 = vst [vmem:[#allocation77_spill] sm:$0xff] %v2615_v33  ;;  %3846 = vst [vmem:[#allocation88_spill] sm:$0xff] %v2675_v19 }
 0x133   : > { %3824 = vst [vmem:[#allocation76_spill] sm:$0xff] %v2613_v32  ;;  %s2623_s16 = sld [smem:[#allocation10 + $0x1f]]  ;;  %3857 = vst [vmem:[#allocation96_spill] sm:$0xff] %v2706_v47 }
 0x134   : > { %634 = vrot.lane.b32.xlu1 %v2357_v13, %s2184_s18  ;;  %v3738_v42 = vstv %s3819_s10  ;;  %s2690_s10 = sld [smem:[#allocation10 + $0x41]] }
 0x135   : > { %710 = vrot.lane.b32.xlu0 %v2357_v13, %s2185_s19  ;;  %v2569_v13 = vadd.f32 %v731_v52, %v724_v46  ;;  %v1231_v46 = vld [vmem:[#allocation3 + $0xaa] sm:$0xff] }
 0x138   : > { %676 = vrot.lane.b32.xlu1 %v668_v35, %s2181_s15  ;;  %s2461_s15 = sld [smem:[#allocation10 + $0x4]] }
 0x139   : > { %657 = vrot.lane.b32.xlu0 %v649_v36, %s3625_s14  ;;  %s2477_s14 = sld [smem:[#allocation10 + $0x3c]]  ;;  %3830 = sst [smem:[#allocation79_spill]] %s2623_s16 }
 0x13a   : > { %3852 = sst [smem:[#allocation92_spill]] %s2690_s10  ;;  %s3936_s16 = sld [smem:[#allocation36_spill]] }
 0x13c   : > { %693 = vrot.lane.b32.xlu1 %v603_v23, %s2183_s17  ;;  %s2465_s17 = sld [smem:[#allocation10 + $0x42]] }
 0x13e   : > { %3765 = sst [smem:[#allocation24_spill]] %s2461_s15  ;;  %v761_v30 = vstv %s2461_s15  ;;  %s2649_s15 = sld [smem:[#allocation10 + $0x47]] }
 0x13f   : > { %3773 = sst [smem:[#allocation32_spill]] %s2477_s14  ;;  %s2497_s14 = sld [smem:[#allocation10 + $0x2b]] }
 0x140   : > { %638 = vrot.lane.b32.xlu1 %v630_v37, %s2184_s18  ;;  %s2467_s18 = sld [smem:[#allocation10 + $0x49]] }
 0x142   : > { %3767 = sst [smem:[#allocation26_spill]] %s2465_s17 }
 0x143   : > { %s2487_s17 = sld [smem:[#allocation10 + $0x8]] }
 0x144   : > { %712 = vrot.lane.b32.xlu1 %v603_v23, %s2185_s19  ;;  %s3811_s24 = sld [smem:[#allocation26_spill]]  ;;  %v2590_v23 = vmul.f32 %v1065_v60, %v1063_v59  ;;  %3838 = sst [smem:[#allocation83_spill]] %s2649_s15  ;;  %v1455_v60 = vld [vmem:[#allocation3 + $0xae] sm:$0xff] }
 0x145   : > { %3783 = sst [smem:[#allocation42_spill]] %s2497_s14  ;;  %s2667_s14 = sld [smem:[#allocation10 + $0x36]] }
 0x146   : > { %3768 = sst [smem:[#allocation27_spill]] %s2467_s18  ;;  %3812 = vst [vmem:[#allocation70_spill] sm:$0xff] %v2590_v23  ;;  %s2631_s18 = sld [smem:[#allocation10 + $0x2d]] }
 0x147   : > { %s3914_s4 = sld [smem:[#allocation27_spill]] }
 0x148   : > { %714 = vrot.lane.b32.xlu1 %v706_v38, %s2185_s19  ;;  %s2469_s19 = sld [smem:[#allocation10 + $0x50]]  ;;  %s3930_s15 = sld [smem:[#allocation35_spill]] }
 0x149   : > { %3778 = sst [smem:[#allocation37_spill]] %s2487_s17  ;;  %s2507_s17 = sld [smem:[#allocation10 + $0x20]] }
 0x14a   : > { %v3752_v35 = vstv %s3811_s24  ;;  %s2688_s24 = sld [smem:[#allocation10 + $0x3a]]  ;;  %s3916_s11 = sld [smem:[#allocation37_spill]] }
 0x14b   : > { %3844 = sst [smem:[#allocation86_spill]] %s2667_s14  ;;  %s3926_s14 = sld [smem:[#allocation33_spill]] }
 0x14c   : > { %3833 = sst [smem:[#allocation81_spill]] %s2631_s18  ;;  %s3894_s9 = sld [smem:[#allocation86_spill]] }
 0x14d   : > { %3896 = sst [smem:[#allocation86_spill]] %s2785_s21  ;;  %s3956_s18 = sld [smem:[#allocation42_spill]] }
 0x14e   : > { %3769 = sst [smem:[#allocation28_spill]] %s2469_s19  ;;  %s2489_s19 = sld [smem:[#allocation10 + $0xf]] }
 0x14f   : > { %3788 = sst [smem:[#allocation47_spill]] %s2507_s17  ;;  %s2523_s17 = sld [smem:[#allocation10 + $0x28]] }
 0x150   : > { %3851 = sst [smem:[#allocation91_spill]] %s2688_s24  ;;  %s2714_s24 = sld [smem:[#allocation10 + $0x56]] }
 0x151   : > { %s3895_s10 = sld [smem:[#allocation91_spill]]  ;;  %s3915_s5 = sld [smem:[#allocation28_spill]] }
 0x152   : > { %s3923_s21 = sld [smem:[#allocation32_spill]] }
 0x154   : > { %3779 = sst [smem:[#allocation38_spill]] %s2489_s19  ;;  %s2659_s19 = sld [smem:[#allocation10 + $0x55]] }
 0x155   : > { %3795 = sst [smem:[#allocation54_spill]] %s2523_s17  ;;  %s2537_s17 = sld [smem:[#allocation10 + $0x17]] }
 0x156   : > { %3862 = sst [smem:[#allocation98_spill]] %s2714_s24  ;;  %s2777_s24 = sld [smem:[#allocation10 + $0x5a]] }
 0x157   : > { %s3999_s23 = sld [smem:[#allocation54_spill]] }
 0x15b   : > { %3800 = sst [smem:[#allocation59_spill]] %s2537_s17  ;;  %s2621_s17 = sld [smem:[#allocation10 + $0x18]] }
 0x15c   : > { %s3867_s30 = sld [smem:[#allocation59_spill]]  ;;  %3893 = sst [smem:[#allocation109_spill]] %s2777_s24 }
 0x15d   : > { %3871 = sst [smem:[#allocation59_spill]] %s2731_s27  ;;  %s3910_s27 = sld [smem:[#allocation23_spill]] }
 0x15e   : > { %s3917_s24 = sld [smem:[#allocation29_spill]] }
 0x161   : > { %3828 = sst [smem:[#allocation78_spill]] %s2621_s17  ;;  %s3909_s17 = sld [smem:[#allocation22_spill]] }
 0x164   : > { %v3931_v25 = vstv %s3917_s24  ;;  %s3949_s24 = sld [smem:[#allocation40_spill]] }
 0x167   : > { %v654_v39 = vpop.permute.xlu0 %653 }
 0x168   : > { %663 = vst.msk [vmem:[#allocation3 + $0xf0] sm:$0xff] %vm483_vm8, %v654_v39  ;;  %v1120_v39 = vld [vmem:[#allocation3 + $0xb0] sm:$0xff] }
 0x169   : > { %v2655_v2 = vmul.f32 %v1121_v61, %v1120_v39  ;;  %v2671_v61 = vmul.f32 %v1233_v63, %v1231_v46  ;;  %v2683_v39 = vmul.f32 %v1401_v5, %v1399_v55  ;;  %v2694_v55 = vmul.f32 %v3693_v6, %v1455_v60 }
 0x16a   : > { %v2710_v60 = vmul.f32 %v1233_v63, %v1232_v18 }
 0x16b   : > { %v673_v43 = vpop.permute.xlu0 %672  ;;  %3839 = vst [vmem:[#allocation84_spill] sm:$0xff] %v2655_v2  ;;  %3845 = vst [vmem:[#allocation87_spill] sm:$0xff] %v2671_v61  ;;  %v3994_v61 = vstv %s3874_s8 }
 0x16c   : > { %682 = vst.msk [vmem:[#allocation3 + $0x108] sm:$0xff] %vm483_vm8, %v673_v43  ;;  %3850 = vst [vmem:[#allocation90_spill] sm:$0xff] %v2683_v39 }
 0x16d   : > { %3854 = vst [vmem:[#allocation93_spill] sm:$0xff] %v2694_v55  ;;  %3859 = vst [vmem:[#allocation97_spill] sm:$0xff] %v2710_v60  ;;  %v3938_v55 = vstv %s3923_s21 }
 0x16f   : > { %v495_v0 = vpop.permute.xlu0 %494  ;;  %v1143_v63 = vld [vmem:[#allocation3 + $0xf0] sm:$0xff] }
 0x170   : > { %504 = vst.msk [vmem:[#allocation3 + $0x18] sm:$0xff] %vm483_vm8, %v495_v0  ;;  %v2821_v58 = vmul.f32 %v1145_v7, %v1143_v63 }
 0x173   : > { %v552_v24 = vpop.permute.xlu0 %551 }
 0x174   : > { %561 = vst.msk [vmem:[#allocation3 + $0x60] sm:$0xff] %vm483_vm8, %v552_v24  ;;  %v2679_v24 = vmul.f32 %v1345_v4, %v1343_v54  ;;  %v1400_v54 = vld [vmem:[#allocation3 + $0xb5] sm:$0xff] }
 0x175   : > { %v2735_v18 = vmul.f32 %v1401_v5, %v1400_v54  ;;  %v1151_v5 = vld [vmem:[#allocation3 + $0x108] sm:$0xff] }
 0x176   : > { %v656_v48 = vpop.permute.xlu1 %655  ;;  %3848 = vst [vmem:[#allocation89_spill] sm:$0xff] %v2679_v24  ;;  %v2825_v44 = vmul.f32 %v3744_v8, %v1151_v5 }
 0x177   : > { %v571_v49 = vpop.permute.xlu0 %570  ;;  %664 = vst.msk [vmem:[#allocation3 + $0xf8] sm:$0xff] %vm483_vm8, %v656_v48  ;;  %v1344_v48 = vld [vmem:[#allocation3 + $0xb4] sm:$0xff]  ;;  %3872 = vst [vmem:[#allocation102_spill] sm:$0xff] %v2735_v18 }
 0x178   : > { %580 = vst.msk [vmem:[#allocation3 + $0x78] sm:$0xff] %vm483_vm8, %v571_v49  ;;  %v2724_v1 = vmul.f32 %v1345_v4, %v1344_v48  ;;  %3913 = vst [vmem:[#allocation110_spill] sm:$0xff] %v2825_v44 }
 0x17a   : > { %v675_v49 = vpop.permute.xlu1 %674  ;;  %3865 = vst [vmem:[#allocation101_spill] sm:$0xff] %v2724_v1 }
 0x17b   : > { %v499_v15 = vpop.permute.xlu0 %498  ;;  %683 = vst.msk [vmem:[#allocation3 + $0x110] sm:$0xff] %vm483_vm8, %v675_v49  ;;  %v759_v46 = vld [vmem:[#allocation3 + $0x60] sm:$0xff] }
 0x17c   : > { %506 = vst.msk [vmem:[#allocation3 + $0x28] sm:$0x3f] %vm486_vm9, %v499_v15  ;;  %v2720_v15 = vmul.f32 %v1289_v3, %v1288_v40  ;;  %v735_v40 = vld [vmem:[#allocation3 + $0x18] sm:$0xff] }
 0x17e   : > { %3864 = vst [vmem:[#allocation100_spill] sm:$0xff] %v2720_v15  ;;  %v497_v6 = vpop.permute.xlu1 %496  ;;  %v1144_v0 = vld [vmem:[#allocation3 + $0xf8] sm:$0xff] }
 0x17f   : > { %v516_v3 = vpop.permute.xlu0 %515  ;;  %505 = vst.msk [vmem:[#allocation3 + $0x20] sm:$0xff] %vm483_vm8, %v497_v6  ;;  %v767_v49 = vld [vmem:[#allocation3 + $0x78] sm:$0xff]  ;;  %v762_v6 = vmul.f32 %v761_v30, %v759_v46  ;;  %v2835_v5 = vmul.f32 %v1145_v7, %v1144_v0  ;;  %v3928_v0 = vstv %s3916_s11 }
 0x180   : > { %524 = vst.msk [vmem:[#allocation3 + $0x38] sm:$0xff] %vm483_vm8, %v516_v3  ;;  %v1255_v62 = vld [vmem:[#allocation3 + $0xf2] sm:$0xff]  ;;  %v770_v46 = vmul.f32 %v3738_v42, %v767_v49  ;;  %v738_v49 = vmul.f32 %v3743_v20, %v735_v40 }
 0x181   : > { %v1311_v57 = vld [vmem:[#allocation3 + $0xf3] sm:$0xff]  ;;  %v764_v63 = vadd.f32 %v762_v6, %v2561_v9  ;;  %3919 = vst [vmem:[#allocation111_spill] sm:$0xff] %v2835_v5  ;;  %v3925_v9 = vstv %s3915_s5  ;;  %s3977_s5 = sld [smem:[#allocation47_spill]] }
 0x182   : > { %v554_v12 = vpop.permute.xlu1 %553  ;;  %v1367_v56 = vld [vmem:[#allocation3 + $0xf4] sm:$0xff]  ;;  %v1207_v43 = vld [vmem:[#allocation3 + $0x109] sm:$0xff] }
 0x183   : > { %v575_v48 = vpop.permute.xlu0 %574  ;;  %562 = vst.msk [vmem:[#allocation3 + $0x68] sm:$0xff] %vm483_vm8, %v554_v12  ;;  %v1199_v12 = vld [vmem:[#allocation3 + $0xf1] sm:$0xff]  ;;  %v2853_v7 = vmul.f32 %v3925_v9, %v1367_v56  ;;  %v2873_v18 = vmul.f32 %v3938_v55, %v1207_v43  ;;  %v3948_v43 = vstv %s3936_s16  ;;  %v3951_v55 = vstv %s3910_s27  ;;  %s3970_s27 = sld [smem:[#allocation44_spill]]  ;;  %s4001_s16 = sld [smem:[#allocation55_spill]] }
 0x184   : > { %582 = vst.msk [vmem:[#allocation3 + $0x88] sm:$0x3f] %vm486_vm9, %v575_v48  ;;  %v1423_v50 = vld [vmem:[#allocation3 + $0xf5] sm:$0xff]  ;;  %v1263_v41 = vld [vmem:[#allocation3 + $0x10a] sm:$0xff]  ;;  %v2839_v40 = vmul.f32 %v3749_v31, %v1199_v12 }
 0x185   : > { %v1152_v48 = vld [vmem:[#allocation3 + $0x110] sm:$0xff]  ;;  %3927 = vst [vmem:[#allocation115_spill] sm:$0xff] %v2853_v7  ;;  %3939 = vst [vmem:[#allocation119_spill] sm:$0xff] %v2873_v18 }
 0x186   : > { %v573_v54 = vpop.permute.xlu1 %572  ;;  %v791_v51 = vld [vmem:[#allocation3 + $0x19] sm:$0xff]  ;;  %v1319_v3 = vld [vmem:[#allocation3 + $0x10b] sm:$0xff]  ;;  %3920 = vst [vmem:[#allocation112_spill] sm:$0xff] %v2839_v40  ;;  %v792_v53 = vld [vmem:[#allocation3 + $0x21] sm:$0xff] }
 0x187   : > { %v592_v4 = vpop.permute.xlu0 %591  ;;  %581 = vst.msk [vmem:[#allocation3 + $0x80] sm:$0xff] %vm483_vm8, %v573_v54  ;;  %v1375_v59 = vld [vmem:[#allocation3 + $0x10c] sm:$0xff]  ;;  %v736_v37 = vld [vmem:[#allocation3 + $0x20] sm:$0xff]  ;;  %v794_v6 = vmul.f32 %v3928_v0, %v791_v51 }
 0x188   : > { %600 = vst.msk [vmem:[#allocation3 + $0x98] sm:$0xff] %vm483_vm8, %v592_v4  ;;  %v1479_v4 = vld [vmem:[#allocation3 + $0xf6] sm:$0xff]  ;;  %v1431_v42 = vld [vmem:[#allocation3 + $0x10d] sm:$0xff]  ;;  %v848_v12 = vld [vmem:[#allocation3 + $0x22] sm:$0xff] }
 0x189   : > { %v847_v20 = vld [vmem:[#allocation3 + $0x1a] sm:$0xff]  ;;  %v904_v45 = vld [vmem:[#allocation3 + $0x23] sm:$0xff]  ;;  %v796_v15 = vadd.f32 %v794_v6, %v764_v63  ;;  %v3961_v63 = vstv %s3949_s24  ;;  %s3973_s24 = sld [smem:[#allocation45_spill]] }
 0x18a   : > { %v760_v52 = vld [vmem:[#allocation3 + $0x68] sm:$0xff]  ;;  %v514_v54 = vpop.permute.xlu1 %513  ;;  %v903_v31 = vld [vmem:[#allocation3 + $0x1b] sm:$0xff] }
 0x18b   : > { %v533_v38 = vpop.permute.xlu0 %532  ;;  %523 = vst.msk [vmem:[#allocation3 + $0x30] sm:$0xff] %vm483_vm8, %v514_v54  ;;  %v763_v8 = vmul.f32 %v761_v30, %v760_v52  ;;  %v2845_v54 = vmul.f32 %v3752_v35, %v1255_v62  ;;  %v2859_v30 = vmul.f32 %v3931_v25, %v1423_v50  ;;  %v3933_v52 = vstv %s3918_s0  ;;  %v959_v56 = vld [vmem:[#allocation3 + $0x1c] sm:$0xff]  ;;  %v960_v51 = vld [vmem:[#allocation3 + $0x24] sm:$0xff]  ;;  %s3943_s0 = sld [smem:[#allocation38_spill]] }
 0x18c   : > { %542 = vst.msk [vmem:[#allocation3 + $0x48] sm:$0xff] %vm483_vm8, %v533_v38  ;;  %v3922_v38 = vstv %s3914_s4  ;;  %v2863_v62 = vmul.f32 %v3933_v52, %v1479_v4  ;;  %v2865_v35 = vadd.f32 %v770_v46, %v738_v49  ;;  %v1015_v9 = vld [vmem:[#allocation3 + $0x1d] sm:$0xff]  ;;  %v3940_v25 = vstv %s3926_s14  ;;  %v1016_v52 = vld [vmem:[#allocation3 + $0x25] sm:$0xff]  ;;  %s3980_s4 = sld [smem:[#allocation49_spill]] }
 0x18d   : > { %3921 = vst [vmem:[#allocation113_spill] sm:$0xff] %v2845_v54  ;;  %v2849_v36 = vmul.f32 %v3922_v38, %v1311_v57  ;;  %3932 = vst [vmem:[#allocation116_spill] sm:$0xff] %v2859_v30  ;;  %v3935_v57 = vstv %s3909_s17  ;;  %v2877_v50 = vmul.f32 %v3940_v25, %v1263_v41  ;;  %v3942_v4 = vstv %s3929_s6  ;;  %s3947_s17 = sld [smem:[#allocation39_spill]]  ;;  %v815_v30 = vld [vmem:[#allocation3 + $0x61] sm:$0xff] }
 0x18e   : > { %3934 = vst [vmem:[#allocation117_spill] sm:$0xff] %v2863_v62  ;;  %v2869_v38 = vmul.f32 %v3935_v57, %v1152_v48  ;;  %v518_v0 = vpop.permute.xlu1 %517  ;;  %v2881_v46 = vmul.f32 %v3942_v4, %v1319_v3  ;;  %v3945_v49 = vstv %s3930_s15  ;;  %v1071_v57 = vld [vmem:[#allocation3 + $0x1e] sm:$0xff]  ;;  %v1072_v62 = vld [vmem:[#allocation3 + $0x26] sm:$0xff]  ;;  %v2891_v41 = vmul.f32 %v3948_v43, %v1431_v42 }
 0x18f   : > { %3924 = vst [vmem:[#allocation114_spill] sm:$0xff] %v2849_v36  ;;  %v537_v34 = vpop.permute.xlu0 %536  ;;  %3941 = vst [vmem:[#allocation120_spill] sm:$0xff] %v2877_v50  ;;  %v2885_v48 = vmul.f32 %v3945_v49, %v1375_v59  ;;  %v739_v3 = vmul.f32 %v3951_v55, %v736_v37  ;;  %v3952_v25 = vstv %s3916_s11  ;;  %v744_v4 = vld [vmem:[#allocation3 + $0x38] sm:$0xff]  ;;  %v765_v49 = vadd.f32 %v763_v8, %v2569_v13  ;;  %v768_v1 = vld [vmem:[#allocation3 + $0x80] sm:$0xff]  ;;  %s3966_s11 = sld [smem:[#allocation50_spill]] }
 0x190   : > { %3937 = vst [vmem:[#allocation118_spill] sm:$0xff] %v2869_v38  ;;  %3944 = vst [vmem:[#allocation121_spill] sm:$0xff] %v2881_v46  ;;  %v795_v59 = vmul.f32 %v3952_v25, %v792_v53  ;;  %v871_v55 = vld [vmem:[#allocation3 + $0x62] sm:$0xff]  ;;  %v823_v53 = vld [vmem:[#allocation3 + $0x79] sm:$0xff]  ;;  %v2916_v6 = vmul.f32 %v3961_v63, %v959_v56  ;;  %v3985_v50 = vstv %s3973_s24 }
 0x191   : > { %3946 = vst [vmem:[#allocation122_spill] sm:$0xff] %v2885_v48  ;;  %525 = vst.msk [vmem:[#allocation3 + $0x40] sm:$0x3f] %vm486_vm9, %v518_v0  ;;  %v3954_v0 = vstv %s3943_s0  ;;  %v824_v25 = vld [vmem:[#allocation3 + $0x81] sm:$0xff]  ;;  %s3965_s0 = sld [smem:[#allocation43_spill]] }
 0x192   : > { %544 = vst.msk [vmem:[#allocation3 + $0x58] sm:$0x3f] %vm486_vm9, %v537_v34  ;;  %3950 = vst [vmem:[#allocation123_spill] sm:$0xff] %v2891_v41  ;;  %v2900_v48 = vmul.f32 %v3954_v0, %v847_v20  ;;  %v3955_v34 = vmov %v3954_v0  ;;  %v3962_v20 = vmov %v3961_v63  ;;  %v3964_v41 = vstv %s3953_s12  ;;  %v590_v46 = vpop.permute.xlu1 %589  ;;  %v879_v60 = vld [vmem:[#allocation3 + $0x7a] sm:$0xff]  ;;  %v880_v19 = vld [vmem:[#allocation3 + $0x82] sm:$0xff]  ;;  %s3978_s12 = sld [smem:[#allocation48_spill]] }
 0x193   : > { %v2904_v42 = vmul.f32 %v3955_v34, %v848_v12  ;;  %v3958_v43 = vstv %s3947_s17  ;;  %v2920_v0 = vmul.f32 %v3962_v20, %v960_v51  ;;  %v2924_v12 = vmul.f32 %v3964_v41, %v1015_v9  ;;  %v927_v34 = vld [vmem:[#allocation3 + $0x63] sm:$0xff]  ;;  %v616_v39 = vpop.permute.xlu0 %615  ;;  %s3975_s17 = sld [smem:[#allocation46_spill]]  ;;  %599 = vst.msk [vmem:[#allocation3 + $0x90] sm:$0xff] %vm483_vm8, %v590_v46  ;;  %v935_v36 = vld [vmem:[#allocation3 + $0x7b] sm:$0xff]  ;;  %v799_v5 = vld [vmem:[#allocation3 + $0x31] sm:$0xff] }
 0x194   : > { %v2908_v37 = vmul.f32 %v3958_v43, %v903_v31  ;;  %v3959_v8 = vmov %v3958_v43  ;;  %v983_v31 = vld [vmem:[#allocation3 + $0x64] sm:$0xff]  ;;  %v3967_v24 = vmov %v3964_v41  ;;  %v3976_v41 = vstv %s3907_s25  ;;  %625 = vst.msk [vmem:[#allocation3 + $0xc0] sm:$0xff] %vm483_vm8, %v616_v39  ;;  %s3989_s25 = sld [smem:[#allocation56_spill]]  ;;  %v855_v33 = vld [vmem:[#allocation3 + $0x32] sm:$0xff] }
 0x195   : > { %3957 = vst [vmem:[#allocation124_spill] sm:$0xff] %v2904_v42  ;;  %v2912_v13 = vmul.f32 %v3959_v8, %v904_v45  ;;  %3963 = vst [vmem:[#allocation126_spill] sm:$0xff] %v2920_v0  ;;  %v1039_v43 = vld [vmem:[#allocation3 + $0x65] sm:$0xff]  ;;  %v2928_v45 = vmul.f32 %v3967_v24, %v1016_v52  ;;  %v3969_v8 = vstv %s3956_s18  ;;  %v771_v20 = vmul.f32 %v3976_v41, %v768_v1  ;;  %v776_v1 = vld [vmem:[#allocation3 + $0x98] sm:$0xff]  ;;  %s3988_s18 = sld [smem:[#allocation52_spill]] }
 0x196   : > { %v2932_v56 = vmul.f32 %v3969_v8, %v1071_v57  ;;  %v3972_v51 = vmov %v3969_v8  ;;  %v1095_v9 = vld [vmem:[#allocation3 + $0x66] sm:$0xff]  ;;  %v797_v57 = vadd.f32 %v795_v59, %v765_v49  ;;  %v3982_v8 = vstv %s3966_s11  ;;  %v991_v49 = vld [vmem:[#allocation3 + $0x7c] sm:$0xff]  ;;  %s3996_s11 = sld [smem:[#allocation53_spill]] }
 0x197   : > { %3960 = vst [vmem:[#allocation125_spill] sm:$0xff] %v2912_v13  ;;  %3968 = vst [vmem:[#allocation127_spill] sm:$0xff] %v2928_v45  ;;  %v2936_v63 = vmul.f32 %v3972_v51, %v1072_v62  ;;  %v3979_v24 = vstv %s3965_s0  ;;  %v826_v62 = vmul.f32 %v3982_v8, %v823_v53  ;;  %v3983_v51 = vmov %v3982_v8  ;;  %v936_v54 = vld [vmem:[#allocation3 + $0x83] sm:$0xff] }
 0x198   : > { %3971 = vst [vmem:[#allocation128_spill] sm:$0xff] %v2932_v56  ;;  %v747_v52 = vmul.f32 %v3979_v24, %v744_v4  ;;  %v827_v7 = vmul.f32 %v3983_v51, %v824_v25  ;;  %v3984_v41 = vstv %s3970_s27  ;;  %v2952_v46 = vmul.f32 %v3985_v50, %v871_v55  ;;  %v992_v53 = vld [vmem:[#allocation3 + $0x84] sm:$0xff] }
 0x199   : > { %3974 = vst [vmem:[#allocation129_spill] sm:$0xff] %v2936_v63  ;;  %v818_v38 = vmul.f32 %v3984_v41, %v815_v30  ;;  %v3986_v2 = vstv %s3975_s17  ;;  %v3987_v4 = vstv %s3977_s5  ;;  %v751_v25 = vld [vmem:[#allocation3 + $0x48] sm:$0xff]  ;;  %v3990_v24 = vstv %s3978_s12  ;;  %v1047_v41 = vld [vmem:[#allocation3 + $0x7d] sm:$0xff]  ;;  %v620_v63 = vpop.permute.xlu0 %619 }
 0x19a   : > { %v2956_v39 = vmul.f32 %v3986_v2, %v927_v34  ;;  %v2960_v59 = vmul.f32 %v3987_v4, %v983_v31  ;;  %v2964_v8 = vmul.f32 %v3990_v24, %v1039_v43  ;;  %v3991_v51 = vstv %s3980_s4  ;;  %v1048_v2 = vld [vmem:[#allocation3 + $0x85] sm:$0xff]  ;;  %v594_v4 = vpop.permute.xlu1 %593  ;;  %627 = vst.msk [vmem:[#allocation3 + $0xd0] sm:$0x3f] %vm486_vm9, %v620_v63  ;;  %v887_v56 = vld [vmem:[#allocation3 + $0x92] sm:$0xff] }
 0x19b   : > { %v2968_v30 = vmul.f32 %v3991_v51, %v1095_v9  ;;  %v3993_v50 = vstv %s3981_s7  ;;  %v1103_v34 = vld [vmem:[#allocation3 + $0x7e] sm:$0xff]  ;;  %v754_v31 = vmul.f32 %v3994_v61, %v751_v25  ;;  %v2976_v47 = vadd.f32 %v771_v20, %v739_v3  ;;  %601 = vst.msk [vmem:[#allocation3 + $0xa0] sm:$0x3f] %vm486_vm9, %v594_v4  ;;  %s4002_s7 = sld [smem:[#allocation57_spill]]  ;;  %v911_v20 = vld [vmem:[#allocation3 + $0x33] sm:$0xff] }
 0x19c   : > { %v2972_v55 = vmul.f32 %v3993_v50, %v879_v60  ;;  %v3995_v40 = vmov %v3993_v50  ;;  %v3998_v24 = vstv %s3988_s18  ;;  %v1104_v60 = vld [vmem:[#allocation3 + $0x86] sm:$0xff]  ;;  %v4000_v51 = vstv %s3989_s25  ;;  %v967_v25 = vld [vmem:[#allocation3 + $0x34] sm:$0xff]  ;;  %s4020_s18 = sld [smem:[#allocation66_spill]] }
 0x19d   : > { %3992 = vst [vmem:[#allocation130_spill] sm:$0xff] %v2968_v30  ;;  %v2980_v43 = vmul.f32 %v3995_v40, %v880_v19  ;;  %v2984_v9 = vmul.f32 %v3998_v24, %v935_v36  ;;  %v779_v50 = vmul.f32 %v4000_v51, %v776_v1  ;;  %v828_v61 = vadd.f32 %v826_v62, %v796_v15  ;;  %v743_v36 = vld [vmem:[#allocation3 + $0x30] sm:$0xff]  ;;  %v856_v62 = vld [vmem:[#allocation3 + $0x3a] sm:$0xff] }
 0x19e   : > { %v829_v19 = vadd.f32 %v827_v7, %v797_v57  ;;  %v4003_v40 = vmov %v3998_v24  ;;  %v788_v24 = vadd.f32 %v2563_v10, %v754_v31  ;;  %v4005_v1 = vstv %s3996_s11  ;;  %v800_v57 = vld [vmem:[#allocation3 + $0x39] sm:$0xff]  ;;  %s4041_s11 = sld [smem:[#allocation71_spill]] }
 0x19f   : > { %3997 = vst [vmem:[#allocation131_spill] sm:$0xff] %v2980_v43  ;;  %v2992_v3 = vmul.f32 %v4003_v40, %v936_v54  ;;  %v2997_v51 = vmul.f32 %v4005_v1, %v991_v49  ;;  %v4006_v29 = vmov %v4005_v1  ;;  %v4008_v63 = vstv %s3999_s23  ;;  %v1023_v54 = vld [vmem:[#allocation3 + $0x35] sm:$0xff]  ;;  %s4016_s23 = sld [smem:[#allocation61_spill]] }
 0x1a0   : > { %v3001_v4 = vmul.f32 %v4006_v29, %v992_v53  ;;  %v3005_v18 = vmul.f32 %v4008_v63, %v1047_v41  ;;  %v4009_v15 = vmov %v4008_v63  ;;  %v4011_v40 = vstv %s4001_s16  ;;  %v775_v41 = vld [vmem:[#allocation3 + $0x90] sm:$0xff]  ;;  %s4022_s16 = sld [smem:[#allocation62_spill]] }
 0x1a1   : > { %4004 = vst [vmem:[#allocation132_spill] sm:$0xff] %v2992_v3  ;;  %v3009_v7 = vmul.f32 %v4009_v15, %v1048_v2  ;;  %v3013_v10 = vmul.f32 %v4011_v40, %v1103_v34  ;;  %v4013_v49 = vstv %s4002_s7  ;;  %v4014_v1 = vstv %s3866_s29  ;;  %v831_v63 = vld [vmem:[#allocation3 + $0x91] sm:$0xff]  ;;  %v535_v2 = vpop.permute.xlu1 %534  ;;  %v637_v15 = vpop.permute.xlu0 %636 }
 0x1a2   : > { %4007 = vst [vmem:[#allocation133_spill] sm:$0xff] %v3001_v4  ;;  %v802_v31 = vmul.f32 %v4013_v49, %v799_v5  ;;  %v858_v29 = vmul.f32 %v4014_v1, %v855_v33  ;;  %v820_v53 = vadd.f32 %v818_v38, %v788_v24  ;;  %v3023_v34 = vadd.f32 %v779_v50, %v747_v52  ;;  %v1079_v38 = vld [vmem:[#allocation3 + $0x36] sm:$0xff] }
 0x1a3   : > { %4010 = vst [vmem:[#allocation134_spill] sm:$0xff] %v3009_v7  ;;  %4012 = vst [vmem:[#allocation135_spill] sm:$0xff] %v3013_v10  ;;  %v4015_v7 = vmov %v4011_v40  ;;  %v4018_v40 = vstv %s3965_s0  ;;  %v4019_v49 = vstv %s3867_s30  ;;  %v912_v24 = vld [vmem:[#allocation3 + $0x3b] sm:$0xff]  ;;  %v4021_v1 = vstv %s3868_s28  ;;  %s4031_s0 = sld [smem:[#allocation68_spill]] }
 0x1a4   : > { %v3021_v4 = vmul.f32 %v4015_v7, %v1104_v60  ;;  %v746_v5 = vmul.f32 %v4018_v40, %v743_v36  ;;  %v914_v33 = vmul.f32 %v4019_v49, %v911_v20  ;;  %543 = vst.msk [vmem:[#allocation3 + $0x50] sm:$0xff] %vm483_vm8, %v535_v2  ;;  %645 = vst.msk [vmem:[#allocation3 + $0xe0] sm:$0xff] %vm483_vm8, %v637_v15  ;;  %v4023_v52 = vstv %s4002_s7  ;;  %v968_v36 = vld [vmem:[#allocation3 + $0x3c] sm:$0xff]  ;;  %s4051_s7 = sld [smem:[#allocation75_spill]] }
 0x1a5   : > { %v3033_v10 = vmul.f32 %v4021_v1, %v967_v25  ;;  %v852_v60 = vadd.f32 %v2900_v48, %v820_v53  ;;  %v803_v50 = vmul.f32 %v4023_v52, %v800_v57  ;;  %v4024_v7 = vstv %s3866_s29  ;;  %v1024_v40 = vld [vmem:[#allocation3 + $0x3d] sm:$0xff]  ;;  %v943_v53 = vld [vmem:[#allocation3 + $0x93] sm:$0xff]  ;;  %s4030_s29 = sld [smem:[#allocation67_spill]]  ;;  %v692_v0 = vpop.permute.xlu0 %691 }
 0x1a6   : > { %4017 = vst [vmem:[#allocation136_spill] sm:$0xff] %v3021_v4  ;;  %v859_v4 = vmul.f32 %v4024_v7, %v856_v62  ;;  %v1080_v20 = vld [vmem:[#allocation3 + $0x3e] sm:$0xff]  ;;  %v4025_v49 = vstv %s4016_s23  ;;  %v4026_v15 = vstv %s3989_s25  ;;  %v4027_v25 = vstv %s3875_s13  ;;  %v999_v57 = vld [vmem:[#allocation3 + $0x94] sm:$0xff]  ;;  %s4040_s25 = sld [smem:[#allocation69_spill]]  ;;  %701 = vst.msk [vmem:[#allocation3 + $0x120] sm:$0xff] %vm483_vm8, %v692_v0 }
 0x1a7   : > { %v3042_v2 = vmul.f32 %v4025_v49, %v1023_v54  ;;  %v778_v44 = vmul.f32 %v4026_v15, %v775_v41  ;;  %v834_v1 = vmul.f32 %v4027_v25, %v831_v63  ;;  %v4028_v45 = vstv %s4020_s18  ;;  %v1055_v54 = vld [vmem:[#allocation3 + $0x95] sm:$0xff]  ;;  %v618_v49 = vpop.permute.xlu1 %617 }
 0x1a8   : > { %v890_v48 = vmul.f32 %v4028_v45, %v887_v56  ;;  %v804_v62 = vadd.f32 %v802_v31, %v2865_v35  ;;  %v860_v52 = vadd.f32 %v858_v29, %v828_v61  ;;  %v4029_v7 = vstv %s4022_s16  ;;  %v1111_v31 = vld [vmem:[#allocation3 + $0x96] sm:$0xff]  ;;  %v1127_v29 = vld [vmem:[#allocation3 + $0xc0] sm:$0xff]  ;;  %626 = vst.msk [vmem:[#allocation3 + $0xc8] sm:$0xff] %vm483_vm8, %v618_v49  ;;  %s4074_s16 = sld [smem:[#allocation82_spill]] }
 0x1a9   : > { %v3053_v3 = vmul.f32 %v4029_v7, %v1079_v38  ;;  %v884_v30 = vadd.f32 %v2972_v55, %v852_v60  ;;  %v4032_v41 = vstv %s3867_s30  ;;  %v4034_v63 = vstv %s3868_s28  ;;  %v832_v55 = vld [vmem:[#allocation3 + $0x99] sm:$0xff]  ;;  %s4042_s30 = sld [smem:[#allocation72_spill]]  ;;  %s4045_s28 = sld [smem:[#allocation74_spill]] }
 0x1aa   : > { %v3058_v15 = vmul.f32 %v4032_v41, %v912_v24  ;;  %v3062_v45 = vmul.f32 %v4034_v63, %v968_v36  ;;  %v4036_v56 = vstv %s4016_s23  ;;  %v4038_v35 = vmov %v4029_v7  ;;  %v944_v41 = vld [vmem:[#allocation3 + $0x9b] sm:$0xff]  ;;  %s4052_s23 = sld [smem:[#allocation78_spill]] }
 0x1ab   : > { %v3066_v25 = vmul.f32 %v4036_v56, %v1024_v40  ;;  %v3070_v61 = vmul.f32 %v4038_v35, %v1080_v20  ;;  %v805_v38 = vadd.f32 %v803_v50, %v2976_v47  ;;  %v861_v24 = vadd.f32 %v859_v4, %v829_v19  ;;  %v888_v20 = vld [vmem:[#allocation3 + $0x9a] sm:$0xff] }
 0x1ac   : > { %4033 = vst [vmem:[#allocation137_spill] sm:$0xff] %v3058_v15  ;;  %4035 = vst [vmem:[#allocation138_spill] sm:$0xff] %v3062_v45  ;;  %v4043_v60 = vstv %s4030_s29  ;;  %v4044_v40 = vstv %s4031_s0  ;;  %v1000_v63 = vld [vmem:[#allocation3 + $0x9c] sm:$0xff]  ;;  %v780_v56 = vadd.f32 %v778_v44, %v746_v5  ;;  %v836_v49 = vadd.f32 %v834_v1, %v804_v62  ;;  %v807_v44 = vld [vmem:[#allocation3 + $0x49] sm:$0xff]  ;;  %v556_v1 = vpop.permute.xlu1 %555 }
 0x1ad   : > { %4037 = vst [vmem:[#allocation139_spill] sm:$0xff] %v3066_v25  ;;  %4039 = vst [vmem:[#allocation140_spill] sm:$0xff] %v3070_v61  ;;  %v946_v36 = vmul.f32 %v4043_v60, %v943_v53  ;;  %v3079_v7 = vmul.f32 %v4044_v40, %v999_v57  ;;  %v892_v35 = vadd.f32 %v890_v48, %v860_v52  ;;  %v4046_v0 = vstv %s4040_s25  ;;  %v1056_v47 = vld [vmem:[#allocation3 + $0x9d] sm:$0xff]  ;;  %v752_v25 = vld [vmem:[#allocation3 + $0x50] sm:$0xff]  ;;  %v696_v48 = vpop.permute.xlu0 %695 }
 0x1ae   : > { %v3083_v61 = vmul.f32 %v4046_v0, %v1055_v54  ;;  %v916_v19 = vadd.f32 %v914_v33, %v884_v30  ;;  %v4047_v4 = vstv %s4041_s11  ;;  %v4050_v60 = vstv %s3875_s13  ;;  %v808_v5 = vld [vmem:[#allocation3 + $0x51] sm:$0xff]  ;;  %563 = vst.msk [vmem:[#allocation3 + $0x70] sm:$0x3f] %vm486_vm9, %v556_v1  ;;  %s4059_s13 = sld [smem:[#allocation79_spill]]  ;;  %703 = vst.msk [vmem:[#allocation3 + $0x130] sm:$0x3f] %vm486_vm9, %v696_v48 }
 0x1af   : > { %v3087_v50 = vmul.f32 %v4047_v4, %v1111_v31  ;;  %v4048_v53 = vstv %s4042_s30  ;;  %v835_v40 = vmul.f32 %v4050_v60, %v832_v55  ;;  %v4053_v62 = vstv %s4020_s18  ;;  %v863_v0 = vld [vmem:[#allocation3 + $0x4a] sm:$0xff]  ;;  %v864_v4 = vld [vmem:[#allocation3 + $0x52] sm:$0xff]  ;;  %s4071_s18 = sld [smem:[#allocation81_spill]] }
 0x1b0   : > { %v3091_v57 = vmul.f32 %v4048_v53, %v1127_v29  ;;  %v891_v52 = vmul.f32 %v4053_v62, %v888_v20  ;;  %v4054_v30 = vstv %s4030_s29  ;;  %v4056_v54 = vstv %s4031_s0  ;;  %v919_v53 = vld [vmem:[#allocation3 + $0x4b] sm:$0xff]  ;;  %s4079_s29 = sld [smem:[#allocation83_spill]]  ;;  %s4179_s0 = sld [smem:[#allocation105_spill]] }
 0x1b1   : > { %v3099_v33 = vmul.f32 %v4054_v30, %v944_v41  ;;  %v3103_v31 = vmul.f32 %v4056_v54, %v1000_v63  ;;  %v4058_v29 = vstv %s4045_s28  ;;  %v4060_v20 = vstv %s4040_s25  ;;  %v1112_v41 = vld [vmem:[#allocation3 + $0x9e] sm:$0xff]  ;;  %s4180_s25 = sld [smem:[#allocation106_spill]] }
 0x1b2   : > { %4049 = vst [vmem:[#allocation141_spill] sm:$0xff] %v3091_v57  ;;  %v810_v55 = vmul.f32 %v4058_v29, %v807_v44  ;;  %v3111_v60 = vmul.f32 %v4060_v20, %v1056_v47  ;;  %v4062_v62 = vstv %s3874_s8  ;;  %v4063_v63 = vstv %s4051_s7  ;;  %s4070_s8 = sld [smem:[#allocation80_spill]]  ;;  %s4222_s7 = sld [smem:[#allocation30_spill]] }
 0x1b3   : > { %4055 = vst [vmem:[#allocation142_spill] sm:$0xff] %v3099_v33  ;;  %4057 = vst [vmem:[#allocation143_spill] sm:$0xff] %v3103_v31  ;;  %v755_v30 = vmul.f32 %v4062_v62, %v752_v25  ;;  %v866_v54 = vmul.f32 %v4063_v63, %v863_v0  ;;  %v920_v31 = vld [vmem:[#allocation3 + $0x53] sm:$0xff]  ;;  %v4064_v44 = vstv %s4052_s23  ;;  %v4065_v45 = vstv %s4045_s28  ;;  %v635_v25 = vpop.permute.xlu1 %634  ;;  %v711_v62 = vpop.permute.xlu0 %710  ;;  %s4221_s28 = sld [smem:[#allocation21_spill]]  ;;  %s4230_s23 = smov 3  }
 0x1b4   : > { %4061 = vst [vmem:[#allocation144_spill] sm:$0xff] %v3111_v60  ;;  %v922_v29 = vmul.f32 %v4064_v44, %v919_v53  ;;  %v975_v33 = vld [vmem:[#allocation3 + $0x4c] sm:$0xff]  ;;  %v811_v57 = vmul.f32 %v4065_v45, %v808_v5  ;;  %v812_v15 = vadd.f32 %v810_v55, %v780_v56  ;;  %v4066_v1 = vmov %v4063_v63  ;;  %v976_v45 = vld [vmem:[#allocation3 + $0x54] sm:$0xff]  ;;  %644 = vst.msk [vmem:[#allocation3 + $0xd8] sm:$0xff] %vm483_vm8, %v635_v25 }
 0x1b5   : > { %v867_v43 = vmul.f32 %v4066_v1, %v864_v4  ;;  %v4067_v11 = vmov %v4064_v44  ;;  %v948_v32 = vadd.f32 %v946_v36, %v916_v19  ;;  %v868_v47 = vadd.f32 %v866_v54, %v836_v49  ;;  %720 = vst.msk [vmem:[#allocation3 + $0x138] sm:$0xff] %vm483_vm8, %v711_v62  ;;  %v1032_v49 = vld [vmem:[#allocation3 + $0x55] sm:$0xff]  ;;  %v1240_v1 = vld [vmem:[#allocation3 + $0xca] sm:$0xff] }
 0x1b6   : > { %v923_v48 = vmul.f32 %v4067_v11, %v920_v31  ;;  %v924_v20 = vadd.f32 %v922_v29, %v892_v35  ;;  %v4068_v60 = vstv %s4059_s13  ;;  %v837_v0 = vadd.f32 %v835_v40, %v805_v38  ;;  %v1088_v40 = vld [vmem:[#allocation3 + $0x56] sm:$0xff]  ;;  %s4232_s13 = smov 125  }
 0x1b7   : > { %v978_v13 = vmul.f32 %v4068_v60, %v975_v33  ;;  %v893_v63 = vadd.f32 %v891_v52, %v861_v24  ;;  %v4069_v23 = vstv %s4041_s11  ;;  %v844_v53 = vadd.f32 %v2575_v14, %v812_v15  ;;  %v1031_v24 = vld [vmem:[#allocation3 + $0x4d] sm:$0xff]  ;;  %s4182_s11 = sld [smem:[#allocation107_spill]] }
 0x1b8   : > { %v3129_v42 = vmul.f32 %v4069_v23, %v1112_v41  ;;  %v3135_v11 = vadd.f32 %v2586_v21, %v755_v30  ;;  %v900_v36 = vadd.f32 %v2577_v16, %v868_v47  ;;  %v956_v56 = vadd.f32 %v2579_v17, %v924_v20  ;;  %v1087_v23 = vld [vmem:[#allocation3 + $0x4e] sm:$0xff]  ;;  %v1136_v21 = vld [vmem:[#allocation3 + $0xe0] sm:$0xff] }
 0x1b9   : > { %v980_v38 = vadd.f32 %v978_v13, %v948_v32  ;;  %v813_v35 = vadd.f32 %v811_v57, %v3023_v34  ;;  %v869_v14 = vadd.f32 %v867_v43, %v837_v0  ;;  %v876_v15 = vadd.f32 %v2952_v46, %v844_v53  ;;  %v1128_v13 = vld [vmem:[#allocation3 + $0xc8] sm:$0xff]  ;;  %v677_v57 = vpop.permute.xlu1 %676  ;;  %v658_v46 = vpop.permute.xlu0 %657 }
 0x1ba   : > { %v925_v19 = vadd.f32 %v923_v48, %v893_v63  ;;  %v932_v5 = vadd.f32 %v2956_v39, %v900_v36  ;;  %v4072_v16 = vmov %v4068_v60  ;;  %v988_v17 = vadd.f32 %v2960_v59, %v956_v56  ;;  %v1183_v43 = vld [vmem:[#allocation3 + $0xc1] sm:$0xff]  ;;  %v1184_v34 = vld [vmem:[#allocation3 + $0xc9] sm:$0xff]  ;;  %684 = vst.msk [vmem:[#allocation3 + $0x118] sm:$0x3f] %vm486_vm9, %v677_v57  ;;  %665 = vst.msk [vmem:[#allocation3 + $0x100] sm:$0x3f] %vm486_vm9, %v658_v46 }
 0x1bb   : > { %v3144_v52 = vmul.f32 %v4072_v16, %v976_v45  ;;  %v1012_v32 = vadd.f32 %v2588_v22, %v980_v38  ;;  %v908_v33 = vadd.f32 %v2908_v37, %v876_v15  ;;  %v4073_v31 = vstv %s4070_s8  ;;  %v1239_v41 = vld [vmem:[#allocation3 + $0xc2] sm:$0xff]  ;;  %v1296_v47 = vld [vmem:[#allocation3 + $0xcb] sm:$0xff]  ;;  %s2186_s8 = smov 13  }
 0x1bc   : > { %v1034_v39 = vmul.f32 %v4073_v31, %v1031_v24  ;;  %v4075_v55 = vmov %v4073_v31  ;;  %v4076_v59 = vstv %s4071_s18  ;;  %v964_v22 = vadd.f32 %v2916_v6, %v932_v5  ;;  %v1295_v48 = vld [vmem:[#allocation3 + $0xc3] sm:$0xff]  ;;  %v984_v57 = vld [vmem:[#allocation3 + $0x6c] sm:$0xff]  ;;  %s2187_s18 = smov 29  }
 0x1bd   : > { %v3153_v4 = vmul.f32 %v4075_v55, %v1032_v49  ;;  %v1090_v60 = vmul.f32 %v4076_v59, %v1087_v23  ;;  %v1020_v30 = vadd.f32 %v2924_v12, %v988_v17  ;;  %v4077_v37 = vmov %v4076_v59  ;;  %v1351_v53 = vld [vmem:[#allocation3 + $0xc4] sm:$0xff]  ;;  %v694_v23 = vpop.permute.xlu1 %693 }
 0x1be   : > { %v3163_v54 = vmul.f32 %v4077_v37, %v1088_v40  ;;  %v4078_v44 = vstv %s2637_s22  ;;  %v940_v20 = vadd.f32 %v2984_v9, %v908_v33  ;;  %v4080_v25 = vstv %s4042_s30  ;;  %v816_v45 = vld [vmem:[#allocation3 + $0x69] sm:$0xff]  ;;  %702 = vst.msk [vmem:[#allocation3 + $0x128] sm:$0xff] %vm483_vm8, %v694_v23  ;;  %s4220_s30 = sld [smem:[#allocation65_spill]] }
 0x1bf   : > { %v3167_v29 = vmul.f32 %v4078_v44, %v1136_v21  ;;  %v3172_v62 = vmul.f32 %v4080_v25, %v1128_v13  ;;  %v4081_v6 = vstv %s4074_s16  ;;  %v996_v36 = vadd.f32 %v2997_v51, %v964_v22  ;;  %v872_v49 = vld [vmem:[#allocation3 + $0x6a] sm:$0xff]  ;;  %s2188_s16 = smov 45  }
 0x1c0   : > { %v3176_v0 = vmul.f32 %v4081_v6, %v1183_v43  ;;  %v4082_v12 = vmov %v4081_v6  ;;  %v1044_v56 = vadd.f32 %v2964_v8, %v1012_v32  ;;  %v1052_v38 = vadd.f32 %v3005_v18, %v1020_v30  ;;  %v928_v8 = vld [vmem:[#allocation3 + $0x6b] sm:$0xff] }
 0x1c1   : > { %v3180_v63 = vmul.f32 %v4082_v12, %v1184_v34  ;;  %v4083_v9 = vstv %s2647_s1  ;;  %v972_v15 = vadd.f32 %v3033_v10, %v940_v20  ;;  %v4085_v5 = vstv %s4079_s29  ;;  %v639_v44 = vpop.permute.xlu1 %638  ;;  %s4125_s1 = sld [smem:[#allocation95_spill]]  ;;  %s2189_s29 = smov 61  }
 0x1c2   : > { %v3187_v24 = vmul.f32 %v4083_v9, %v1239_v41  ;;  %v4084_v40 = vmov %v4083_v9  ;;  %v3196_v16 = vmul.f32 %v4085_v5, %v1295_v48  ;;  %v4086_v17 = vmov %v4085_v5  ;;  %646 = vst.msk [vmem:[#allocation3 + $0xe8] sm:$0x3f] %vm486_vm9, %v639_v44  ;;  %v4098_v9 = vld [vmem:[#allocation131_spill] sm:$0xff]  ;;  %v4109_v44 = vld [vmem:[#allocation138_spill] sm:$0xff] }
 0x1c3   : > { %v3192_v21 = vmul.f32 %v4084_v40, %v1240_v1  ;;  %v3200_v51 = vmul.f32 %v4086_v17, %v1296_v47  ;;  %v1028_v18 = vadd.f32 %v3042_v2, %v996_v36  ;;  %v1084_v32 = vadd.f32 %v3053_v3, %v1052_v38  ;;  %v1352_v3 = vld [vmem:[#allocation3 + $0xcc] sm:$0xff]  ;;  %v4097_v38 = vld [vmem:[#allocation85_spill] sm:$0xff] }
 0x1c4   : > { %v4087_v13 = vstv %s2657_s3  ;;  %v4088_v10 = vstv %s3970_s27  ;;  %v1004_v46 = vadd.f32 %v3079_v7, %v972_v15  ;;  %v845_v33 = vadd.f32 %v2596_v26, %v813_v35  ;;  %v1463_v17 = vld [vmem:[#allocation3 + $0xc6] sm:$0xff]  ;;  %s4124_s3 = sld [smem:[#allocation92_spill]]  ;;  %s4148_s27 = sld [smem:[#allocation27_spill]] }
 0x1c5   : > { %v3207_v43 = vmul.f32 %v4087_v13, %v1351_v53  ;;  %v819_v34 = vmul.f32 %v4088_v10, %v816_v45  ;;  %v4089_v31 = vstv %s3973_s24  ;;  %v901_v59 = vadd.f32 %v2598_v27, %v869_v14  ;;  %v4092_v14 = vld [vmem:[#allocation124_spill] sm:$0xff]  ;;  %v713_v15 = vpop.permute.xlu1 %712  ;;  %v4103_v10 = vld [vmem:[#allocation127_spill] sm:$0xff]  ;;  %s4166_s24 = sld [smem:[#allocation63_spill]] }
 0x1c6   : > { %v875_v55 = vmul.f32 %v4089_v31, %v872_v49  ;;  %v1060_v41 = vadd.f32 %v3083_v61, %v1028_v18  ;;  %v1116_v2 = vadd.f32 %v3087_v50, %v1084_v32  ;;  %v4090_v30 = vstv %s3975_s17  ;;  %v1407_v50 = vld [vmem:[#allocation3 + $0xc5] sm:$0xff]  ;;  %v4099_v49 = vld [vmem:[#allocation126_spill] sm:$0xff]  ;;  %721 = vst.msk [vmem:[#allocation3 + $0x140] sm:$0xff] %vm483_vm8, %v713_v15  ;;  %s4171_s17 = sld [smem:[#allocation103_spill]] }
 0x1c7   : > { %v821_v22 = vadd.f32 %v819_v34, %v3135_v11  ;;  %v931_v37 = vmul.f32 %v4090_v30, %v928_v8  ;;  %v1036_v1 = vadd.f32 %v1034_v39, %v1004_v46  ;;  %v957_v7 = vadd.f32 %v2600_v28, %v925_v19  ;;  %v4093_v11 = vld [vmem:[#allocation70_spill] sm:$0xff]  ;;  %v4095_v28 = vld [vmem:[#allocation125_spill] sm:$0xff]  ;;  %v4096_v45 = vld [vmem:[#allocation76_spill] sm:$0xff] }
 0x1c8   : > { %v877_v48 = vadd.f32 %v875_v55, %v845_v33  ;;  %v4091_v26 = vstv %s3977_s5  ;;  %v1092_v27 = vadd.f32 %v1090_v60, %v1060_v41  ;;  %v1148_v61 = vadd.f32 %v2821_v58, %v1116_v2  ;;  %v1408_v39 = vld [vmem:[#allocation3 + $0xcd] sm:$0xff]  ;;  %v4102_v32 = vld [vmem:[#allocation132_spill] sm:$0xff]  ;;  %s4132_s5 = sld [smem:[#allocation99_spill]] }
 0x1c9   : > { %v987_v35 = vmul.f32 %v4091_v26, %v984_v57  ;;  %v853_v47 = vadd.f32 %v4092_v14, %v821_v22  ;;  %v933_v20 = vadd.f32 %v931_v37, %v901_v59  ;;  %v1068_v25 = vadd.f32 %v4093_v11, %v1036_v1  ;;  %v4101_v8 = vld [vmem:[#allocation130_spill] sm:$0xff]  ;;  %v1159_v59 = vld [vmem:[#allocation3 + $0x120] sm:$0xff]  ;;  %v4106_v41 = vld [vmem:[#allocation137_spill] sm:$0xff] }
 0x1ca   : > { %v4094_v6 = vmov %v4087_v13  ;;  %v909_v19 = vadd.f32 %v4095_v28, %v877_v48  ;;  %v1124_v36 = vadd.f32 %v4096_v45, %v1092_v27  ;;  %v1180_v60 = vadd.f32 %v4097_v38, %v1148_v61  ;;  %v4104_v57 = vld [vmem:[#allocation110_spill] sm:$0xff]  ;;  %v4108_v30 = vld [vmem:[#allocation141_spill] sm:$0xff]  ;;  %v1135_v61 = vld [vmem:[#allocation3 + $0xd8] sm:$0xff] }
 0x1cb   : > { %v3230_v12 = vmul.f32 %v4094_v6, %v1352_v3  ;;  %v989_v53 = vadd.f32 %v987_v35, %v957_v7  ;;  %v885_v58 = vadd.f32 %v4098_v9, %v853_v47  ;;  %v965_v23 = vadd.f32 %v4099_v49, %v933_v20  ;;  %v1464_v55 = vld [vmem:[#allocation3 + $0xce] sm:$0xff]  ;;  %v4111_v35 = vld [vmem:[#allocation128_spill] sm:$0xff]  ;;  %v4115_v6 = vld [vmem:[#allocation139_spill] sm:$0xff] }
 0x1cc   : > { %v4100_v40 = vstv %s2659_s19  ;;  %v1100_v18 = vadd.f32 %v4101_v8, %v1068_v25  ;;  %v941_v13 = vadd.f32 %v4102_v32, %v909_v19  ;;  %v1156_v46 = vadd.f32 %v4104_v57, %v1124_v36  ;;  %v4107_v3 = vld [vmem:[#allocation133_spill] sm:$0xff]  ;;  %v4110_v7 = vld [vmem:[#allocation134_spill] sm:$0xff]  ;;  %v715_v19 = vpop.permute.xlu1 %714  ;;  %v1191_v32 = vld [vmem:[#allocation3 + $0xd9] sm:$0xff]  ;;  %s4137_s19 = sld [smem:[#allocation36_spill]] }
 0x1cd   : > { %v3239_v5 = vmul.f32 %v4100_v40, %v1407_v50  ;;  %v1021_v34 = vadd.f32 %v4103_v10, %v989_v53  ;;  %v4105_v33 = vmov %v4100_v40  ;;  %v917_v2 = vadd.f32 %v4106_v41, %v885_v58  ;;  %v1040_v48 = vld [vmem:[#allocation3 + $0x6d] sm:$0xff]  ;;  %v4112_v50 = vld [vmem:[#allocation119_spill] sm:$0xff]  ;;  %v4119_v58 = vld [vmem:[#allocation140_spill] sm:$0xff]  ;;  %722 = vst.msk [vmem:[#allocation3 + $0x148] sm:$0x3f] %vm486_vm9, %v715_v19 }
 0x1ce   : > { %v3248_v31 = vmul.f32 %v4105_v33, %v1408_v39  ;;  %v997_v22 = vadd.f32 %v4107_v3, %v965_v23  ;;  %v1132_v37 = vadd.f32 %v4108_v30, %v1100_v18  ;;  %v973_v1 = vadd.f32 %v4109_v44, %v941_v13  ;;  %v4114_v11 = vld [vmem:[#allocation142_spill] sm:$0xff]  ;;  %v4121_v40 = vld [vmem:[#allocation135_spill] sm:$0xff]  ;;  %v4127_v30 = vld [vmem:[#allocation144_spill] sm:$0xff] }
 0x1cf   : > { %v1053_v26 = vadd.f32 %v4110_v7, %v1021_v34  ;;  %v1076_v27 = vadd.f32 %v4111_v35, %v1044_v56  ;;  %v1212_v14 = vadd.f32 %v4112_v50, %v1180_v60  ;;  %v4113_v47 = vstv %s2665_s2  ;;  %v1096_v28 = vld [vmem:[#allocation3 + $0x6e] sm:$0xff]  ;;  %v4118_v56 = vld [vmem:[#allocation143_spill] sm:$0xff]  ;;  %s4144_s2 = sld [smem:[#allocation26_spill]] }
 0x1d0   : > { %v3259_v20 = vmul.f32 %v4113_v47, %v1463_v17  ;;  %v949_v25 = vadd.f32 %v4114_v11, %v917_v2  ;;  %v1029_v39 = vadd.f32 %v4115_v6, %v997_v22  ;;  %v4116_v53 = vmov %v4113_v47  ;;  %v1167_v13 = vld [vmem:[#allocation3 + $0x138] sm:$0xff] }
 0x1d1   : > { %v3265_v45 = vmul.f32 %v4116_v53, %v1464_v55  ;;  %v4117_v36 = vstv %s3894_s9  ;;  %v1005_v9 = vadd.f32 %v4118_v56, %v973_v1  ;;  %v1085_v49 = vadd.f32 %v4119_v58, %v1053_v26  ;;  %v1359_v41 = vld [vmem:[#allocation3 + $0xdc] sm:$0xff]  ;;  %v1376_v19 = vld [vmem:[#allocation3 + $0x114] sm:$0xff] }
 0x1d2   : > { %v1162_v38 = vmul.f32 %v4117_v36, %v1159_v59  ;;  %v981_v60 = vadd.f32 %v3144_v52, %v949_v25  ;;  %v4120_v23 = vstv %s3978_s12  ;;  %v1108_v17 = vadd.f32 %v4121_v40, %v1076_v27  ;;  %v1247_v59 = vld [vmem:[#allocation3 + $0xda] sm:$0xff]  ;;  %s4172_s12 = sld [smem:[#allocation104_spill]] }
 0x1d3   : > { %v1043_v15 = vmul.f32 %v4120_v23, %v1040_v48  ;;  %v4122_v8 = vstv %s2637_s22  ;;  %v3279_v10 = vadd.f32 %v3176_v0, %v1156_v46  ;;  %v1037_v57 = vadd.f32 %v3153_v4, %v1005_v9  ;;  %v1303_v52 = vld [vmem:[#allocation3 + $0xdb] sm:$0xff]  ;;  %s4138_s22 = sld [smem:[#allocation25_spill]] }
 0x1d4   : > { %v1138_v18 = vmul.f32 %v4122_v8, %v1135_v61  ;;  %v1164_v34 = vadd.f32 %v1162_v38, %v1132_v37  ;;  %v4123_v33 = vstv %s3980_s4  ;;  %v3285_v2 = vadd.f32 %v3187_v24, %v1212_v14  ;;  %v4126_v3 = vld [vmem:[#allocation73_spill] sm:$0xff]  ;;  %v4128_v37 = vld [vmem:[#allocation77_spill] sm:$0xff]  ;;  %s4131_s4 = sld [smem:[#allocation98_spill]] }
 0x1d5   : > { %v1099_v55 = vmul.f32 %v4123_v33, %v1096_v28  ;;  %v1013_v22 = vadd.f32 %v4126_v3, %v981_v60  ;;  %v1061_v44 = vadd.f32 %v4127_v30, %v1029_v39  ;;  %v1415_v46 = vld [vmem:[#allocation3 + $0xdd] sm:$0xff]  ;;  %v1069_v1 = vadd.f32 %v4128_v37, %v1037_v57  ;;  %v1208_v61 = vld [vmem:[#allocation3 + $0x111] sm:$0xff]  ;;  %v4145_v57 = vld [vmem:[#allocation96_spill] sm:$0xff] }
 0x1d6   : > { %v1140_v0 = vadd.f32 %v1138_v18, %v1108_v17  ;;  %v4129_v4 = vstv %s3895_s10  ;;  %v1471_v7 = vld [vmem:[#allocation3 + $0xde] sm:$0xff]  ;;  %v4130_v26 = vstv %s3902_s20  ;;  %v1117_v27 = vadd.f32 %v3129_v42, %v1085_v49  ;;  %v1264_v24 = vld [vmem:[#allocation3 + $0x112] sm:$0xff]  ;;  %v1160_v30 = vld [vmem:[#allocation3 + $0x128] sm:$0xff] }
 0x1d7   : > { %v1194_v48 = vmul.f32 %v4129_v4, %v1191_v32  ;;  %v1170_v35 = vmul.f32 %v4130_v26, %v1167_v13  ;;  %v1045_v50 = vadd.f32 %v1043_v15, %v1013_v22  ;;  %v4133_v14 = vstv %s4124_s3  ;;  %v1320_v28 = vld [vmem:[#allocation3 + $0x113] sm:$0xff]  ;;  %v4143_v13 = vld [vmem:[#allocation112_spill] sm:$0xff] }
 0x1d8   : > { %v3297_v47 = vmul.f32 %v4133_v14, %v1247_v59  ;;  %v4134_v11 = vstv %s3898_s26  ;;  %v4135_v6 = vstv %s4125_s1  ;;  %v1101_v42 = vadd.f32 %v1099_v55, %v1069_v1  ;;  %v4136_v38 = vld [vmem:[#allocation111_spill] sm:$0xff]  ;;  %v1215_v26 = vld [vmem:[#allocation3 + $0x121] sm:$0xff] }
 0x1d9   : > { %v3301_v25 = vmul.f32 %v4134_v11, %v1303_v52  ;;  %v3305_v39 = vmul.f32 %v4135_v6, %v1359_v41  ;;  %v3307_v53 = vadd.f32 %v1194_v48, %v1164_v34  ;;  %v1172_v36 = vadd.f32 %v1170_v35, %v1140_v0  ;;  %v1432_v9 = vld [vmem:[#allocation3 + $0x115] sm:$0xff]  ;;  %v4150_v0 = vld [vmem:[#allocation129_spill] sm:$0xff] }
 0x1da   : > { %v1149_v56 = vadd.f32 %v4136_v38, %v1117_v27  ;;  %v1200_v58 = vld [vmem:[#allocation3 + $0xf9] sm:$0xff]  ;;  %v4139_v49 = vstv %s4131_s4  ;;  %v4140_v23 = vstv %s4132_s5  ;;  %v4141_v40 = vstv %s3923_s21  ;;  %s4149_s21 = sld [smem:[#allocation28_spill]]  ;;  %v1271_v35 = vld [vmem:[#allocation3 + $0x122] sm:$0xff] }
 0x1db   : > { %v3312_v60 = vmul.f32 %v4139_v49, %v1415_v46  ;;  %v3316_v15 = vmul.f32 %v4140_v23, %v1471_v7  ;;  %v1211_v17 = vmul.f32 %v4141_v40, %v1208_v61  ;;  %v4142_v8 = vstv %s3926_s14  ;;  %v1256_v32 = vld [vmem:[#allocation3 + $0xfa] sm:$0xff]  ;;  %s4153_s14 = sld [smem:[#allocation59_spill]] }
 0x1dc   : > { %v3322_v18 = vmul.f32 %v4142_v8, %v1264_v24  ;;  %v1204_v34 = vadd.f32 %v4143_v13, %v1172_v36  ;;  %v1181_v33 = vadd.f32 %v4145_v57, %v1149_v56  ;;  %v4146_v55 = vstv %s3929_s6  ;;  %v1312_v3 = vld [vmem:[#allocation3 + $0xfb] sm:$0xff]  ;;  %s4157_s6 = sld [smem:[#allocation29_spill]]  ;;  %v4160_v56 = vld [vmem:[#allocation84_spill] sm:$0xff]  ;;  %v1327_v13 = vld [vmem:[#allocation3 + $0x123] sm:$0xff] }
 0x1dd   : > { %v3328_v59 = vmul.f32 %v4146_v55, %v1320_v28  ;;  %v4147_v52 = vstv %s3930_s15  ;;  %v1368_v22 = vld [vmem:[#allocation3 + $0xfc] sm:$0xff]  ;;  %v1077_v46 = vadd.f32 %v4150_v0, %v1045_v50  ;;  %v4151_v37 = vstv %s4137_s19  ;;  %s4154_s15 = sld [smem:[#allocation60_spill]]  ;;  %v1216_v28 = vld [vmem:[#allocation3 + $0x129] sm:$0xff]  ;;  %s4253_s19 = sld [smem:[#allocation15_spill]] }
 0x1de   : > { %v3332_v41 = vmul.f32 %v4147_v52, %v1376_v19  ;;  %v3337_v1 = vmul.f32 %v4151_v37, %v1432_v9  ;;  %v4152_v4 = vstv %s4138_s22  ;;  %v1093_v7 = vadd.f32 %v3163_v54, %v1061_v44  ;;  %v4155_v27 = vld [vmem:[#allocation87_spill] sm:$0xff]  ;;  %v1272_v19 = vld [vmem:[#allocation3 + $0x12a] sm:$0xff] }
 0x1df   : > { %v3341_v48 = vmul.f32 %v4152_v4, %v1200_v58  ;;  %v1236_v61 = vadd.f32 %v4155_v27, %v1204_v34  ;;  %v1213_v24 = vadd.f32 %v1211_v17, %v1181_v33  ;;  %v4156_v14 = vstv %s4144_s2  ;;  %v1424_v50 = vld [vmem:[#allocation3 + $0xfd] sm:$0xff]  ;;  %v1328_v34 = vld [vmem:[#allocation3 + $0x12b] sm:$0xff] }
 0x1e0   : > { %v3347_v11 = vmul.f32 %v4156_v14, %v1256_v32  ;;  %v1133_v6 = vadd.f32 %v3172_v62, %v1101_v42  ;;  %v4158_v36 = vstv %s4148_s27  ;;  %v4159_v54 = vstv %s4149_s21  ;;  %v4163_v8 = vld [vmem:[#allocation120_spill] sm:$0xff]  ;;  %v4167_v52 = vld [vmem:[#allocation118_spill] sm:$0xff] }
 0x1e1   : > { %v3352_v38 = vmul.f32 %v4158_v36, %v1312_v3  ;;  %v3356_v44 = vmul.f32 %v4159_v54, %v1368_v22  ;;  %v1125_v9 = vadd.f32 %v4160_v56, %v1093_v7  ;;  %v4161_v58 = vstv %s3894_s9  ;;  %v1383_v57 = vld [vmem:[#allocation3 + $0x124] sm:$0xff]  ;;  %v1384_v4 = vld [vmem:[#allocation3 + $0x12c] sm:$0xff]  ;;  %s4170_s9 = sld [smem:[#allocation64_spill]] }
 0x1e2   : > { %v1163_v49 = vmul.f32 %v4161_v58, %v1160_v30  ;;  %v4162_v23 = vstv %s4153_s14  ;;  %v1245_v17 = vadd.f32 %v3192_v21, %v1213_v24  ;;  %v1268_v62 = vadd.f32 %v4163_v8, %v1236_v61  ;;  %v1439_v21 = vld [vmem:[#allocation3 + $0x125] sm:$0xff]  ;;  %v1440_v7 = vld [vmem:[#allocation3 + $0x12d] sm:$0xff] }
 0x1e3   : > { %v1218_v40 = vmul.f32 %v4162_v23, %v1215_v26  ;;  %v4164_v42 = vstv %s4154_s15  ;;  %v4165_v33 = vstv %s4157_s6  ;;  %v1157_v3 = vadd.f32 %v4167_v52, %v1125_v9  ;;  %v1495_v24 = vld [vmem:[#allocation3 + $0x126] sm:$0xff]  ;;  %v1496_v14 = vld [vmem:[#allocation3 + $0x12e] sm:$0xff]  ;;  %s4256_s22 = sshll.u32 %s4253_s19, 3 }
 0x1e4   : > { %v1274_v32 = vmul.f32 %v4164_v42, %v1271_v35  ;;  %v3369_v55 = vmul.f32 %v4165_v33, %v1424_v50  ;;  %v4168_v22 = vmov %v4162_v23  ;;  %v4169_v0 = vmov %v4164_v42  ;;  %v1248_v9 = vld [vmem:[#allocation3 + $0xe2] sm:$0xff]  ;;  %v1223_v42 = vld [vmem:[#allocation3 + $0x139] sm:$0xff]  ;;  %s1900_s2 = scalar_lea.vmem [#allocation11], %s4256_s22 }
 0x1e5   : > { %v1219_v30 = vmul.f32 %v4168_v22, %v1216_v28  ;;  %v1275_v37 = vmul.f32 %v4169_v0, %v1272_v19  ;;  %v1165_v26 = vadd.f32 %v1163_v49, %v1133_v6  ;;  %v1220_v35 = vadd.f32 %v1218_v40, %v3279_v10  ;;  %v1192_v6 = vld [vmem:[#allocation3 + $0xe1] sm:$0xff] }
 0x1e6   : > { %v1276_v27 = vadd.f32 %v1274_v32, %v3285_v2  ;;  %v1300_v61 = vadd.f32 %v3196_v16, %v1268_v62  ;;  %v1189_v50 = vadd.f32 %v3180_v63, %v1157_v3  ;;  %v4173_v19 = vstv %s4166_s24  ;;  %v1304_v10 = vld [vmem:[#allocation3 + $0xe3] sm:$0xff]  ;;  %v1279_v3 = vld [vmem:[#allocation3 + $0x13a] sm:$0xff] }
 0x1e7   : > { %v1277_v28 = vadd.f32 %v1275_v37, %v1245_v17  ;;  %v1330_v36 = vmul.f32 %v4173_v19, %v1327_v13  ;;  %v4174_v54 = vmov %v4173_v19  ;;  %v4175_v2 = vstv %s4170_s9  ;;  %v1360_v8 = vld [vmem:[#allocation3 + $0xe4] sm:$0xff]  ;;  %v1335_v22 = vld [vmem:[#allocation3 + $0x13b] sm:$0xff] }
 0x1e8   : > { %v3384_v56 = vmul.f32 %v4174_v54, %v1328_v34  ;;  %v3388_v16 = vmul.f32 %v4175_v2, %v1383_v57  ;;  %v4176_v58 = vmov %v4175_v2  ;;  %v4177_v63 = vstv %s4171_s17  ;;  %v1168_v62 = vld [vmem:[#allocation3 + $0x140] sm:$0xff] }
 0x1e9   : > { %v3392_v49 = vmul.f32 %v4176_v58, %v1384_v4  ;;  %v3396_v23 = vmul.f32 %v4177_v63, %v1439_v21  ;;  %v4178_v40 = vmov %v4177_v63  ;;  %v1221_v32 = vadd.f32 %v1219_v30, %v1189_v50  ;;  %v4187_v54 = vld [vmem:[#allocation136_spill] sm:$0xff] }
 0x1ea   : > { %v3400_v17 = vmul.f32 %v4178_v40, %v1440_v7  ;;  %v1332_v13 = vadd.f32 %v1330_v36, %v1300_v61  ;;  %v4181_v34 = vstv %s4172_s12  ;;  %v4184_v0 = vstv %s3895_s10  ;;  %s4203_s10 = sld [smem:[#allocation109_spill]] }
 0x1eb   : > { %v3404_v57 = vmul.f32 %v4181_v34, %v1495_v24  ;;  %v4183_v33 = vmov %v4181_v34  ;;  %v1195_v37 = vmul.f32 %v4184_v0, %v1192_v6  ;;  %v4185_v4 = vstv %s4124_s3  ;;  %s2190_s3 = smov 77  }
 0x1ec   : > { %v3408_v52 = vmul.f32 %v4183_v33, %v1496_v14  ;;  %v1251_v21 = vmul.f32 %v4185_v4, %v1248_v9  ;;  %v4186_v7 = vstv %s3898_s26  ;;  %v1109_v2 = vadd.f32 %v4187_v54, %v1077_v46  ;;  %s4193_s26 = sld [smem:[#allocation108_spill]]  ;;  %v1391_v46 = vld [vmem:[#allocation3 + $0x13c] sm:$0xff] }
 0x1ed   : > { %v1307_v19 = vmul.f32 %v4186_v7, %v1304_v10  ;;  %v4188_v58 = vstv %s4125_s1  ;;  %v4189_v61 = vstv %s3902_s20  ;;  %v4190_v24 = vstv %s4179_s0  ;;  %v1280_v33 = vld [vmem:[#allocation3 + $0x142] sm:$0xff]  ;;  %s4213_s20 = sld [smem:[#allocation86_spill]]  ;;  %s2191_s1 = smov 93  }
 0x1ee   : > { %v3419_v30 = vmul.f32 %v4188_v58, %v1360_v8  ;;  %v1171_v50 = vmul.f32 %v4189_v61, %v1168_v62  ;;  %v1226_v36 = vmul.f32 %v4190_v24, %v1223_v42  ;;  %v1252_v14 = vadd.f32 %v3297_v47, %v1220_v35  ;;  %v1224_v8 = vld [vmem:[#allocation3 + $0x141] sm:$0xff]  ;;  %s69_s0 = sadd.s32 1, %s4253_s19  }
 0x1ef   : > { %v1141_v63 = vadd.f32 %v3167_v29, %v1109_v2  ;;  %v4191_v40 = vstv %s4180_s25  ;;  %v1308_v6 = vadd.f32 %v3301_v25, %v1276_v27  ;;  %v4192_v9 = vstv %s4182_s11  ;;  %v1336_v29 = vld [vmem:[#allocation3 + $0x143] sm:$0xff]  ;;  %p66_p13 = scmp.ge.s32.totalorder %s69_s0, 2  }
 0x1f0   : > { %v1282_v34 = vmul.f32 %v4191_v40, %v1279_v3  ;;  %v1338_v10 = vmul.f32 %v4192_v9, %v1335_v22  ;;  %v1197_v0 = vadd.f32 %v1195_v37, %v1165_v26  ;;  %v1253_v62 = vadd.f32 %v1251_v21, %v1221_v32  ;;  %v1416_v35 = vld [vmem:[#allocation3 + $0xe5] sm:$0xff]  ;;  %v4198_v37 = vld [vmem:[#allocation114_spill] sm:$0xff]  ;;  %s2193_s27 = smov (%p66_p13), [#allocation11]  }
 0x1f1   : > { %v1309_v42 = vadd.f32 %v1307_v19, %v1277_v28  ;;  %v1228_v47 = vadd.f32 %v1226_v36, %v3307_v53  ;;  %v1173_v3 = vadd.f32 %v1171_v50, %v1141_v63  ;;  %v1364_v27 = vadd.f32 %v3305_v39, %v1332_v13  ;;  %v4194_v22 = vld [vmem:[#allocation113_spill] sm:$0xff]  ;;  %v4199_v53 = vld [vmem:[#allocation115_spill] sm:$0xff]  ;;  %s1907_s21 = sshll.u32 (%p66_p13), %s2193_s27, 4  ;;  %s1908_s21 = int_to_ptr.vmem [resolvable:$true] %s1907_s21 }
 0x1f2   : > { %v1284_v4 = vadd.f32 %v1282_v34, %v1252_v14  ;;  %v1340_v25 = vadd.f32 %v1338_v10, %v1308_v6  ;;  %v4195_v54 = vstv %s4193_s26  ;;  %v4196_v58 = vmov %v4190_v24  ;;  %v1472_v39 = vld [vmem:[#allocation3 + $0xe6] sm:$0xff]  ;;  %v4204_v6 = vld [vmem:[#allocation97_spill] sm:$0xff]  ;;  %s2130_s14 = scalar_lea.vmem (%p66_p13), %s1908_s21, 256  ;;  %p2135_p1 = scmp.lt.s32.totalorder (%p66_p13), %s1908_s21, %s1908_s21 }
 0x1f3   : > { %v1260_v7 = vadd.f32 %v4194_v22, %v1228_v47  ;;  %v1394_v2 = vmul.f32 %v4195_v54, %v1391_v46  ;;  %v1227_v61 = vmul.f32 %v4196_v58, %v1224_v8  ;;  %v4197_v26 = vmov %v4191_v40  ;;  %v4202_v13 = vld [vmem:[#allocation88_spill] sm:$0xff]  ;;  %v4205_v10 = vld [vmem:[#allocation89_spill] sm:$0xff]  ;;  %p2131_p0 = scmp.ne.s32.totalorder (%p66_p13), %s1908_s21, %s2130_s14  ;;  %p2136_p2 = scmp.lt.s32.totalorder (%p66_p13), %s2130_s14, %s2130_s14 }
 0x1f4   : > { %v1283_v32 = vmul.f32 %v4197_v26, %v1280_v33  ;;  %v1205_v28 = vadd.f32 %v3341_v48, %v1173_v3  ;;  %v1316_v21 = vadd.f32 %v4198_v37, %v1284_v4  ;;  %v1372_v19 = vadd.f32 %v4199_v53, %v1340_v25  ;;  %v4206_v48 = vld [vmem:[#allocation90_spill] sm:$0xff]  ;;  %v4207_v3 = vld [vmem:[#allocation121_spill] sm:$0xff] }
 0x1f5   : > { %v4200_v24 = vmov %v4192_v9  ;;  %v4201_v36 = vstv %s4131_s4  ;;  %v1292_v63 = vadd.f32 %v4202_v13, %v1260_v7  ;;  %v1229_v40 = vadd.f32 %v1227_v61, %v1197_v0  ;;  %v1447_v33 = vld [vmem:[#allocation3 + $0x13d] sm:$0xff]  ;;  %s2192_s4 = smov 109   ;;  %p2137_p3 = por (%p66_p13), %p2136_p2, %p2135_p1 }
 0x1f6   : > { %v1339_v50 = vmul.f32 %v4200_v24, %v1336_v29  ;;  %v1419_v14 = vmul.f32 %v4201_v36, %v1416_v35  ;;  %v1285_v34 = vadd.f32 %v1283_v32, %v1253_v62  ;;  %v1237_v9 = vadd.f32 %v4204_v6, %v1205_v28  ;;  %v4209_v62 = vld [vmem:[#allocation122_spill] sm:$0xff]  ;;  %v4211_v32 = vld [vmem:[#allocation100_spill] sm:$0xff]  ;;  %v1448_v36 = vld [vmem:[#allocation3 + $0x145] sm:$0xff] }
 0x1f7   : > { %v1348_v46 = vadd.f32 %v4205_v10, %v1316_v21  ;;  %v1404_v8 = vadd.f32 %v4206_v48, %v1372_v19  ;;  %v1324_v4 = vadd.f32 %v4207_v3, %v1292_v63  ;;  %v1396_v25 = vadd.f32 %v1394_v2, %v1364_v27  ;;  %v4214_v2 = vld [vmem:[#allocation102_spill] sm:$0xff]  ;;  %v4215_v53 = vld [vmem:[#allocation123_spill] sm:$0xff]  ;;  %v4223_v3 = vld [vmem:[#allocation93_spill] sm:$0xff]  ;;  %p2138_p4 = pnand (%p66_p13), %p2137_p3, %p2131_p0 }
 0x1f8   : > { %v1341_v47 = vadd.f32 %v1339_v50, %v1309_v42  ;;  %v1261_v29 = vadd.f32 %v3347_v11, %v1229_v40  ;;  %v1317_v35 = vadd.f32 %v3352_v38, %v1285_v34  ;;  %v4208_v22 = vstv %s4132_s5  ;;  %v4212_v42 = vld [vmem:[#allocation101_spill] sm:$0xff]  ;;  %s4252_s5 = sld [smem:[#allocation16_spill]] }
 0x1f9   : > { %v1475_v7 = vmul.f32 %v4208_v22, %v1472_v39  ;;  %v1269_v0 = vadd.f32 %v3322_v18, %v1237_v9  ;;  %v1380_v54 = vadd.f32 %v4209_v62, %v1348_v46  ;;  %v4210_v61 = vstv %s4203_s10  ;;  %v1503_v11 = vld [vmem:[#allocation3 + $0x13e] sm:$0xff] }
 0x1fa   : > { %v1373_v58 = vadd.f32 %v3356_v44, %v1341_v47  ;;  %v1450_v26 = vmul.f32 %v4210_v61, %v1447_v33  ;;  %v1293_v28 = vadd.f32 %v4211_v32, %v1261_v29  ;;  %v1349_v37 = vadd.f32 %v4212_v42, %v1317_v35  ;;  %v1392_v50 = vld [vmem:[#allocation3 + $0x144] sm:$0xff] }
 0x1fb   : > { %v1356_v27 = vadd.f32 %v3207_v43, %v1324_v4  ;;  %v1301_v38 = vadd.f32 %v3200_v51, %v1269_v0  ;;  %v1412_v18 = vadd.f32 %v3239_v5, %v1380_v54  ;;  %v1436_v19 = vadd.f32 %v4215_v53, %v1404_v8  ;;  %v4216_v39 = vld [vmem:[#allocation116_spill] sm:$0xff]  ;;  %v1487_v8 = vld [vmem:[#allocation3 + $0x10e] sm:$0xff] }
 0x1fc   : > { %v1405_v21 = vadd.f32 %v4214_v2, %v1373_v58  ;;  %v1325_v44 = vadd.f32 %v3328_v59, %v1293_v28  ;;  %v1381_v24 = vadd.f32 %v3332_v41, %v1349_v37  ;;  %v1428_v13 = vadd.f32 %v4216_v39, %v1396_v25  ;;  %v4225_v0 = vld [vmem:[#allocation117_spill] sm:$0xff] }
 0x1fd   : > { %v1388_v43 = vadd.f32 %v3388_v16, %v1356_v27  ;;  %v1333_v51 = vadd.f32 %v3384_v56, %v1301_v38  ;;  %v1444_v63 = vadd.f32 %v3396_v23, %v1412_v18  ;;  %v1468_v5 = vadd.f32 %v3259_v20, %v1436_v19  ;;  %v1504_v23 = vld [vmem:[#allocation3 + $0x146] sm:$0xff] }
 0x1fe   : > { %v1437_v40 = vadd.f32 %v3337_v1, %v1405_v21  ;;  %v4217_v34 = vstv %s4213_s20  ;;  %v1357_v41 = vadd.f32 %v3230_v12, %v1325_v44  ;;  %v1413_v9 = vadd.f32 %v3248_v31, %v1381_v24  ;;  %v1456_v12 = vld [vmem:[#allocation3 + $0xb6] sm:$0xff] }
 0x1ff   : > { %v1506_v6 = vmul.f32 %v4217_v34, %v1503_v11  ;;  %v1420_v59 = vadd.f32 %v3312_v60, %v1388_v43  ;;  %v1365_v16 = vadd.f32 %v3419_v30, %v1333_v51  ;;  %v4218_v10 = vstv %s4193_s26  ;;  %v1480_v30 = vld [vmem:[#allocation3 + $0xfe] sm:$0xff] }
 0x200   : > { %v1395_v46 = vmul.f32 %v4218_v10, %v1392_v50  ;;  %v4219_v48 = vmov %v4210_v61  ;;  %v1476_v20 = vadd.f32 %v3316_v15, %v1444_v63  ;;  %v1389_v33 = vadd.f32 %v3392_v49, %v1357_v41  ;;  %v1488_v15 = vld [vmem:[#allocation3 + $0x116] sm:$0xff] }
 0x201   : > { %v1451_v56 = vmul.f32 %v4219_v48, %v1448_v36  ;;  %v1452_v1 = vadd.f32 %v1450_v26, %v1420_v59  ;;  %v1445_v60 = vadd.f32 %v3400_v17, %v1413_v9  ;;  %v1469_v31 = vadd.f32 %v3265_v45, %v1437_v40 }
 0x202   : > { %v1397_v47 = vadd.f32 %v1395_v46, %v1365_v16  ;;  %v1460_v4 = vadd.f32 %v4223_v3, %v1428_v13  ;;  %v1500_v25 = vadd.f32 %v3404_v57, %v1468_v5  ;;  %v1508_v29 = vadd.f32 %v1506_v6, %v1476_v20 }
 0x203   : > { %v4224_v35 = vmov %v4217_v34  ;;  %v1484_v49 = vadd.f32 %v4225_v0, %v1452_v1  ;;  %v1421_v62 = vadd.f32 %v1419_v14, %v1389_v33  ;;  %v1477_v17 = vadd.f32 %v1475_v7, %v1445_v60  ;;  %v4231_v34 = vld [vmem:[#allocation18_spill] sm:$0xff] }
 0x204   : > { %v1507_v22 = vmul.f32 %v4224_v35, %v1504_v23  ;;  %v4226_v54 = vstv %s4220_s30  ;;  %v1510_v61 = vadd.f32 %v1508_v29, %v1500_v25  ;;  %v1429_v45 = vadd.f32 %v3369_v55, %v1397_v47 }
 0x205   : > { %v1490_v58 = vmul.f32 %v4226_v54, %v1487_v8  ;;  %v4227_v26 = vstv %s4221_s28  ;;  %v4228_v28 = vstv %s4222_s7  ;;  %v1453_v37 = vadd.f32 %v1451_v56, %v1421_v62 }
 0x206   : > { %v1459_v32 = vmul.f32 %v4227_v26, %v1456_v12  ;;  %v1483_v42 = vmul.f32 %v4228_v28, %v1480_v30  ;;  %v1501_v57 = vadd.f32 %v3408_v52, %v1469_v31  ;;  %v1509_v27 = vadd.f32 %v1507_v22, %v1477_v17 }
 0x207   : > { %v1492_v11 = vadd.f32 %v1490_v58, %v1460_v4  ;;  %v1512_v38 = vadd.f32 %v1510_v61, %v1484_v49  ;;  %v4229_v21 = vmov %v4226_v54  ;;  %v4233_v58 = vlaneseq }
 0x208   : > { %v1461_v2 = vadd.f32 %v1459_v32, %v1429_v45  ;;  %v1491_v18 = vmul.f32 %v4229_v21, %v1488_v15  ;;  %v1485_v14 = vadd.f32 %v1483_v42, %v1453_v37  ;;  %v1511_v7 = vadd.f32 %v1509_v27, %v1501_v57 }
 0x209   : > { %v1514_v53 = vadd.f32 %v1512_v38, %v1492_v11  ;;  %vm1559_vm11 = vcmp.lt.s32.totalorder %v4233_v58, 16  ;;  %vm3528_vm12 = vcmp.ge.s32.totalorder %v4233_v58, 16  ;;  %vm1582_vm13 = vcmp.lt.s32.totalorder %v4233_v58, 32 }
 0x20a   : > { %v1493_v19 = vadd.f32 %v1491_v18, %v1461_v2  ;;  %v1513_v44 = vadd.f32 %v1511_v7, %v1485_v14  ;;  %vm1583_vm14 = vmand %vm3528_vm12, %vm1582_vm13  ;;  %vm3536_vm15 = vcmp.ge.s32.totalorder %v4233_v58, 32  ;;  %vm3541_vm0 = vcmp.lt.s32.totalorder %v4233_v58, 48 }
 0x20b   : > { %v2030_v24 = vmul.f32 -1.442695, %v1514_v53  ;;  %vm1606_vm1 = vmand %vm3536_vm15, %vm3541_vm0  ;;  %vm3550_vm2 = vcmp.ge.s32.totalorder %v4233_v58, 48  ;;  %vm3555_vm3 = vcmp.lt.s32.totalorder %v4233_v58, 64  ;;  %vm3564_vm5 = vcmp.ge.s32.totalorder %v4233_v58, 64 }
 0x20c   : > { %v1515_v55 = vadd.f32 %v1513_v44, %v1493_v19  ;;  %vm1629_vm4 = vmand %vm3550_vm2, %vm3555_vm3  ;;  %vm3569_vm6 = vcmp.lt.s32.totalorder %v4233_v58, 80  ;;  %vm3578_vm8 = vcmp.ge.s32.totalorder %v4233_v58, 80  ;;  %vm3583_vm9 = vcmp.lt.s32.totalorder %v4233_v58, 96 }
 0x20d   : > { %2088 = vpow2.f32 %v2030_v24  ;;  %vm1652_vm7 = vmand %vm3564_vm5, %vm3569_vm6  ;;  %vm1697_vm12 = vcmp.lt.s32.totalorder %v4233_v58, 112  ;;  %vm1720_vm15 = vcmp.lt.s32.totalorder %v4233_v58, 128 }
 0x20e   : > { %v2031_v50 = vmul.f32 -1.442695, %v1515_v55 }
 0x210   : > { %2090 = vpow2.f32 %v2031_v50 }
 0x217   : > { %v2089_v36 = vpop.eup %2088 }
 0x218   : > { %v1522_v43 = vadd.f32 1.0, %v2089_v36 }
 0x21a   : > { %v2091_v39 = vpop.eup %2090  ;;  %2092 = vrcp.f32 %v1522_v43 }
 0x21b   : > { %v1523_v52 = vadd.f32 1.0, %v2091_v39 }
 0x21d   : > { %2094 = vrcp.f32 %v1523_v52  ;;  %v4254_v52 = vld [vmem:[#allocation17_spill] sm:$0xff] }
 0x224   : > { %v2093_v13 = vpop.eup %2092 }
 0x225   : > { %1530 = vrot.lane.b32.xlu0 %v2093_v13, %s4230_s23  ;;  %v1894_v13 = vsub.s32 1, %v4254_v52 }
 0x227   : > { %v2095_v51 = vpop.eup %2094 }
 0x228   : > { %1532 = vrot.lane.b32.xlu1 %v2095_v51, %s4230_s23 }
 0x297   : > { %v1531_v63 = vpop.permute.xlu0 %1530 }
 0x298   : > { %1537 = vst.msk [vmem:[#allocation2 + $0x3] sm:$0xff] %vm1536_vm10, %v1531_v63  ;;  %v4255_v63 = vld [vmem:[#allocation19_spill] sm:$0xff] }
 0x29a   : > { %v1533_v5 = vpop.permute.xlu1 %1532 }
 0x29b   : > { %1538 = vst.msk [vmem:[#allocation2 + $0xb] sm:$0xff] %vm1536_vm10, %v1533_v5  ;;  %vm1675_vm10 = vmand %vm3578_vm8, %vm3583_vm9 }
 0x29f   : > { %v2032_v40 = vld.sshfl [vmem:[#allocation2 + $0x3] sm:$0x1 pattern:$0x75316420] }
 0x2a0   : > { %v1555_v6 = vrot.slane %v2032_v40, %v4231_v34  ;;  %v2033_v59 = vld.sshfl [vmem:[#allocation2 + $0x4] sm:$0x1 pattern:$0x75316420] }
 0x2a1   : > { %v1577_v16 = vrot.slane %v2033_v59, %v4231_v34  ;;  %v2034_v46 = vld.sshfl [vmem:[#allocation2 + $0x5] sm:$0x1 pattern:$0x75316420] }
 0x2a2   : > { %1556 = vrot.lane.b32.xlu0 %v1555_v6, %s4232_s13  ;;  %v2040_v41 = vld.sshfl [vmem:[#allocation2 + $0xb] sm:$0x1 pattern:$0x75316420]  ;;  %v1600_v56 = vrot.slane %v2034_v46, %v4231_v34 }
 0x2a3   : > { %v1738_v9 = vrot.slane %v2040_v41, %v4231_v34  ;;  %v2041_v10 = vld.sshfl [vmem:[#allocation2 + $0xc] sm:$0x1 pattern:$0x75316420] }
 0x2a4   : > { %v1759_v48 = vrot.slane %v2041_v10, %v4231_v34  ;;  %v2042_v23 = vld.sshfl [vmem:[#allocation2 + $0xd] sm:$0x1 pattern:$0x75316420] }
 0x2a5   : > { %1739 = vrot.lane.b32.xlu1 %v1738_v9, %s4232_s13  ;;  %v2035_v20 = vld.sshfl [vmem:[#allocation2 + $0x6] sm:$0x1 pattern:$0x75316420]  ;;  %v1779_v8 = vrot.slane %v2042_v23, %v4231_v34 }
 0x2a6   : > { %1578 = vrot.lane.b32.xlu0 %v1577_v16, %s2186_s8  ;;  %v1623_v1 = vrot.slane %v2035_v20, %v4231_v34  ;;  %v2043_v33 = vld.sshfl [vmem:[#allocation2 + $0xe] sm:$0x1 pattern:$0x75316420] }
 0x2a7   : > { %v2036_v60 = vld.sshfl [vmem:[#allocation2 + $0x7] sm:$0x1 pattern:$0x75316420]  ;;  %v1799_v12 = vrot.slane %v2043_v33, %v4231_v34 }
 0x2a8   : > { %v1646_v31 = vrot.slane %v2036_v60, %v4231_v34  ;;  %v2044_v30 = vld.sshfl [vmem:[#allocation2 + $0xf] sm:$0x1 pattern:$0x75316420] }
 0x2a9   : > { %1760 = vrot.lane.b32.xlu1 %v1759_v48, %s2186_s8  ;;  %v2037_v47 = vld.sshfl [vmem:[#allocation2 + $0x8] sm:$0x1 pattern:$0x75316420]  ;;  %v1819_v3 = vrot.slane %v2044_v30, %v4231_v34 }
 0x2aa   : > { %1601 = vrot.lane.b32.xlu0 %v1600_v56, %s2187_s18  ;;  %v1669_v4 = vrot.slane %v2037_v47, %v4231_v34  ;;  %v2045_v25 = vld.sshfl [vmem:[#allocation2 + $0x10] sm:$0x1 pattern:$0x75316420] }
 0x2ab   : > { %v2038_v29 = vld.sshfl [vmem:[#allocation2 + $0x9] sm:$0x1 pattern:$0x75316420]  ;;  %v1839_v15 = vrot.slane %v2045_v25, %v4231_v34 }
 0x2ac   : > { %v1692_v35 = vrot.slane %v2038_v29, %v4231_v34  ;;  %v2046_v22 = vld.sshfl [vmem:[#allocation2 + $0x11] sm:$0x1 pattern:$0x75316420] }
 0x2ad   : > { %1780 = vrot.lane.b32.xlu1 %v1779_v8, %s2187_s18  ;;  %v2039_v0 = vld.sshfl [vmem:[#allocation2 + $0xa] sm:$0x1 pattern:$0x75316420]  ;;  %v1859_v49 = vrot.slane %v2046_v22, %v4231_v34 }
 0x2ae   : > { %1624 = vrot.lane.b32.xlu0 %v1623_v1, %s2188_s16  ;;  %v1715_v62 = vrot.slane %v2039_v0, %v4231_v34  ;;  %v2047_v17 = vld.sshfl [vmem:[#allocation2 + $0x12] sm:$0x1 pattern:$0x75316420] }
 0x2af   : > { %v1879_v54 = vrot.slane %v2047_v17, %v4231_v34  ;;  %v1886_v34 = vld [vmem:[%s4252_s5] sm:$0xff] }
 0x2b1   : > { %1800 = vrot.lane.b32.xlu1 %v1799_v12, %s2188_s16 }
 0x2b2   : > { %1647 = vrot.lane.b32.xlu0 %v1646_v31, %s2189_s29 }
 0x2b5   : > { %1820 = vrot.lane.b32.xlu1 %v1819_v3, %s2189_s29 }
 0x2b6   : > { %1670 = vrot.lane.b32.xlu0 %v1669_v4, %s2190_s3 }
 0x2b9   : > { %1840 = vrot.lane.b32.xlu1 %v1839_v15, %s2190_s3 }
 0x2ba   : > { %1693 = vrot.lane.b32.xlu0 %v1692_v35, %s2191_s1 }
 0x2bd   : > { %1860 = vrot.lane.b32.xlu1 %v1859_v49, %s2191_s1 }
 0x2be   : > { %1716 = vrot.lane.b32.xlu0 %v1715_v62, %s2192_s4 }
 0x2c1   : > { %1880 = vrot.lane.b32.xlu1 %v1879_v54, %s2192_s4 }
 0x314   : > { %v1557_v45 = vpop.permute.xlu0 %1556 }
 0x315   : > { %1561 = vst.msk [vmem:[#allocation4 + $0x2] ss:$4 sm:$0x1] %vm1559_vm11, %v1557_v45 }
 0x317   : > { %v1740_v26 = vpop.permute.xlu1 %1739 }
 0x318   : > { %1743 = vst.msk [vmem:[#allocation4 + $0x6] ss:$4 sm:$0x1] %vm1559_vm11, %v1740_v26  ;;  %v1579_v42 = vpop.permute.xlu0 %1578  ;;  %vm1696_vm11 = vcmp.ge.s32.totalorder %v4233_v58, 96 }
 0x319   : > { %1584 = vst.msk [vmem:[#allocation4 + $0x2] ss:$4 sm:$0x1] %vm1583_vm14, %v1579_v42  ;;  %vm1698_vm13 = vmand %vm1696_vm11, %vm1697_vm12 }
 0x31b   : > { %v1761_v37 = vpop.permute.xlu1 %1760 }
 0x31c   : > { %1763 = vst.msk [vmem:[#allocation4 + $0x6] ss:$4 sm:$0x1] %vm1583_vm14, %v1761_v37  ;;  %v1602_v11 = vpop.permute.xlu0 %1601  ;;  %vm1719_vm14 = vcmp.ge.s32.totalorder %v4233_v58, 112 }
 0x31d   : > { %1607 = vst.msk [vmem:[#allocation4 + $0x2] ss:$4 sm:$0x1] %vm1606_vm1, %v1602_v11  ;;  %vm1721_vm0 = vmand %vm1719_vm14, %vm1720_vm15 }
 0x31f   : > { %v1781_v38 = vpop.permute.xlu1 %1780 }
 0x320   : > { %1783 = vst.msk [vmem:[#allocation4 + $0x6] ss:$4 sm:$0x1] %vm1606_vm1, %v1781_v38  ;;  %v1625_v18 = vpop.permute.xlu0 %1624 }
 0x321   : > { %1630 = vst.msk [vmem:[#allocation4 + $0x2] ss:$4 sm:$0x1] %vm1629_vm4, %v1625_v18 }
 0x323   : > { %v1801_v14 = vpop.permute.xlu1 %1800 }
 0x324   : > { %1803 = vst.msk [vmem:[#allocation4 + $0x6] ss:$4 sm:$0x1] %vm1629_vm4, %v1801_v14  ;;  %v1648_v19 = vpop.permute.xlu0 %1647 }
 0x325   : > { %1653 = vst.msk [vmem:[#allocation4 + $0x2] ss:$4 sm:$0x1] %vm1652_vm7, %v1648_v19 }
 0x327   : > { %v1821_v44 = vpop.permute.xlu1 %1820 }
 0x328   : > { %1823 = vst.msk [vmem:[#allocation4 + $0x6] ss:$4 sm:$0x1] %vm1652_vm7, %v1821_v44  ;;  %v1671_v24 = vpop.permute.xlu0 %1670 }
 0x329   : > { %1676 = vst.msk [vmem:[#allocation4 + $0x2] ss:$4 sm:$0x1] %vm1675_vm10, %v1671_v24 }
 0x32b   : > { %v1841_v55 = vpop.permute.xlu1 %1840 }
 0x32c   : > { %1843 = vst.msk [vmem:[#allocation4 + $0x6] ss:$4 sm:$0x1] %vm1675_vm10, %v1841_v55  ;;  %v1694_v50 = vpop.permute.xlu0 %1693 }
 0x32d   : > { %1699 = vst.msk [vmem:[#allocation4 + $0x2] ss:$4 sm:$0x1] %vm1698_vm13, %v1694_v50 }
 0x32f   : > { %v1861_v36 = vpop.permute.xlu1 %1860 }
 0x330   : > { %1863 = vst.msk [vmem:[#allocation4 + $0x6] ss:$4 sm:$0x1] %vm1698_vm13, %v1861_v36  ;;  %v1717_v43 = vpop.permute.xlu0 %1716 }
 0x331   : > { %1722 = vst.msk [vmem:[#allocation4 + $0x2] ss:$4 sm:$0x1] %vm1721_vm0, %v1717_v43 }
 0x333   : > { %v1881_v39 = vpop.permute.xlu1 %1880 }
 0x334   : > { %1883 = vst.msk [vmem:[#allocation4 + $0x6] ss:$4 sm:$0x1] %vm1721_vm0, %v1881_v39 }
 0x33b   : > { %v1885_v51 = vld [vmem:[#allocation4 + $0x2] ss:$4 sm:$0x3] }
 0x33c   : > { %v1891_v5 = vrot.slane %v1885_v51, %v4255_v63  ;;  %v1895_v40 = vrot.slane %v1885_v51, %v1894_v13  ;;  %68 = sbr.rel (!%p66_p13) target bundleno = 46 (0x2e), region = 70 }
 0x33e   : > { %v1896_v6 = vcombine.low %v1891_v5, %v1895_v40 }
 0x340   : > { %v1898_v59 = vmul.f32 %v1896_v6, %v1886_v34 }
 0x342   : > { %1901 = vst [vmem:[%s1900_s2] sm:$0xff] %v1898_v59 }
 0x343   :  { %2141 = shalt.err (!%p2138_p4)
}
 0x344   :  { %s4257_s24 = sld [smem:[#allocation145_spill]] }
 0x34a   :  { %s2142_s9 = scalar_lea.hbm %s4257_s24, 256 }
 0x34b   :  { %p2143_p5 = scmp.ne.s32.totalorder %s4257_s24, %s2142_s9  ;;  %p2146_p6 = scmp.lt.u32.totalorder %s2142_s9, %s4257_s24 }
 0x34d   :  { %p2148_p7 = pnand %p2146_p6, %p2143_p5 }
 0x34f   :  { %2151 = shalt.err (!%p2148_p7)
}
 0x350   :  { %s4258_s11 = smov 8   ;;  %s4259_s26 = smov 128  }
 0x351   :  { %1913 = dma.vmem_to_hbm [thread:$0]  %s1908_s21, 256, %s4257_s24, [#allocation8], %s4259_s26, %s4259_s26, %s4258_s11  }
 0x352   :  { %2160 = dma.done.wait [#allocation8], 256  }
 0x353   :  { %2161 = vsyncadd [#allocation8], 4294967040 }
 0x354   :  { %1917 = vsyncpa [#allocation7], 1 }
 0x355   :  { %1918 = vsyncpa [#allocation8], 1 }
 0x356   :  { %1919 = vsyncpa [#allocation9], 1 }

</bundles_post_ra>
